<compile_context>
chip_gen: v6e
topology: v6e:2x2x1
jax: 0.10.0
libtpu: 0.0.40
codegen_flags: <defaults>
</compile_context>

<pallas_src>
import functools
import math

import jax
import jax.numpy as jnp
from jax.experimental import pallas as pl
from jax.experimental.pallas import tpu as pltpu


def _rope_attention_kernel(x_ref, wqkv_ref, g_ref, c_ref, hsum_ref, hbc_ref,
                           wproj_ref, o_ref, *, H, D, approx_recip):
    """One batch tile: fused qkv matmul + QKNorm + RoPE + head-axis SDPA + proj."""
    Bt, L, dim = x_ref.shape
    R = Bt * L
    mm_dtype = wqkv_ref.dtype

    # packed per-lane constants: rows of the (8, dim) constant block
    c = c_ref[...]
    q_scale = c[0:1, :]
    k_scale = c[1:2, :]
    rope_self = c[2:3, :]     # coefficient of t[c]
    rope_m1 = c[3:4, :]       # coefficient of t[c-1]; zero at even lanes (kills wrap)
    rope_p1 = c[4:5, :]       # coefficient of t[c+1]; zero at odd lanes (kills wrap)
    bproj = c[5:6, :]

    # ---- fused qkv projection: one tall matmul on the MXU (x cast in-kernel) ----
    xf = x_ref[...].reshape(R, dim).astype(mm_dtype)
    qkv = jnp.dot(xf, wqkv_ref[...], preferred_element_type=jnp.float32)   # [R, 3*dim]
    qf = qkv[:, :dim]
    kf = qkv[:, dim:2 * dim]
    vf = qkv[:, 2 * dim:]

    # ---- QKNorm (RMSNorm over each head's D lanes, eps=1e-6), lane-dense ----
    # per-head mean of t^2 via a block-diagonal [dim, dim] matrix (1/D per head
    # block): stays in flat [R, dim] layout and rides the MXU.
    def rmsnorm(t, scale_row):
        ms = jnp.dot((t * t).astype(g_ref.dtype), g_ref[...],
                     preferred_element_type=jnp.float32)
        return t * jax.lax.rsqrt(ms + 1e-6) * scale_row

    qn = rmsnorm(qf, q_scale)
    kn = rmsnorm(kf, k_scale)

    # ---- RoPE via precomputed coefficient rows (rolls ride the XLU slot) ----
    #   out[c] = c_self[c]*t[c] + c_m1[c]*t[c-1] + c_p1[c]*t[c+1]
    def rope(t):
        return (rope_self * t
                + rope_m1 * pltpu.roll(t, shift=1, axis=1)
                + rope_p1 * pltpu.roll(t, shift=dim - 1, axis=1))

    qr = rope(qn) * (1.0 / math.sqrt(D))   # fold the SDPA scale into q once
    kr = rope(kn)

    # ---- attention over the head axis, fully lane-dense ----
    # offset formulation: scores_o[r, h] = <q[r,h,:], k[r,(h+o)%H,:]>
    #   = full-lane multiply of q with K rolled left by o*D lanes, reduced per head
    #     with the [dim, H] 0/1 block matrix on the MXU.
    hsum = hsum_ref[...]                   # [dim, H] per-head reducer
    hbc = hbc_ref[...]                     # [H, dim] per-head broadcaster
    scores = []
    for o in range(H):
        sh = (dim - o * D) % dim
        k_o = kr if sh == 0 else pltpu.roll(kr, shift=sh, axis=1)
        scores.append(jnp.dot(qr * k_o, hsum, preferred_element_type=jnp.float32))

    m = scores[0]
    for s in scores[1:]:
        m = jnp.maximum(m, s)
    exps = [jnp.exp(s - m) for s in scores]          # each [R, H]
    denom = exps[0]
    for e in exps[1:]:
        denom = denom + e
    inv = pl.reciprocal(denom, approx=True) if approx_recip else 1.0 / denom

    ctx = None                                        # [R, dim], lanes = h*D + d
    for o in range(H):
        sh = (dim - o * D) % dim
        v_o = vf if sh == 0 else pltpu.roll(vf, shift=sh, axis=1)
        attn_lane = jnp.dot(exps[o] * inv, hbc, preferred_element_type=jnp.float32)
        term = attn_lane * v_o
        ctx = term if ctx is None else ctx + term

    # ---- rearrange 'B H L D -> B L (H D)' fused with proj: ONE matmul ----
    # ctx2d[b*H + h, l*D + d] = ctx[b*L + l, h*D + d]
    ctx2d = jnp.transpose(ctx.reshape(Bt, L, H, D), (0, 2, 1, 3)).reshape(Bt * H, L * D)
    y = jnp.dot(ctx2d.astype(mm_dtype), wproj_ref[...],
                preferred_element_type=jnp.float32) + bproj                # [Bt*H, dim]
    o_ref[...] = y.reshape(Bt, H, dim).astype(o_ref.dtype)


def prepare_rope_attention_params(wqkv, q_scale, k_scale, pe, wproj, bproj,
                                  num_heads, *, precise=False):
    """One-time weight packing (hoisted out of the per-call hot path)."""
    dim = wqkv.shape[1]
    H = num_heads
    D = dim // H
    assert H * D == dim
    assert D % 2 == 0, "RoPE lane-roll formulation requires even head_dim"
    assert pe.shape == (1, 1, H, D // 2, 2, 2), \
        "literal module semantics index pe by the head axis (pe L-dim == num_heads)"

    mm_dtype = jnp.float32 if precise else jnp.bfloat16

    wqkv_t = jnp.asarray(wqkv).T.astype(mm_dtype)            # [dim, 3*dim]
    wproj_t = jnp.asarray(wproj).T.astype(mm_dtype)          # [L*D, dim] (row = l*D + d)

    cols = jnp.arange(dim)
    head_of = cols // D
    gmat = jnp.where(head_of[:, None] == head_of[None, :],
                     1.0 / D, 0.0).astype(mm_dtype)          # block-diag mean matrix
    head_sum = (head_of[:, None] == jnp.arange(H)[None, :]).astype(jnp.float32)  # [dim,H]
    head_bcast = head_sum.T                                                      # [H,dim]

    pe_sq = jnp.asarray(pe, jnp.float32).reshape(H, D // 2, 2, 2)
    pe_a = pe_sq[..., 0].reshape(dim)                        # column h*D + 2p + r
    pe_b = pe_sq[..., 1].reshape(dim)
    even = (cols % 2) == 0
    c_self = jnp.where(even, pe_a, pe_b)
    c_m1 = jnp.where(even, 0.0, pe_a)                        # zero at even lanes
    c_p1 = jnp.where(even, pe_b, 0.0)                        # zero at odd lanes

    qs = jnp.tile(jnp.asarray(q_scale, jnp.float32), H)
    ks = jnp.tile(jnp.asarray(k_scale, jnp.float32), H)
    bp = jnp.asarray(bproj, jnp.float32)
    zeros = jnp.zeros((dim,), jnp.float32)
    consts = jnp.stack([qs, ks, c_self, c_m1, c_p1, bp, zeros, zeros], axis=0)  # (8,dim)

    return dict(wqkv_t=wqkv_t, gmat=gmat, consts=consts, head_sum=head_sum,
                head_bcast=head_bcast, wproj_t=wproj_t,
                num_heads=H, head_dim=D, precise=precise)


def _choose_block_b(B, L, *, max_rows=1024, min_rows_per_step_for_split=512):
    """Largest batch tile whose row count (Bt*L) fits the row budget. Prefer >=2
    grid steps only when every step still has >= min_rows_per_step_for_split rows
    (so dual-TC sharding amortizes the ~600-cycle step overhead); otherwise run a
    single grid step with the tallest possible M."""
    divisors = [d for d in range(1, B + 1) if B % d == 0]
    fit = [d for d in divisors if d * L <= max_rows]
    if not fit:
        return 1
    split = [d for d in fit if B // d >= 2 and d * L >= min_rows_per_step_for_split]
    return max(split) if split else max(fit)


def rope_self_attention_forward(x, params, *, block_b=None, max_rows=1024,
                                vmem_limit_bytes=48 * 1024 * 1024):
    """Pallas forward. x: [B, L, dim] float32; params from prepare_rope_attention_params."""
    B, L, dim = x.shape
    H = params["num_heads"]
    D = params["head_dim"]
    precise = params["precise"]
    assert L == H, "literal module semantics require seq_len == num_heads"
    assert H * D == dim

    if block_b is None:
        Bt = _choose_block_b(B, L, max_rows=max_rows)
    else:
        Bt = block_b
        if B % Bt != 0:
            raise ValueError(f"block_b={Bt} must divide batch {B}")
        if Bt * L > max_rows:
            raise ValueError(
                f"block_b={Bt} gives {Bt * L} rows/step (> {max_rows}); live f32 "
                "intermediates are ~10 KiB/row and would risk exceeding VMEM")

    out_dtype = jnp.float32 if precise else jnp.bfloat16
    kernel = functools.partial(_rope_attention_kernel, H=H, D=D,
                               approx_recip=not precise)
    return pl.pallas_call(
        kernel,
        out_shape=jax.ShapeDtypeStruct((B, H, dim), out_dtype),
        grid=(B // Bt,),
        in_specs=[
            pl.BlockSpec((Bt, L, dim), lambda b: (b, 0, 0)),     # x (batch tile, f32)
            pl.BlockSpec((dim, 3 * dim), lambda b: (0, 0)),      # Wqkv^T
            pl.BlockSpec((dim, dim), lambda b: (0, 0)),          # block-diag mean matrix
            pl.BlockSpec((8, dim), lambda b: (0, 0)),            # packed per-lane consts
            pl.BlockSpec((dim, H), lambda b: (0, 0)),            # per-head reducer (0/1)
            pl.BlockSpec((H, dim), lambda b: (0, 0)),            # per-head broadcaster (0/1)
            pl.BlockSpec((dim, dim), lambda b: (0, 0)),          # Wproj^T (flat [L*D, dim])
        ],
        out_specs=pl.BlockSpec((Bt, H, dim), lambda b: (b, 0, 0)),
        compiler_params=pltpu.CompilerParams(
            dimension_semantics=("parallel",),
            vmem_limit_bytes=vmem_limit_bytes),
    )(x, params["wqkv_t"], params["gmat"], params["consts"],
      params["head_sum"], params["head_bcast"], params["wproj_t"])


def rope_self_attention(x, wqkv, q_scale, k_scale, pe, wproj, bproj, num_heads,
                        *, block_b=None, precise=False):
    """Convenience wrapper mirroring the PyTorch module call (packs params each call).
    For repeated calls, hoist prepare_rope_attention_params() out of the hot path."""
    params = prepare_rope_attention_params(wqkv, q_scale, k_scale, pe, wproj, bproj,
                                           num_heads, precise=precise)
    return rope_self_attention_forward(x, params, block_b=block_b)


def _reference(x, wqkv, q_scale, k_scale, pe, wproj, bproj, num_heads,
               matmul_dtype=jnp.float32):
    """Plain-JAX mirror of the (literal) PyTorch forward."""
    B, L, dim = x.shape
    H = num_heads
    D = dim // H
    qkv = jnp.dot(x.reshape(B * L, dim).astype(matmul_dtype),
                  wqkv.T.astype(matmul_dtype),
                  preferred_element_type=jnp.float32).reshape(B, L, 3, H, D)
    q, k, v = qkv[:, :, 0], qkv[:, :, 1], qkv[:, :, 2]        # each [B, L, H, D]

    def rms(t, s):
        rr = jax.lax.rsqrt(jnp.mean(t * t, axis=-1, keepdims=True) + 1e-6)
        return t * rr * s

    q = rms(q, q_scale)
    k = rms(k, k_scale)

    def rope(t):
        t_ = t.reshape(*t.shape[:-1], -1, 1, 2)
        out = pe[..., 0] * t_[..., 0] + pe[..., 1] * t_[..., 1]
        return out.reshape(t.shape)

    q = rope(q)
    k = rope(k)

    scores = jnp.einsum('blhd,blgd->blhg', q, k) / math.sqrt(D)
    attn = jax.nn.softmax(scores, axis=-1)
    o = jnp.einsum('blhg,blgd->blhd', attn, v)                 # [B, L, H, D]
    o = jnp.transpose(o, (0, 2, 1, 3)).reshape(B, H, L * D)    # 'B H L D -> B L (H D)'
    y = jnp.dot(o.reshape(B * H, L * D).astype(matmul_dtype),
                wproj.T.astype(matmul_dtype),
                preferred_element_type=jnp.float32).reshape(B, H, dim)
    return y + bproj


if __name__ == "__main__":
    B = 8
    num_heads = 8
    head_dim = 16
    dim = num_heads * head_dim          # 128
    L = num_heads                       # required by the module's literal rearrange

    key = jax.random.PRNGKey(0)
    keys = jax.random.split(key, 7)
    x = jax.random.normal(keys[0], (B, L, dim), jnp.float32)
    pe = jax.random.normal(keys[1], (1, 1, L, head_dim // 2, 2, 2), jnp.float32)

    # Deterministic synthetic parameters (shapes from __init__; qkv_bias=False default).
    wqkv = jax.random.normal(keys[2], (3 * dim, dim), jnp.float32) * (1.0 / math.sqrt(dim))
    wproj = jax.random.normal(keys[3], (dim, dim), jnp.float32) * (1.0 / math.sqrt(dim))
    bproj = jax.random.normal(keys[4], (dim,), jnp.float32) * 0.02
    q_scale = 1.0 + 0.1 * jax.random.normal(keys[5], (head_dim,), jnp.float32)
    k_scale = 1.0 + 0.1 * jax.random.normal(keys[6], (head_dim,), jnp.float32)

    # 1) precise path (f32 MXU operands, exact softmax divide): tight correctness check.
    params_f32 = prepare_rope_attention_params(wqkv, q_scale, k_scale, pe, wproj, bproj,
                                               num_heads, precise=True)
    out_f32 = rope_self_attention_forward(x, params_f32)
    out_f32 = jax.block_until_ready(out_f32)
    ref_f32 = _reference(x, wqkv, q_scale, k_scale, pe, wproj, bproj, num_heads)
    assert out_f32.shape == ref_f32.shape, (out_f32.shape, ref_f32.shape)
    err32 = float(jnp.max(jnp.abs(out_f32 - ref_f32)))
    assert jnp.allclose(out_f32, ref_f32, atol=5e-4, rtol=5e-4), f"f32 max abs err {err32}"

    # 2) fast path (bf16 MXU operands, bf16 output, approx reciprocal):
    #    check against a bf16-operand reference with a looser tolerance.
    params_bf = prepare_rope_attention_params(wqkv, q_scale, k_scale, pe, wproj, bproj,
                                              num_heads, precise=False)
    out_bf = rope_self_attention_forward(x, params_bf)
    out_bf = jax.block_until_ready(out_bf)
    assert out_bf.dtype == jnp.bfloat16
    ref_bf = _reference(x, wqkv, q_scale, k_scale, pe, wproj, bproj, num_heads,
                        matmul_dtype=jnp.bfloat16)
    errbf = float(jnp.max(jnp.abs(out_bf.astype(jnp.float32) - ref_bf)))
    assert jnp.allclose(out_bf.astype(jnp.float32), ref_bf,
                        atol=5e-2, rtol=5e-2), f"bf16 max abs err {errbf}"

    print("KERNEL_OK")
</pallas_src>

<mosaic_0001>
module attributes {stable_mosaic.version = 11 : i64} {
  func.func @_rope_attention_kernel(%arg0: i32, %arg1: memref<8x8x128xf32, #tpu.memory_space<vmem>>, %arg2: memref<128x384xf32, #tpu.memory_space<vmem>>, %arg3: memref<128x128xf32, #tpu.memory_space<vmem>>, %arg4: memref<8x128xf32, #tpu.memory_space<vmem>>, %arg5: memref<128x8xf32, #tpu.memory_space<vmem>>, %arg6: memref<8x128xf32, #tpu.memory_space<vmem>>, %arg7: memref<128x128xf32, #tpu.memory_space<vmem>>, %arg8: memref<8x8x128xf32, #tpu.memory_space<vmem>>) attributes {dimension_semantics = [#tpu.dimension_semantics<parallel>], iteration_bounds = array<i64: 1>, scalar_prefetch = 0 : i64, scratch_operands = 0 : i64, tpu.core_type = #tpu.core_type<tc>, window_params = [{transform_indices = @transform_0, window_bounds = array<i64: 8, 8, 128>}, {pipeline_mode = #tpu.pipeline_mode<synchronous>, transform_indices = @transform_1, window_bounds = array<i64: 128, 384>}, {pipeline_mode = #tpu.pipeline_mode<synchronous>, transform_indices = @transform_2, window_bounds = array<i64: 128, 128>}, {pipeline_mode = #tpu.pipeline_mode<synchronous>, transform_indices = @transform_3, window_bounds = array<i64: 8, 128>}, {pipeline_mode = #tpu.pipeline_mode<synchronous>, transform_indices = @transform_4, window_bounds = array<i64: 128, 8>}, {pipeline_mode = #tpu.pipeline_mode<synchronous>, transform_indices = @transform_5, window_bounds = array<i64: 8, 128>}, {pipeline_mode = #tpu.pipeline_mode<synchronous>, transform_indices = @transform_6, window_bounds = array<i64: 128, 128>}, {transform_indices = @transform_7, window_bounds = array<i64: 8, 8, 128>}]} {
    %c0 = arith.constant 0 : index
    %c0_0 = arith.constant 0 : index
    %0 = vector.load %arg4[%c0, %c0_0] : memref<8x128xf32, #tpu.memory_space<vmem>>, vector<8x128xf32>
    %1 = vector.extract_strided_slice %0 {offsets = [0, 0], sizes = [1, 128], strides = [1, 1]} : vector<8x128xf32> to vector<1x128xf32>
    %2 = vector.extract_strided_slice %0 {offsets = [1, 0], sizes = [1, 128], strides = [1, 1]} : vector<8x128xf32> to vector<1x128xf32>
    %3 = vector.extract_strided_slice %0 {offsets = [2, 0], sizes = [1, 128], strides = [1, 1]} : vector<8x128xf32> to vector<1x128xf32>
    %4 = vector.extract_strided_slice %0 {offsets = [3, 0], sizes = [1, 128], strides = [1, 1]} : vector<8x128xf32> to vector<1x128xf32>
    %5 = vector.extract_strided_slice %0 {offsets = [4, 0], sizes = [1, 128], strides = [1, 1]} : vector<8x128xf32> to vector<1x128xf32>
    %6 = vector.extract_strided_slice %0 {offsets = [5, 0], sizes = [1, 128], strides = [1, 1]} : vector<8x128xf32> to vector<1x128xf32>
    %c0_1 = arith.constant 0 : index
    %c0_2 = arith.constant 0 : index
    %c0_3 = arith.constant 0 : index
    %7 = vector.load %arg1[%c0_1, %c0_2, %c0_3] : memref<8x8x128xf32, #tpu.memory_space<vmem>>, vector<8x8x128xf32>
    %8 = vector.shape_cast %7 : vector<8x8x128xf32> to vector<64x128xf32>
    %c0_4 = arith.constant 0 : index
    %c0_5 = arith.constant 0 : index
    %9 = vector.load %arg2[%c0_4, %c0_5] : memref<128x384xf32, #tpu.memory_space<vmem>>, vector<128x384xf32>
    %cst = arith.constant dense<0.000000e+00> : vector<64x384xf32>
    %10 = tpu.matmul %8, %9, %cst {dimension_numbers = #tpu.dot_dimension_numbers<[1], [0], [0], [1], [0, 0, 1, 1], [], []>} : vector<64x128xf32>, vector<128x384xf32>, vector<64x384xf32> -> vector<64x384xf32>
    %11 = vector.extract_strided_slice %10 {offsets = [0, 0], sizes = [64, 128], strides = [1, 1]} : vector<64x384xf32> to vector<64x128xf32>
    %12 = vector.extract_strided_slice %10 {offsets = [0, 128], sizes = [64, 128], strides = [1, 1]} : vector<64x384xf32> to vector<64x128xf32>
    %13 = vector.extract_strided_slice %10 {offsets = [0, 256], sizes = [64, 128], strides = [1, 1]} : vector<64x384xf32> to vector<64x128xf32>
    %14 = arith.mulf %11, %11 : vector<64x128xf32>
    %c0_6 = arith.constant 0 : index
    %c0_7 = arith.constant 0 : index
    %15 = vector.load %arg3[%c0_6, %c0_7] : memref<128x128xf32, #tpu.memory_space<vmem>>, vector<128x128xf32>
    %cst_8 = arith.constant dense<0.000000e+00> : vector<64x128xf32>
    %16 = tpu.matmul %14, %15, %cst_8 {dimension_numbers = #tpu.dot_dimension_numbers<[1], [0], [0], [1], [0, 0, 1, 1], [], []>} : vector<64x128xf32>, vector<128x128xf32>, vector<64x128xf32> -> vector<64x128xf32>
    %cst_9 = arith.constant 9.99999997E-7 : f32
    %17 = vector.broadcast %cst_9 : f32 to vector<64x128xf32>
    %18 = arith.addf %16, %17 : vector<64x128xf32>
    %19 = math.rsqrt %18 : vector<64x128xf32>
    %20 = arith.mulf %11, %19 : vector<64x128xf32>
    %21 = vector.broadcast %1 : vector<1x128xf32> to vector<64x128xf32>
    %22 = arith.mulf %20, %21 : vector<64x128xf32>
    %23 = arith.mulf %12, %12 : vector<64x128xf32>
    %c0_10 = arith.constant 0 : index
    %c0_11 = arith.constant 0 : index
    %24 = vector.load %arg3[%c0_10, %c0_11] : memref<128x128xf32, #tpu.memory_space<vmem>>, vector<128x128xf32>
    %cst_12 = arith.constant dense<0.000000e+00> : vector<64x128xf32>
    %25 = tpu.matmul %23, %24, %cst_12 {dimension_numbers = #tpu.dot_dimension_numbers<[1], [0], [0], [1], [0, 0, 1, 1], [], []>} : vector<64x128xf32>, vector<128x128xf32>, vector<64x128xf32> -> vector<64x128xf32>
    %cst_13 = arith.constant 9.99999997E-7 : f32
    %26 = vector.broadcast %cst_13 : f32 to vector<64x128xf32>
    %27 = arith.addf %25, %26 : vector<64x128xf32>
    %28 = math.rsqrt %27 : vector<64x128xf32>
    %29 = arith.mulf %12, %28 : vector<64x128xf32>
    %30 = vector.broadcast %2 : vector<1x128xf32> to vector<64x128xf32>
    %31 = arith.mulf %29, %30 : vector<64x128xf32>
    %32 = vector.broadcast %3 : vector<1x128xf32> to vector<64x128xf32>
    %33 = arith.mulf %32, %22 : vector<64x128xf32>
    %c1_i32 = arith.constant 1 : i32
    %34 = tpu.dynamic_rotate %22 by %c1_i32 dim 1 : vector<64x128xf32>, i32 -> vector<64x128xf32>
    %35 = vector.broadcast %4 : vector<1x128xf32> to vector<64x128xf32>
    %36 = arith.mulf %35, %34 : vector<64x128xf32>
    %37 = arith.addf %33, %36 : vector<64x128xf32>
    %c127_i32 = arith.constant 127 : i32
    %38 = tpu.dynamic_rotate %22 by %c127_i32 dim 1 : vector<64x128xf32>, i32 -> vector<64x128xf32>
    %39 = vector.broadcast %5 : vector<1x128xf32> to vector<64x128xf32>
    %40 = arith.mulf %39, %38 : vector<64x128xf32>
    %41 = arith.addf %37, %40 : vector<64x128xf32>
    %cst_14 = arith.constant 2.500000e-01 : f32
    %42 = vector.broadcast %cst_14 : f32 to vector<64x128xf32>
    %43 = arith.mulf %41, %42 : vector<64x128xf32>
    %44 = vector.broadcast %3 : vector<1x128xf32> to vector<64x128xf32>
    %45 = arith.mulf %44, %31 : vector<64x128xf32>
    %c1_i32_15 = arith.constant 1 : i32
    %46 = tpu.dynamic_rotate %31 by %c1_i32_15 dim 1 : vector<64x128xf32>, i32 -> vector<64x128xf32>
    %47 = vector.broadcast %4 : vector<1x128xf32> to vector<64x128xf32>
    %48 = arith.mulf %47, %46 : vector<64x128xf32>
    %49 = arith.addf %45, %48 : vector<64x128xf32>
    %c127_i32_16 = arith.constant 127 : i32
    %50 = tpu.dynamic_rotate %31 by %c127_i32_16 dim 1 : vector<64x128xf32>, i32 -> vector<64x128xf32>
    %51 = vector.broadcast %5 : vector<1x128xf32> to vector<64x128xf32>
    %52 = arith.mulf %51, %50 : vector<64x128xf32>
    %53 = arith.addf %49, %52 : vector<64x128xf32>
    %c0_17 = arith.constant 0 : index
    %c0_18 = arith.constant 0 : index
    %54 = vector.load %arg5[%c0_17, %c0_18] : memref<128x8xf32, #tpu.memory_space<vmem>>, vector<128x8xf32>
    %c0_19 = arith.constant 0 : index
    %c0_20 = arith.constant 0 : index
    %55 = vector.load %arg6[%c0_19, %c0_20] : memref<8x128xf32, #tpu.memory_space<vmem>>, vector<8x128xf32>
    %56 = arith.mulf %43, %53 : vector<64x128xf32>
    %cst_21 = arith.constant dense<0.000000e+00> : vector<64x8xf32>
    %57 = tpu.matmul %56, %54, %cst_21 {dimension_numbers = #tpu.dot_dimension_numbers<[1], [0], [0], [1], [0, 0, 1, 1], [], []>} : vector<64x128xf32>, vector<128x8xf32>, vector<64x8xf32> -> vector<64x8xf32>
    %c112_i32 = arith.constant 112 : i32
    %58 = tpu.dynamic_rotate %53 by %c112_i32 dim 1 : vector<64x128xf32>, i32 -> vector<64x128xf32>
    %59 = arith.mulf %43, %58 : vector<64x128xf32>
    %cst_22 = arith.constant dense<0.000000e+00> : vector<64x8xf32>
    %60 = tpu.matmul %59, %54, %cst_22 {dimension_numbers = #tpu.dot_dimension_numbers<[1], [0], [0], [1], [0, 0, 1, 1], [], []>} : vector<64x128xf32>, vector<128x8xf32>, vector<64x8xf32> -> vector<64x8xf32>
    %c96_i32 = arith.constant 96 : i32
    %61 = tpu.dynamic_rotate %53 by %c96_i32 dim 1 : vector<64x128xf32>, i32 -> vector<64x128xf32>
    %62 = arith.mulf %43, %61 : vector<64x128xf32>
    %cst_23 = arith.constant dense<0.000000e+00> : vector<64x8xf32>
    %63 = tpu.matmul %62, %54, %cst_23 {dimension_numbers = #tpu.dot_dimension_numbers<[1], [0], [0], [1], [0, 0, 1, 1], [], []>} : vector<64x128xf32>, vector<128x8xf32>, vector<64x8xf32> -> vector<64x8xf32>
    %c80_i32 = arith.constant 80 : i32
    %64 = tpu.dynamic_rotate %53 by %c80_i32 dim 1 : vector<64x128xf32>, i32 -> vector<64x128xf32>
    %65 = arith.mulf %43, %64 : vector<64x128xf32>
    %cst_24 = arith.constant dense<0.000000e+00> : vector<64x8xf32>
    %66 = tpu.matmul %65, %54, %cst_24 {dimension_numbers = #tpu.dot_dimension_numbers<[1], [0], [0], [1], [0, 0, 1, 1], [], []>} : vector<64x128xf32>, vector<128x8xf32>, vector<64x8xf32> -> vector<64x8xf32>
    %c64_i32 = arith.constant 64 : i32
    %67 = tpu.dynamic_rotate %53 by %c64_i32 dim 1 : vector<64x128xf32>, i32 -> vector<64x128xf32>
    %68 = arith.mulf %43, %67 : vector<64x128xf32>
    %cst_25 = arith.constant dense<0.000000e+00> : vector<64x8xf32>
    %69 = tpu.matmul %68, %54, %cst_25 {dimension_numbers = #tpu.dot_dimension_numbers<[1], [0], [0], [1], [0, 0, 1, 1], [], []>} : vector<64x128xf32>, vector<128x8xf32>, vector<64x8xf32> -> vector<64x8xf32>
    %c48_i32 = arith.constant 48 : i32
    %70 = tpu.dynamic_rotate %53 by %c48_i32 dim 1 : vector<64x128xf32>, i32 -> vector<64x128xf32>
    %71 = arith.mulf %43, %70 : vector<64x128xf32>
    %cst_26 = arith.constant dense<0.000000e+00> : vector<64x8xf32>
    %72 = tpu.matmul %71, %54, %cst_26 {dimension_numbers = #tpu.dot_dimension_numbers<[1], [0], [0], [1], [0, 0, 1, 1], [], []>} : vector<64x128xf32>, vector<128x8xf32>, vector<64x8xf32> -> vector<64x8xf32>
    %c32_i32 = arith.constant 32 : i32
    %73 = tpu.dynamic_rotate %53 by %c32_i32 dim 1 : vector<64x128xf32>, i32 -> vector<64x128xf32>
    %74 = arith.mulf %43, %73 : vector<64x128xf32>
    %cst_27 = arith.constant dense<0.000000e+00> : vector<64x8xf32>
    %75 = tpu.matmul %74, %54, %cst_27 {dimension_numbers = #tpu.dot_dimension_numbers<[1], [0], [0], [1], [0, 0, 1, 1], [], []>} : vector<64x128xf32>, vector<128x8xf32>, vector<64x8xf32> -> vector<64x8xf32>
    %c16_i32 = arith.constant 16 : i32
    %76 = tpu.dynamic_rotate %53 by %c16_i32 dim 1 : vector<64x128xf32>, i32 -> vector<64x128xf32>
    %77 = arith.mulf %43, %76 : vector<64x128xf32>
    %cst_28 = arith.constant dense<0.000000e+00> : vector<64x8xf32>
    %78 = tpu.matmul %77, %54, %cst_28 {dimension_numbers = #tpu.dot_dimension_numbers<[1], [0], [0], [1], [0, 0, 1, 1], [], []>} : vector<64x128xf32>, vector<128x8xf32>, vector<64x8xf32> -> vector<64x8xf32>
    %79 = arith.maximumf %57, %60 : vector<64x8xf32>
    %80 = arith.maximumf %79, %63 : vector<64x8xf32>
    %81 = arith.maximumf %80, %66 : vector<64x8xf32>
    %82 = arith.maximumf %81, %69 : vector<64x8xf32>
    %83 = arith.maximumf %82, %72 : vector<64x8xf32>
    %84 = arith.maximumf %83, %75 : vector<64x8xf32>
    %85 = arith.maximumf %84, %78 : vector<64x8xf32>
    %86 = arith.subf %57, %85 : vector<64x8xf32>
    %87 = math.exp %86 : vector<64x8xf32>
    %88 = arith.subf %60, %85 : vector<64x8xf32>
    %89 = math.exp %88 : vector<64x8xf32>
    %90 = arith.subf %63, %85 : vector<64x8xf32>
    %91 = math.exp %90 : vector<64x8xf32>
    %92 = arith.subf %66, %85 : vector<64x8xf32>
    %93 = math.exp %92 : vector<64x8xf32>
    %94 = arith.subf %69, %85 : vector<64x8xf32>
    %95 = math.exp %94 : vector<64x8xf32>
    %96 = arith.subf %72, %85 : vector<64x8xf32>
    %97 = math.exp %96 : vector<64x8xf32>
    %98 = arith.subf %75, %85 : vector<64x8xf32>
    %99 = math.exp %98 : vector<64x8xf32>
    %100 = arith.subf %78, %85 : vector<64x8xf32>
    %101 = math.exp %100 : vector<64x8xf32>
    %102 = arith.addf %87, %89 : vector<64x8xf32>
    %103 = arith.addf %102, %91 : vector<64x8xf32>
    %104 = arith.addf %103, %93 : vector<64x8xf32>
    %105 = arith.addf %104, %95 : vector<64x8xf32>
    %106 = arith.addf %105, %97 : vector<64x8xf32>
    %107 = arith.addf %106, %99 : vector<64x8xf32>
    %108 = arith.addf %107, %101 : vector<64x8xf32>
    %cst_29 = arith.constant 1.000000e+00 : f32
    %109 = vector.broadcast %cst_29 : f32 to vector<64x8xf32>
    %110 = arith.divf %109, %108 : vector<64x8xf32>
    %111 = arith.mulf %87, %110 : vector<64x8xf32>
    %cst_30 = arith.constant dense<0.000000e+00> : vector<64x128xf32>
    %112 = tpu.matmul %111, %55, %cst_30 {dimension_numbers = #tpu.dot_dimension_numbers<[1], [0], [0], [1], [0, 0, 1, 1], [], []>} : vector<64x8xf32>, vector<8x128xf32>, vector<64x128xf32> -> vector<64x128xf32>
    %113 = arith.mulf %112, %13 : vector<64x128xf32>
    %c112_i32_31 = arith.constant 112 : i32
    %114 = tpu.dynamic_rotate %13 by %c112_i32_31 dim 1 : vector<64x128xf32>, i32 -> vector<64x128xf32>
    %115 = arith.mulf %89, %110 : vector<64x8xf32>
    %cst_32 = arith.constant dense<0.000000e+00> : vector<64x128xf32>
    %116 = tpu.matmul %115, %55, %cst_32 {dimension_numbers = #tpu.dot_dimension_numbers<[1], [0], [0], [1], [0, 0, 1, 1], [], []>} : vector<64x8xf32>, vector<8x128xf32>, vector<64x128xf32> -> vector<64x128xf32>
    %117 = arith.mulf %116, %114 : vector<64x128xf32>
    %118 = arith.addf %113, %117 : vector<64x128xf32>
    %c96_i32_33 = arith.constant 96 : i32
    %119 = tpu.dynamic_rotate %13 by %c96_i32_33 dim 1 : vector<64x128xf32>, i32 -> vector<64x128xf32>
    %120 = arith.mulf %91, %110 : vector<64x8xf32>
    %cst_34 = arith.constant dense<0.000000e+00> : vector<64x128xf32>
    %121 = tpu.matmul %120, %55, %cst_34 {dimension_numbers = #tpu.dot_dimension_numbers<[1], [0], [0], [1], [0, 0, 1, 1], [], []>} : vector<64x8xf32>, vector<8x128xf32>, vector<64x128xf32> -> vector<64x128xf32>
    %122 = arith.mulf %121, %119 : vector<64x128xf32>
    %123 = arith.addf %118, %122 : vector<64x128xf32>
    %c80_i32_35 = arith.constant 80 : i32
    %124 = tpu.dynamic_rotate %13 by %c80_i32_35 dim 1 : vector<64x128xf32>, i32 -> vector<64x128xf32>
    %125 = arith.mulf %93, %110 : vector<64x8xf32>
    %cst_36 = arith.constant dense<0.000000e+00> : vector<64x128xf32>
    %126 = tpu.matmul %125, %55, %cst_36 {dimension_numbers = #tpu.dot_dimension_numbers<[1], [0], [0], [1], [0, 0, 1, 1], [], []>} : vector<64x8xf32>, vector<8x128xf32>, vector<64x128xf32> -> vector<64x128xf32>
    %127 = arith.mulf %126, %124 : vector<64x128xf32>
    %128 = arith.addf %123, %127 : vector<64x128xf32>
    %c64_i32_37 = arith.constant 64 : i32
    %129 = tpu.dynamic_rotate %13 by %c64_i32_37 dim 1 : vector<64x128xf32>, i32 -> vector<64x128xf32>
    %130 = arith.mulf %95, %110 : vector<64x8xf32>
    %cst_38 = arith.constant dense<0.000000e+00> : vector<64x128xf32>
    %131 = tpu.matmul %130, %55, %cst_38 {dimension_numbers = #tpu.dot_dimension_numbers<[1], [0], [0], [1], [0, 0, 1, 1], [], []>} : vector<64x8xf32>, vector<8x128xf32>, vector<64x128xf32> -> vector<64x128xf32>
    %132 = arith.mulf %131, %129 : vector<64x128xf32>
    %133 = arith.addf %128, %132 : vector<64x128xf32>
    %c48_i32_39 = arith.constant 48 : i32
    %134 = tpu.dynamic_rotate %13 by %c48_i32_39 dim 1 : vector<64x128xf32>, i32 -> vector<64x128xf32>
    %135 = arith.mulf %97, %110 : vector<64x8xf32>
    %cst_40 = arith.constant dense<0.000000e+00> : vector<64x128xf32>
    %136 = tpu.matmul %135, %55, %cst_40 {dimension_numbers = #tpu.dot_dimension_numbers<[1], [0], [0], [1], [0, 0, 1, 1], [], []>} : vector<64x8xf32>, vector<8x128xf32>, vector<64x128xf32> -> vector<64x128xf32>
    %137 = arith.mulf %136, %134 : vector<64x128xf32>
    %138 = arith.addf %133, %137 : vector<64x128xf32>
    %c32_i32_41 = arith.constant 32 : i32
    %139 = tpu.dynamic_rotate %13 by %c32_i32_41 dim 1 : vector<64x128xf32>, i32 -> vector<64x128xf32>
    %140 = arith.mulf %99, %110 : vector<64x8xf32>
    %cst_42 = arith.constant dense<0.000000e+00> : vector<64x128xf32>
    %141 = tpu.matmul %140, %55, %cst_42 {dimension_numbers = #tpu.dot_dimension_numbers<[1], [0], [0], [1], [0, 0, 1, 1], [], []>} : vector<64x8xf32>, vector<8x128xf32>, vector<64x128xf32> -> vector<64x128xf32>
    %142 = arith.mulf %141, %139 : vector<64x128xf32>
    %143 = arith.addf %138, %142 : vector<64x128xf32>
    %c16_i32_43 = arith.constant 16 : i32
    %144 = tpu.dynamic_rotate %13 by %c16_i32_43 dim 1 : vector<64x128xf32>, i32 -> vector<64x128xf32>
    %145 = arith.mulf %101, %110 : vector<64x8xf32>
    %cst_44 = arith.constant dense<0.000000e+00> : vector<64x128xf32>
    %146 = tpu.matmul %145, %55, %cst_44 {dimension_numbers = #tpu.dot_dimension_numbers<[1], [0], [0], [1], [0, 0, 1, 1], [], []>} : vector<64x8xf32>, vector<8x128xf32>, vector<64x128xf32> -> vector<64x128xf32>
    %147 = arith.mulf %146, %144 : vector<64x128xf32>
    %148 = arith.addf %143, %147 : vector<64x128xf32>
    %149 = vector.shape_cast %148 : vector<64x128xf32> to vector<8x8x8x16xf32>
    %150 = tpu.transpose %149, [0, 2, 1, 3] : vector<8x8x8x16xf32> -> vector<8x8x8x16xf32>
    %151 = vector.shape_cast %150 : vector<8x8x8x16xf32> to vector<64x128xf32>
    %c0_45 = arith.constant 0 : index
    %c0_46 = arith.constant 0 : index
    %152 = vector.load %arg7[%c0_45, %c0_46] : memref<128x128xf32, #tpu.memory_space<vmem>>, vector<128x128xf32>
    %cst_47 = arith.constant dense<0.000000e+00> : vector<64x128xf32>
    %153 = tpu.matmul %151, %152, %cst_47 {dimension_numbers = #tpu.dot_dimension_numbers<[1], [0], [0], [1], [0, 0, 1, 1], [], []>} : vector<64x128xf32>, vector<128x128xf32>, vector<64x128xf32> -> vector<64x128xf32>
    %154 = vector.broadcast %6 : vector<1x128xf32> to vector<64x128xf32>
    %155 = arith.addf %153, %154 : vector<64x128xf32>
    %156 = vector.shape_cast %155 : vector<64x128xf32> to vector<8x8x128xf32>
    %c0_48 = arith.constant 0 : index
    %c0_49 = arith.constant 0 : index
    %c0_50 = arith.constant 0 : index
    %157 = vector.load %arg8[%c0_48, %c0_49, %c0_50] : memref<8x8x128xf32, #tpu.memory_space<vmem>>, vector<8x8x128xf32>
    tpu.vector_store %arg8[%c0_48, %c0_49, %c0_50], %156 {strides = array<i32>} : memref<8x8x128xf32, #tpu.memory_space<vmem>>, vector<8x8x128xf32>,
    return
  }
  func.func @transform_0(%arg0: i32) -> (i32, i32, i32) {
    %c0_i32 = arith.constant 0 : i32
    %c0_i32_0 = arith.constant 0 : i32
    %c0_i32_1 = arith.constant 0 : i32
    return %arg0, %c0_i32, %c0_i32_0 : i32, i32, i32
  }
  func.func @transform_1(%arg0: i32) -> (i32, i32) {
    %c0_i32 = arith.constant 0 : i32
    %c0_i32_0 = arith.constant 0 : i32
    %c0_i32_1 = arith.constant 0 : i32
    return %c0_i32, %c0_i32_0 : i32, i32
  }
  func.func @transform_2(%arg0: i32) -> (i32, i32) {
    %c0_i32 = arith.constant 0 : i32
    %c0_i32_0 = arith.constant 0 : i32
    %c0_i32_1 = arith.constant 0 : i32
    return %c0_i32, %c0_i32_0 : i32, i32
  }
  func.func @transform_3(%arg0: i32) -> (i32, i32) {
    %c0_i32 = arith.constant 0 : i32
    %c0_i32_0 = arith.constant 0 : i32
    %c0_i32_1 = arith.constant 0 : i32
    return %c0_i32, %c0_i32_0 : i32, i32
  }
  func.func @transform_4(%arg0: i32) -> (i32, i32) {
    %c0_i32 = arith.constant 0 : i32
    %c0_i32_0 = arith.constant 0 : i32
    %c0_i32_1 = arith.constant 0 : i32
    return %c0_i32, %c0_i32_0 : i32, i32
  }
  func.func @transform_5(%arg0: i32) -> (i32, i32) {
    %c0_i32 = arith.constant 0 : i32
    %c0_i32_0 = arith.constant 0 : i32
    %c0_i32_1 = arith.constant 0 : i32
    return %c0_i32, %c0_i32_0 : i32, i32
  }
  func.func @transform_6(%arg0: i32) -> (i32, i32) {
    %c0_i32 = arith.constant 0 : i32
    %c0_i32_0 = arith.constant 0 : i32
    %c0_i32_1 = arith.constant 0 : i32
    return %c0_i32, %c0_i32_0 : i32, i32
  }
  func.func @transform_7(%arg0: i32) -> (i32, i32, i32) {
    %c0_i32 = arith.constant 0 : i32
    %c0_i32_0 = arith.constant 0 : i32
    %c0_i32_1 = arith.constant 0 : i32
    return %arg0, %c0_i32, %c0_i32_0 : i32, i32, i32
  }
}

</mosaic_0001>

<bundles_post_ra>
// kernel: tpu_custom_call.1
= control target key start
LH: loop header
LB: loop body
LE: loop exit
PB: predicated region body
PF: predicated region fallthrough
CT: control target
= control target key end

     0   :  { %12 = vsyncpa [#allocation3], 0  ;;  %s12348_s0 = inlined_call_operand.hbm [shape: f32[8,8,128], index: 0, kind: input, shape index: {}]   ;;  %s12349_s1 = inlined_call_operand.hbm [shape: f32[128,384], index: 1, kind: input, shape index: {}]   ;;  %s12350_s2 = inlined_call_operand.vmem [shape: f32[128,128], index: 2, kind: input, shape index: {}]   ;;  %s12351_s3 = inlined_call_operand.vmem [shape: f32[8,128], index: 3, kind: input, shape index: {}]   ;;  %s12352_s4 = inlined_call_operand.vmem [shape: f32[128,8], index: 4, kind: input, shape index: {}]   ;;  %s12353_s5 = inlined_call_operand.vmem [shape: f32[8,128], index: 5, kind: input, shape index: {}]   ;;  %s12354_s6 = inlined_call_operand.hbm [shape: f32[128,128], index: 6, kind: input, shape index: {}]   ;;  %s12355_s7 = inlined_call_operand.hbm [shape: f32[8,8,128], index: 7, kind: output, shape index: {}]  }
   0x1   :  { %13 = vsyncpa [#allocation6], 0 }
   0x2   :  { %14 = vsyncpa [#allocation4], 0  ;;  %s8997_s24 = smov [#allocation5]  }
   0x3   :  { %s32_s25 = sshll.u32 %s8997_s24, 4  ;;  %s33_s25 = int_to_ptr.vmem [resolvable:$true] %s32_s25 }
   0x4   :  { %s8919_s26 = scalar_lea.vmem %s33_s25, 6144  ;;  %p8924_p1 = scmp.lt.s32.totalorder %s33_s25, %s33_s25 }
   0x5   :  { %p8920_p0 = scmp.ne.s32.totalorder %s33_s25, %s8919_s26  ;;  %p8925_p2 = scmp.lt.s32.totalorder %s8919_s26, %s8919_s26 }
   0x7   :  { %p8926_p3 = por %p8925_p2, %p8924_p1 }
   0x9   :  { %p8927_p4 = pnand %p8926_p3, %p8920_p0 }
   0xb   :  { %8930 = shalt.err (!%p8927_p4)
}
   0xc   :  { %s8998_s27 = smov 384   ;;  %s8999_s28 = smov 24  }
   0xd   :  { %38 = dma.hbm_to_vmem [thread:$0]  %s12349_s1, 6144, %s33_s25, [#allocation6], %s8998_s27, %s8998_s27, %s8999_s28  }
   0xe   :  { %s9000_s8 = smov [#allocation2]  }
   0xf   :  { %s20_s9 = sshll.u32 %s9000_s8, 4  ;;  %s21_s9 = int_to_ptr.vmem [resolvable:$true] %s20_s9 }
  0x10   :  { %s8939_s10 = scalar_lea.vmem %s21_s9, 1024  ;;  %p8944_p6 = scmp.lt.s32.totalorder %s21_s9, %s21_s9 }
  0x11   :  { %p8940_p5 = scmp.ne.s32.totalorder %s21_s9, %s8939_s10  ;;  %p8945_p7 = scmp.lt.s32.totalorder %s8939_s10, %s8939_s10 }
  0x13   :  { %p8946_p8 = por %p8945_p7, %p8944_p6 }
  0x15   :  { %p8947_p9 = pnand %p8946_p8, %p8940_p5 }
  0x17   :  { %8950 = shalt.err (!%p8947_p9)
}
  0x18   :  { %s9001_s11 = smov 128   ;;  %s9002_s12 = smov 8  }
  0x19   :  { %26 = dma.hbm_to_vmem [thread:$0]  %s12348_s0, 1024, %s21_s9, [#allocation3], %s9001_s11, %s9001_s11, %s9002_s12  }
  0x1a   :  { %s9003_s1 = smov [#allocation7]  }
  0x1b   :  { %s52_s15 = sshll.u32 %s9003_s1, 4  ;;  %s53_s15 = int_to_ptr.vmem [resolvable:$true] %s52_s15 }
  0x1c   :  { %s8959_s16 = scalar_lea.vmem %s53_s15, 2048  ;;  %p8964_p11 = scmp.lt.s32.totalorder %s53_s15, %s53_s15 }
  0x1d   :  { %p8960_p10 = scmp.ne.s32.totalorder %s53_s15, %s8959_s16  ;;  %p8965_p12 = scmp.lt.s32.totalorder %s8959_s16, %s8959_s16 }
  0x1f   :  { %p8966_p13 = por %p8965_p12, %p8964_p11 }
  0x21   :  { %p8967_p0 = pnand %p8966_p13, %p8960_p10 }
  0x23   :  { %8970 = shalt.err (!%p8967_p0)
}
  0x24   :  { %58 = dma.hbm_to_vmem [thread:$0]  %s12354_s6, 2048, %s53_s15, [#allocation6], %s9001_s11, %s9001_s11, %s9002_s12  }
  0x25   :  { %8991 = dma.done.wait [#allocation3], 1024  }
  0x26   :  { %8992 = vsyncadd [#allocation3], 4294966272 }
  0x27   :  { %8993 = dma.done.wait [#allocation6], 8192  }
  0x28   :  { %8994 = vsyncadd [#allocation6], 4294959104  ;;  %v9004_v0 = vmov 0.0   ;;  %v123_v1 = vld [vmem:[#allocation5 + $0x170] sm:$0xff]  ;;  %v122_v2 = vld [vmem:[#allocation5 + $0x168] sm:$0xff]  ;;  %s9005_s26 = smov 127  }
  0x29   :  { %189 = vmatprep.mubr.f32.mxu0 %v9004_v0  ;;  %v120_v3 = vld [vmem:[#allocation5 + $0x158] sm:$0xff]  ;;  %125 = vmatprep.subr.mxu0 %v123_v1  ;;  %v119_v4 = vld [vmem:[#allocation5 + $0x150] sm:$0xff]  ;;  %v117_v5 = vld [vmem:[#allocation5 + $0x140] sm:$0xff]  ;;  %s9006_s27 = smov 1   ;;  %s9008_s15 = smov 96   ;;  %vm2166_vm0 = vcmask 64512  }
  0x2a   :  { %126 = vmatpush1.msra.mxu0 %v122_v2  ;;  %v116_v6 = vld [vmem:[#allocation5 + $0x138] sm:$0xff]  ;;  %v114_v7 = vld [vmem:[#allocation5 + $0x128] sm:$0xff]  ;;  %v113_v8 = vld [vmem:[#allocation5 + $0x120] sm:$0xff]  ;;  %s9010_s16 = smov 64   ;;  %s9011_s17 = smov 48   ;;  %vm7151_vm1 = vcmask 130048  }
  0x2b   :  { %127 = vmatprep.subr.mxu0 %v120_v3  ;;  %v111_v9 = vld [vmem:[#allocation5 + $0x110] sm:$0xff]  ;;  %v110_v10 = vld [vmem:[#allocation5 + $0x108] sm:$0xff]  ;;  %v108_v11 = vld [vmem:[#allocation5 + $0xf8] sm:$0xff]  ;;  %s9012_s18 = smov 32   ;;  %s9013_s0 = smov 16   ;;  %vm7160_vm2 = vcmask 261120  }
  0x2c   :  { %128 = vmatpush1.msra.mxu0 %v119_v4  ;;  %v107_v12 = vld [vmem:[#allocation5 + $0xf0] sm:$0xff]  ;;  %v105_v13 = vld [vmem:[#allocation5 + $0xe0] sm:$0xff]  ;;  %v104_v15 = vld [vmem:[#allocation5 + $0xd8] sm:$0xff]  ;;  %vm7169_vm3 = vcmask 392192   ;;  %vm7178_vm4 = vcmask 523264   ;;  %vm7187_vm5 = vcmask 654336  }
  0x2d   :  { %129 = vmatprep.subr.mxu0 %v117_v5  ;;  %v9073_v14 = vld [vmem:[#allocation2] sm:$0xff]  ;;  %v102_v16 = vld [vmem:[#allocation5 + $0xc8] sm:$0xff]  ;;  %v124_v18 = vld [vmem:[#allocation5 + $0x178] sm:$0xff]  ;;  %vm7196_vm6 = vcmask 785408   ;;  %vm7205_vm7 = vcmask 916480  }
  0x2e   :  { %130 = vmatpush1.msra.mxu0 %v116_v6  ;;  %7949 = vmatprep.mubr.f32.mxu1 %v9073_v14  ;;  %v101_v17 = vld [vmem:[#allocation5 + $0xc0] sm:$0xff]  ;;  %v99_v20 = vld [vmem:[#allocation5 + $0xb0] sm:$0xff]  ;;  %v98_v21 = vld [vmem:[#allocation5 + $0xa8] sm:$0xff] }
  0x2f   :  { %131 = vmatprep.subr.mxu0 %v114_v7  ;;  %v121_v19 = vld [vmem:[#allocation5 + $0x160] sm:$0xff]  ;;  %7917 = vmatprep.subr.mxu1 %v124_v18  ;;  %v118_v22 = vld [vmem:[#allocation5 + $0x148] sm:$0xff]  ;;  %v96_v23 = vld [vmem:[#allocation5 + $0x98] sm:$0xff] }
  0x30   :  { %132 = vmatpush1.msra.mxu0 %v113_v8  ;;  %7918 = vmatpush3.msra.mxu1 %v124_v18  ;;  %v95_v24 = vld [vmem:[#allocation5 + $0x90] sm:$0xff]  ;;  %v93_v26 = vld [vmem:[#allocation5 + $0x80] sm:$0xff]  ;;  %v92_v27 = vld [vmem:[#allocation5 + $0x78] sm:$0xff] }
  0x31   :  { %133 = vmatprep.subr.mxu0 %v111_v9  ;;  %7919 = vmatprep.subr.mxu1 %v121_v19  ;;  %v115_v25 = vld [vmem:[#allocation5 + $0x130] sm:$0xff]  ;;  %v112_v28 = vld [vmem:[#allocation5 + $0x118] sm:$0xff]  ;;  %v90_v29 = vld [vmem:[#allocation5 + $0x68] sm:$0xff] }
  0x32   :  { %134 = vmatpush1.msra.mxu0 %v110_v10  ;;  %7920 = vmatpush3.msra.mxu1 %v121_v19  ;;  %v89_v30 = vld [vmem:[#allocation5 + $0x60] sm:$0xff]  ;;  %v87_v32 = vld [vmem:[#allocation5 + $0x50] sm:$0xff]  ;;  %v86_v33 = vld [vmem:[#allocation5 + $0x48] sm:$0xff] }
  0x33   :  { %135 = vmatprep.subr.mxu0 %v108_v11  ;;  %7921 = vmatprep.subr.mxu1 %v118_v22  ;;  %v109_v31 = vld [vmem:[#allocation5 + $0x100] sm:$0xff]  ;;  %v106_v34 = vld [vmem:[#allocation5 + $0xe8] sm:$0xff]  ;;  %v84_v35 = vld [vmem:[#allocation5 + $0x38] sm:$0xff] }
  0x34   :  { %136 = vmatpush1.msra.mxu0 %v107_v12  ;;  %7922 = vmatpush3.msra.mxu1 %v118_v22  ;;  %v83_v36 = vld [vmem:[#allocation5 + $0x30] sm:$0xff]  ;;  %v81_v38 = vld [vmem:[#allocation5 + $0x20] sm:$0xff]  ;;  %v80_v39 = vld [vmem:[#allocation5 + $0x18] sm:$0xff] }
  0x35   :  { %137 = vmatprep.subr.mxu0 %v105_v13  ;;  %7923 = vmatprep.subr.mxu1 %v115_v25  ;;  %v103_v37 = vld [vmem:[#allocation5 + $0xd0] sm:$0xff]  ;;  %v100_v40 = vld [vmem:[#allocation5 + $0xb8] sm:$0xff]  ;;  %v78_v41 = vld [vmem:[#allocation5 + $0x8] sm:$0xff] }
  0x36   :  { %138 = vmatpush1.msra.mxu0 %v104_v15  ;;  %7924 = vmatpush3.msra.mxu1 %v115_v25  ;;  %v77_v42 = vld [vmem:[#allocation5] sm:$0xff]  ;;  %v94_v44 = vld [vmem:[#allocation5 + $0x88] sm:$0xff]  ;;  %v366_v45 = vld [vmem:[%s12350_s2 + $0x78] sm:$0xff] }
  0x37   :  { %139 = vmatprep.subr.mxu0 %v102_v16  ;;  %7925 = vmatprep.subr.mxu1 %v112_v28  ;;  %v97_v43 = vld [vmem:[#allocation5 + $0xa0] sm:$0xff]  ;;  %v91_v46 = vld [vmem:[#allocation5 + $0x70] sm:$0xff]  ;;  %v70_v47 = vld [vmem:[#allocation2 + $0x8] sm:$0xff] }
  0x38   :  { %140 = vmatpush1.msra.mxu0 %v101_v17  ;;  %7926 = vmatpush3.msra.mxu1 %v112_v28  ;;  %v88_v48 = vld [vmem:[#allocation5 + $0x58] sm:$0xff]  ;;  %v365_v49 = vld [vmem:[%s12350_s2 + $0x70] sm:$0xff]  ;;  %v85_v50 = vld [vmem:[#allocation5 + $0x40] sm:$0xff] }
  0x39   :  { %141 = vmatprep.subr.mxu0 %v99_v20  ;;  %7927 = vmatprep.subr.mxu1 %v109_v31  ;;  %v9085_v51 = vld [vmem:[#allocation2 + $0x10] sm:$0xff]  ;;  %v82_v52 = vld [vmem:[#allocation5 + $0x28] sm:$0xff]  ;;  %v72_v55 = vld [vmem:[#allocation2 + $0x18] sm:$0xff] }
  0x3a   :  { %142 = vmatpush1.msra.mxu0 %v98_v21  ;;  %7928 = vmatpush3.msra.mxu1 %v109_v31  ;;  %v364_v53 = vld [vmem:[%s12350_s2 + $0x68] sm:$0xff]  ;;  %v79_v54 = vld [vmem:[#allocation5 + $0x10] sm:$0xff]  ;;  %v363_v56 = vld [vmem:[%s12350_s2 + $0x60] sm:$0xff] }
  0x3b   :  { %143 = vmatprep.subr.mxu0 %v96_v23  ;;  %7929 = vmatprep.subr.mxu1 %v106_v34  ;;  %v73_v57 = vld [vmem:[#allocation2 + $0x20] sm:$0xff]  ;;  %v362_v58 = vld [vmem:[%s12350_s2 + $0x58] sm:$0xff]  ;;  %v74_v59 = vld [vmem:[#allocation2 + $0x28] sm:$0xff] }
  0x3c   :  { %144 = vmatpush1.msra.mxu0 %v95_v24  ;;  %7930 = vmatpush3.msra.mxu1 %v106_v34  ;;  %v361_v60 = vld [vmem:[%s12350_s2 + $0x50] sm:$0xff]  ;;  %v360_v62 = vld [vmem:[%s12350_s2 + $0x48] sm:$0xff]  ;;  %v359_v63 = vld [vmem:[%s12350_s2 + $0x40] sm:$0xff] }
  0x3d   :  { %145 = vmatprep.subr.mxu0 %v93_v26  ;;  %7931 = vmatprep.subr.mxu1 %v103_v37  ;;  %v75_v61 = vld [vmem:[#allocation2 + $0x30] sm:$0xff]  ;;  %v76_v1 = vld [vmem:[#allocation2 + $0x38] sm:$0xff]  ;;  %v355_v4 = vld [vmem:[%s12350_s2 + $0x20] sm:$0xff] }
  0x3e   :  { %146 = vmatpush1.msra.mxu0 %v92_v27  ;;  %7932 = vmatpush3.msra.mxu1 %v103_v37  ;;  %v358_v2 = vld [vmem:[%s12350_s2 + $0x38] sm:$0xff]  ;;  %v357_v3 = vld [vmem:[%s12350_s2 + $0x30] sm:$0xff]  ;;  %v352_v7 = vld [vmem:[%s12350_s2 + $0x8] sm:$0xff] }
  0x3f   :  { %147 = vmatprep.subr.mxu0 %v90_v29  ;;  %7933 = vmatprep.subr.mxu1 %v100_v40  ;;  %v354_v5 = vld [vmem:[%s12350_s2 + $0x18] sm:$0xff]  ;;  %v353_v6 = vld [vmem:[%s12350_s2 + $0x10] sm:$0xff]  ;;  %v351_v8 = vld [vmem:[%s12350_s2] sm:$0xff] }
  0x40   :  { %148 = vmatpush1.msra.mxu0 %v89_v30  ;;  %7934 = vmatpush3.msra.mxu1 %v100_v40 }
  0x41   :  { %149 = vmatprep.subr.mxu0 %v87_v32  ;;  %7935 = vmatprep.subr.mxu1 %v97_v43 }
  0x42   :  { %150 = vmatpush1.msra.mxu0 %v86_v33  ;;  %7936 = vmatpush3.msra.mxu1 %v97_v43 }
  0x43   :  { %151 = vmatprep.subr.mxu0 %v84_v35  ;;  %7937 = vmatprep.subr.mxu1 %v94_v44 }
  0x44   :  { %152 = vmatpush1.msra.mxu0 %v83_v36  ;;  %7938 = vmatpush3.msra.mxu1 %v94_v44 }
  0x45   :  { %153 = vmatprep.subr.mxu0 %v81_v38  ;;  %7939 = vmatprep.subr.mxu1 %v91_v46 }
  0x46   :  { %154 = vmatpush1.msra.mxu0 %v80_v39  ;;  %7940 = vmatpush3.msra.mxu1 %v91_v46 }
  0x47   :  { %155 = vmatprep.subr.mxu0 %v78_v41  ;;  %7941 = vmatprep.subr.mxu1 %v88_v48 }
  0x48   :  { %156 = vmatpush1.msra.mxu0 %v77_v42  ;;  %7942 = vmatpush3.msra.mxu1 %v88_v48 }
  0x49   :  { %190 = vmatmul.mubr.f32.vlgmr.msra.gmra.mxu0 %v9073_v14  ;;  %7961 = vmatprep.subr.mxu0 %v366_v45 }
  0x4a   :  { %195 = vmatprep.mubr.f32.mxu0 %v9004_v0  ;;  %7962 = vmatpush3.msra.mxu0 %v366_v45 }
  0x4b   :  { %7963 = vmatprep.subr.mxu0 %v365_v49  ;;  %7943 = vmatprep.subr.mxu1 %v85_v50 }
  0x4c   :  { %7964 = vmatpush3.msra.mxu0 %v365_v49  ;;  %7944 = vmatpush3.msra.mxu1 %v85_v50 }
  0x4d   :  { %196 = vmatmul.mubr.f32.gmra.mxu0 %v70_v47  ;;  %7945 = vmatprep.subr.mxu1 %v82_v52 }
  0x4e   :  { %201 = vmatprep.mubr.f32.mxu0 %v9004_v0  ;;  %7946 = vmatpush3.msra.mxu1 %v82_v52 }
  0x4f   :  { %7965 = vmatprep.subr.mxu0 %v364_v53  ;;  %7947 = vmatprep.subr.mxu1 %v79_v54 }
  0x50   :  { %7966 = vmatpush3.msra.mxu0 %v364_v53  ;;  %7948 = vmatpush3.msra.mxu1 %v79_v54 }
  0x51   :  { %202 = vmatmul.mubr.f32.gmra.mxu0 %v9085_v51  ;;  %7950 = vmatmul.mubr.f32.vlgmr.msra.gmra.mxu1 %v70_v47 }
  0x52   :  { %207 = vmatprep.mubr.f32.mxu0 %v9004_v0  ;;  %8005 = vmatprep.subr.mxu1 %v366_v45 }
  0x53   :  { %7967 = vmatprep.subr.mxu0 %v363_v56  ;;  %8006 = vmatpush3.msra.mxu1 %v366_v45 }
  0x54   :  { %7968 = vmatpush3.msra.mxu0 %v363_v56  ;;  %8007 = vmatprep.subr.mxu1 %v365_v49 }
  0x55   :  { %208 = vmatmul.mubr.f32.gmra.mxu0 %v72_v55  ;;  %8008 = vmatpush3.msra.mxu1 %v365_v49 }
  0x56   :  { %213 = vmatprep.mubr.f32.mxu0 %v9004_v0  ;;  %8009 = vmatprep.subr.mxu1 %v364_v53 }
  0x57   :  { %7969 = vmatprep.subr.mxu0 %v362_v58  ;;  %8010 = vmatpush3.msra.mxu1 %v364_v53 }
  0x58   :  { %7970 = vmatpush3.msra.mxu0 %v362_v58  ;;  %8011 = vmatprep.subr.mxu1 %v363_v56 }
  0x59   :  { %214 = vmatmul.mubr.f32.gmra.mxu0 %v73_v57  ;;  %8012 = vmatpush3.msra.mxu1 %v363_v56 }
  0x5a   :  { %219 = vmatprep.mubr.f32.mxu0 %v9004_v0  ;;  %7971 = vmatprep.subr.mxu0 %v361_v60 }
  0x5b   :  { %8013 = vmatprep.subr.mxu1 %v362_v58  ;;  %7972 = vmatpush3.msra.mxu0 %v361_v60 }
  0x5c   :  { %8014 = vmatpush3.msra.mxu1 %v362_v58  ;;  %7973 = vmatprep.subr.mxu0 %v360_v62 }
  0x5d   :  { %220 = vmatmul.mubr.f32.gmra.mxu0 %v74_v59  ;;  %8015 = vmatprep.subr.mxu1 %v361_v60 }
  0x5e   :  { %225 = vmatprep.mubr.f32.mxu0 %v9004_v0  ;;  %7974 = vmatpush3.msra.mxu0 %v360_v62 }
  0x5f   :  { %8016 = vmatpush3.msra.mxu1 %v361_v60  ;;  %7975 = vmatprep.subr.mxu0 %v359_v63 }
  0x60   :  { %8017 = vmatprep.subr.mxu1 %v360_v62  ;;  %7976 = vmatpush3.msra.mxu0 %v359_v63 }
  0x61   :  { %226 = vmatmul.mubr.f32.gmra.mxu0 %v75_v61  ;;  %8018 = vmatpush3.msra.mxu1 %v360_v62 }
  0x62   :  { %231 = vmatprep.mubr.f32.mxu0 %v9004_v0  ;;  %8019 = vmatprep.subr.mxu1 %v359_v63  ;;  %v356_v0 = vld [vmem:[%s12350_s2 + $0x28] sm:$0xff] }
  0x63   :  { %7977 = vmatprep.subr.mxu0 %v358_v2  ;;  %8020 = vmatpush3.msra.mxu1 %v359_v63 }
  0x64   :  { %7978 = vmatpush3.msra.mxu0 %v358_v2  ;;  %8021 = vmatprep.subr.mxu1 %v358_v2 }
  0x65   :  { %232 = vmatmul.mubr.f32.gmra.mxu0 %v76_v1  ;;  %7979 = vmatprep.subr.mxu0 %v357_v3 }
  0x66   :  { %7952 = vmatprep.mubr.f32.mxu1 %v9085_v51  ;;  %7980 = vmatpush3.msra.mxu0 %v357_v3 }
  0x67   :  { %8022 = vmatpush3.msra.mxu1 %v358_v2  ;;  %7981 = vmatprep.subr.mxu0 %v356_v0  ;;  %v9222_v2 = vld [vmem:[%s12351_s3] sm:$0xff] }
  0x68   :  { %7953 = vmatmul.mubr.f32.gmra.mxu1 %v72_v55  ;;  %8023 = vmatprep.subr.mxu1 %v357_v3  ;;  %v488_v55 = vlaneseq }
  0x69   :  { %7982 = vmatpush3.msra.mxu0 %v356_v0  ;;  %8024 = vmatpush3.msra.mxu1 %v357_v3 }
  0x6a   :  { %7983 = vmatprep.subr.mxu0 %v355_v4  ;;  %8025 = vmatprep.subr.mxu1 %v356_v0  ;;  %v9216_v58 = vshrl.u32 %v488_v55, 7 }
  0x6b   :  { %7955 = vmatprep.mubr.f32.mxu1 %v73_v57  ;;  %7984 = vmatpush3.msra.mxu0 %v355_v4 }
  0x6c   :  { %8026 = vmatpush3.msra.mxu1 %v356_v0  ;;  %7985 = vmatprep.subr.mxu0 %v354_v5  ;;  %12387 = vst [vmem:[#allocation20_spill] sm:$0xff] %v9216_v58 }
  0x6d   :  { %7956 = vmatmul.mubr.f32.gmra.mxu1 %v74_v59  ;;  %8027 = vmatprep.subr.mxu1 %v355_v4  ;;  %v631_v59 = vsub.s32 1, %v9216_v58 }
  0x6e   :  { %7986 = vmatpush3.msra.mxu0 %v354_v5  ;;  %8028 = vmatpush3.msra.mxu1 %v355_v4 }
  0x6f   :  { %7958 = vmatprep.mubr.f32.mxu1 %v75_v61  ;;  %8029 = vmatprep.subr.mxu1 %v354_v5  ;;  %v9226_v4 = vrot.slane %v9222_v2, %v631_v59  ;;  %v9333_v59 = vld [vmem:[%s12352_s4 + $0x40] sm:$0xff] }
  0x70   :  { %8030 = vmatpush3.msra.mxu1 %v354_v5  ;;  %7987 = vmatprep.subr.mxu0 %v353_v6 }
  0x71   :  { %7959 = vmatmul.mubr.f32.gmra.mxu1 %v76_v1  ;;  %8031 = vmatprep.subr.mxu1 %v353_v6 }
  0x72   :  { %7988 = vmatpush3.msra.mxu0 %v353_v6  ;;  %8032 = vmatpush3.msra.mxu1 %v353_v6 }
  0x73   :  { %7989 = vmatprep.subr.mxu0 %v352_v7  ;;  %8033 = vmatprep.subr.mxu1 %v352_v7 }
  0x74   :  { %7990 = vmatpush3.msra.mxu0 %v352_v7  ;;  %8034 = vmatpush3.msra.mxu1 %v352_v7 }
  0x75   :  { %7991 = vmatprep.subr.mxu0 %v351_v8  ;;  %8035 = vmatprep.subr.mxu1 %v351_v8 }
  0x76   :  { %7992 = vmatpush3.msra.mxu0 %v351_v8  ;;  %8036 = vmatpush3.msra.mxu1 %v351_v8  ;;  %v9239_v8 = vld [vmem:[%s12352_s4 + $0x78] sm:$0xff] }
  0x77   :  { %8049 = vmatprep.subr.mxu0 %v9239_v8  ;;  %8093 = vmatprep.subr.mxu1 %v9239_v8 }
 0x109   :  { %v9136_v9 = vpop.f32.mrf.mxu0 }
 0x10a   :  { %v343_v10 = vmul.f32 %v9136_v9, %v9136_v9 }
 0x10b   :  { %v9140_v11 = vpop.f32.mrf.mxu0 }
 0x10c   :  { %v500_v12 = vmul.f32 %v9140_v11, %v9140_v11  ;;  %7993 = vmatprep.mubr.f32.mxu0 %v343_v10 }
 0x10d   :  { %v9144_v13 = vpop.f32.mrf.mxu0 }
 0x10e   :  { %v344_v14 = vmul.f32 %v9144_v13, %v9144_v13  ;;  %8037 = vmatprep.mubr.f32.mxu1 %v500_v12 }
 0x10f   :  { %v9148_v15 = vpop.f32.mrf.mxu0 }
 0x110   :  { %v501_v16 = vmul.f32 %v9148_v15, %v9148_v15  ;;  %7994 = vmatmul.mubr.f32.vlgmr.msra.gmra.mxu0 %v344_v14 }
 0x111   :  { %v9152_v17 = vpop.f32.mrf.mxu0  ;;  %v9200_v41 = vpop.f32.mrf.mxu1  ;;  %8050 = vmatpush3.msra.mxu0 %v9239_v8 }
 0x112   :  { %v345_v18 = vmul.f32 %v9152_v17, %v9152_v17  ;;  %8038 = vmatmul.mubr.f32.vlgmr.msra.gmra.mxu1 %v501_v16  ;;  %12379 = vst [vmem:[#allocation12_spill] sm:$0xff] %v9200_v41 }
 0x113   :  { %v9156_v19 = vpop.f32.mrf.mxu0  ;;  %v9202_v42 = vpop.f32.mrf.mxu1  ;;  %8094 = vmatpush3.msra.mxu1 %v9239_v8 }
 0x114   :  { %v502_v20 = vmul.f32 %v9156_v19, %v9156_v19  ;;  %7996 = vmatprep.mubr.f32.mxu0 %v345_v18  ;;  %12380 = vst [vmem:[#allocation13_spill] sm:$0xff] %v9202_v42 }
 0x115   :  { %v9160_v21 = vpop.f32.mrf.mxu0 }
 0x116   :  { %v346_v22 = vmul.f32 %v9160_v21, %v9160_v21  ;;  %8040 = vmatprep.mubr.f32.mxu1 %v502_v20 }
 0x117   :  { %v9164_v23 = vpop.f32.mrf.mxu0 }
 0x118   :  { %v503_v24 = vmul.f32 %v9164_v23, %v9164_v23  ;;  %7997 = vmatmul.mubr.f32.gmra.mxu0 %v346_v22 }
 0x119   :  { %v9168_v25 = vpop.f32.mrf.mxu0 }
 0x11a   :  { %v347_v26 = vmul.f32 %v9168_v25, %v9168_v25  ;;  %8041 = vmatmul.mubr.f32.gmra.mxu1 %v503_v24 }
 0x11b   :  { %v9172_v27 = vpop.f32.mrf.mxu0 }
 0x11c   :  { %v504_v28 = vmul.f32 %v9172_v27, %v9172_v27  ;;  %7999 = vmatprep.mubr.f32.mxu0 %v347_v26 }
 0x11d   :  { %v9176_v29 = vpop.f32.mrf.mxu0 }
 0x11e   :  { %v348_v30 = vmul.f32 %v9176_v29, %v9176_v29  ;;  %8043 = vmatprep.mubr.f32.mxu1 %v504_v28  ;;  %v9264_v28 = vld [vmem:[%s12352_s4 + $0x68] sm:$0xff] }
 0x11f   :  { %v9180_v31 = vpop.f32.mrf.mxu0 }
 0x120   :  { %v505_v32 = vmul.f32 %v9180_v31, %v9180_v31  ;;  %8000 = vmatmul.mubr.f32.gmra.mxu0 %v348_v30 }
 0x121   :  { %v9184_v33 = vpop.f32.mrf.mxu0 }
 0x122   :  { %v349_v34 = vmul.f32 %v9184_v33, %v9184_v33  ;;  %8044 = vmatmul.mubr.f32.gmra.mxu1 %v505_v32 }
 0x123   :  { %v9188_v35 = vpop.f32.mrf.mxu0 }
 0x124   :  { %v506_v36 = vmul.f32 %v9188_v35, %v9188_v35  ;;  %8002 = vmatprep.mubr.f32.mxu0 %v349_v34 }
 0x125   :  { %v9192_v37 = vpop.f32.mrf.mxu0 }
 0x126   :  { %v350_v38 = vmul.f32 %v9192_v37, %v9192_v37  ;;  %8046 = vmatprep.mubr.f32.mxu1 %v506_v36 }
 0x127   :  { %v9196_v39 = vpop.f32.mrf.mxu0 }
 0x128   :  { %v507_v40 = vmul.f32 %v9196_v39, %v9196_v39  ;;  %8003 = vmatmul.mubr.f32.gmra.mxu0 %v350_v38  ;;  %v9204_v43 = vpop.f32.mrf.mxu1  ;;  %v9290_v38 = vld [vmem:[%s12352_s4 + $0x58] sm:$0xff] }
 0x129   :  { %12381 = vst [vmem:[#allocation14_spill] sm:$0xff] %v9204_v43 }
 0x12a   :  { %8047 = vmatmul.mubr.f32.gmra.mxu1 %v507_v40  ;;  %v9206_v44 = vpop.f32.mrf.mxu1 }
 0x12b   :  { %12382 = vst [vmem:[#allocation15_spill] sm:$0xff] %v9206_v44 }
 0x12d   :  { %v9208_v45 = vpop.f32.mrf.mxu1 }
 0x12e   :  { %12383 = vst [vmem:[#allocation16_spill] sm:$0xff] %v9208_v45 }
 0x12f   :  { %v9210_v46 = vpop.f32.mrf.mxu1 }
 0x130   :  { %12384 = vst [vmem:[#allocation17_spill] sm:$0xff] %v9210_v46 }
 0x131   :  { %v9212_v47 = vpop.f32.mrf.mxu1 }
 0x132   :  { %12385 = vst [vmem:[#allocation18_spill] sm:$0xff] %v9212_v47 }
 0x133   :  { %v9214_v48 = vpop.f32.mrf.mxu1 }
 0x134   :  { %12386 = vst [vmem:[#allocation19_spill] sm:$0xff] %v9214_v48 }
 0x1d0   :  { %v7995_v7 = vpop.f32.mrf.mxu0 }
 0x1d1   :  { %v439_v30 = vadd.f32 1e-06, %v7995_v7 }
 0x1d2   :  { %v8039_v49 = vpop.f32.mrf.mxu1  ;;  %v433_v18 = vpop.f32.mrf.mxu0 }
 0x1d3   :  { %v580_v50 = vadd.f32 1e-06, %v8039_v49 }
 0x1d4   :  { %v574_v51 = vpop.f32.mrf.mxu1 }
 0x1d5   :  { %v575_v52 = vadd.f32 1e-06, %v574_v51  ;;  %8717 = vrsqrt.f32 %v580_v50 }
 0x1d7   :  { %8719 = vrsqrt.f32 %v575_v52  ;;  %v9301_v52 = vld [vmem:[%s12352_s4 + $0x50] sm:$0xff] }
 0x1d8   :  { %v7998_v36 = vpop.f32.mrf.mxu0 }
 0x1da   :  { %v8042_v53 = vpop.f32.mrf.mxu1  ;;  %v443_v50 = vpop.f32.mrf.mxu0 }
 0x1db   :  { %v590_v54 = vadd.f32 1e-06, %v8042_v53 }
 0x1dc   :  { %v584_v56 = vpop.f32.mrf.mxu1 }
 0x1dd   :  { %v585_v57 = vadd.f32 1e-06, %v584_v56  ;;  %8721 = vrsqrt.f32 %v590_v54  ;;  %v449_v54 = vadd.f32 1e-06, %v7998_v36 }
 0x1df   :  { %8723 = vrsqrt.f32 %v585_v57  ;;  %v9321_v57 = vld [vmem:[%s12352_s4 + $0x48] sm:$0xff] }
 0x1e2   :  { %v8045_v60 = vpop.f32.mrf.mxu1  ;;  %v8718_v61 = vpop.eup %8717 }
 0x1e3   :  { %v600_v62 = vadd.f32 1e-06, %v8045_v60  ;;  %v622_v6 = vmul.f32 %v8718_v61, %v9148_v15 }
 0x1e4   :  { %v8720_v63 = vpop.eup %8719  ;;  %v594_v1 = vpop.f32.mrf.mxu1 }
 0x1e5   :  { %v595_v3 = vadd.f32 1e-06, %v594_v1  ;;  %v621_v0 = vmul.f32 %v8720_v63, %v9140_v11  ;;  %8725 = vrsqrt.f32 %v600_v62  ;;  %v9245_v11 = vld [vmem:[%s12352_s4 + $0x70] sm:$0xff]  ;;  %v9249_v15 = vmul.f32 %v9226_v4, %v622_v6  ;;  %v9344_v1 = vld [vmem:[%s12352_s4 + $0x38] sm:$0xff] }
 0x1e6   :  { %8051 = vmatprep.subr.mxu0 %v9245_v11  ;;  %8095 = vmatprep.subr.mxu1 %v9245_v11 }
 0x1e7   :  { %8727 = vrsqrt.f32 %v595_v3  ;;  %v9229_v5 = vmul.f32 %v9226_v4, %v621_v0  ;;  %8052 = vmatpush3.msra.mxu0 %v9245_v11  ;;  %8096 = vmatpush3.msra.mxu1 %v9245_v11 }
 0x1e8   :  { %8053 = vmatprep.subr.mxu0 %v9264_v28  ;;  %8097 = vmatprep.subr.mxu1 %v9264_v28 }
 0x1e9   :  { %773 = vrot.lane.b32.xlu1 %v9229_v5, %s9005_s26  ;;  %741 = vrot.lane.b32.xlu0 %v9229_v5, %s9006_s27 }
 0x1ea   :  { %v8048_v10 = vpop.f32.mrf.mxu1  ;;  %v8722_v12 = vpop.eup %8721  ;;  %8054 = vmatpush3.msra.mxu0 %v9264_v28  ;;  %8098 = vmatpush3.msra.mxu1 %v9264_v28 }
 0x1eb   :  { %v610_v14 = vadd.f32 1e-06, %v8048_v10  ;;  %v624_v22 = vmul.f32 %v8722_v12, %v9164_v23  ;;  %v434_v23 = vadd.f32 1e-06, %v433_v18  ;;  %v490_v12 = vsub.s32 0, %v9216_v58 }
 0x1ec   :  { %v8724_v16 = vpop.eup %8723  ;;  %v604_v20 = vpop.f32.mrf.mxu1 }
 0x1ed   :  { %v605_v24 = vadd.f32 1e-06, %v604_v20  ;;  %775 = vrot.lane.b32.xlu1 %v9249_v15, %s9005_s26  ;;  %743 = vrot.lane.b32.xlu0 %v9249_v15, %s9006_s27  ;;  %v623_v26 = vmul.f32 %v8724_v16, %v9156_v19  ;;  %8729 = vrsqrt.f32 %v610_v14  ;;  %v9269_v32 = vmul.f32 %v9226_v4, %v624_v22  ;;  %v9278_v19 = vld [vmem:[%s12352_s4 + $0x60] sm:$0xff] }
 0x1ee   :  { %8055 = vmatprep.subr.mxu0 %v9278_v19  ;;  %8099 = vmatprep.subr.mxu1 %v9278_v19  ;;  %v9383_v20 = vrot.slane %v9222_v2, %v490_v12 }
 0x1ef   :  { %8731 = vrsqrt.f32 %v605_v24  ;;  %v9272_v34 = vmul.f32 %v9226_v4, %v623_v26  ;;  %8056 = vmatpush3.msra.mxu0 %v9278_v19  ;;  %8100 = vmatpush3.msra.mxu1 %v9278_v19  ;;  %v9392_v26 = vld [vmem:[%s12352_s4 + $0x20] sm:$0xff] }
 0x1f0   :  { %8733 = vrsqrt.f32 %v439_v30  ;;  %8057 = vmatprep.subr.mxu0 %v9290_v38  ;;  %8101 = vmatprep.subr.mxu1 %v9290_v38 }
 0x1f1   :  { %747 = vrot.lane.b32.xlu1 %v9269_v32, %s9006_s27  ;;  %745 = vrot.lane.b32.xlu0 %v9272_v34, %s9006_s27  ;;  %8735 = vrsqrt.f32 %v434_v23 }
 0x1f2   :  { %v8726_v40 = vpop.eup %8725  ;;  %8058 = vmatpush3.msra.mxu0 %v9290_v38  ;;  %8102 = vmatpush3.msra.mxu1 %v9290_v38  ;;  %8737 = vrsqrt.f32 %v449_v54  ;;  %v9435_v54 = vld [vmem:[%s12352_s4 + $0x8] sm:$0xff] }
 0x1f3   :  { %v626_v51 = vmul.f32 %v8726_v40, %v9180_v31  ;;  %v444_v31 = vadd.f32 1e-06, %v443_v50  ;;  %8059 = vmatprep.subr.mxu0 %v9301_v52  ;;  %8103 = vmatprep.subr.mxu1 %v9301_v52  ;;  %v9411_v40 = vld [vmem:[%s12352_s4 + $0x18] sm:$0xff]  ;;  %v9423_v50 = vld [vmem:[%s12352_s4 + $0x10] sm:$0xff] }
 0x1f4   :  { %v8728_v49 = vpop.eup %8727  ;;  %8060 = vmatpush3.msra.mxu0 %v9301_v52  ;;  %8104 = vmatpush3.msra.mxu1 %v9301_v52 }
 0x1f5   :  { %779 = vrot.lane.b32.xlu1 %v9269_v32, %s9005_s26  ;;  %777 = vrot.lane.b32.xlu0 %v9272_v34, %s9005_s26  ;;  %v625_v53 = vmul.f32 %v8728_v49, %v9172_v27  ;;  %v9312_v55 = vmul.f32 %v9226_v4, %v626_v51  ;;  %v8001_v27 = vpop.f32.mrf.mxu0  ;;  %8739 = vrsqrt.f32 %v444_v31 }
 0x1f6   :  { %8061 = vmatprep.subr.mxu0 %v9321_v57  ;;  %8105 = vmatprep.subr.mxu1 %v9321_v57  ;;  %v459_v0 = vadd.f32 1e-06, %v8001_v27  ;;  %v9454_v27 = vld [vmem:[%s12352_s4] sm:$0xff] }
 0x1f7   :  { %v9315_v56 = vmul.f32 %v9226_v4, %v625_v53  ;;  %8062 = vmatpush3.msra.mxu0 %v9321_v57  ;;  %8106 = vmatpush3.msra.mxu1 %v9321_v57  ;;  %v453_v62 = vpop.f32.mrf.mxu0 }
 0x1f8   :  { %8063 = vmatprep.subr.mxu0 %v9333_v59  ;;  %8107 = vmatprep.subr.mxu1 %v9333_v59  ;;  %v454_v6 = vadd.f32 1e-06, %v453_v62  ;;  %8741 = vrsqrt.f32 %v459_v0 }
 0x1f9   :  { %751 = vrot.lane.b32.xlu1 %v9312_v55, %s9006_s27  ;;  %749 = vrot.lane.b32.xlu0 %v9315_v56, %s9006_s27  ;;  %v8004_v16 = vpop.f32.mrf.mxu0 }
 0x1fa   :  { %v8730_v60 = vpop.eup %8729  ;;  %8064 = vmatpush3.msra.mxu0 %v9333_v59  ;;  %8108 = vmatpush3.msra.mxu1 %v9333_v59  ;;  %8743 = vrsqrt.f32 %v454_v6 }
 0x1fb   :  { %v628_v63 = vmul.f32 %v8730_v60, %v9196_v39  ;;  %8065 = vmatprep.subr.mxu0 %v9344_v1  ;;  %8109 = vmatprep.subr.mxu1 %v9344_v1  ;;  %v463_v24 = vpop.f32.mrf.mxu0 }
 0x1fc   :  { %v8732_v61 = vpop.eup %8731  ;;  %8066 = vmatpush3.msra.mxu0 %v9344_v1  ;;  %8110 = vmatpush3.msra.mxu1 %v9344_v1  ;;  %v464_v30 = vadd.f32 1e-06, %v463_v24 }
 0x1fd   :  { %783 = vrot.lane.b32.xlu1 %v9312_v55, %s9005_s26  ;;  %781 = vrot.lane.b32.xlu0 %v9315_v56, %s9005_s26  ;;  %v627_v3 = vmul.f32 %v8732_v61, %v9188_v35  ;;  %v8734_v39 = vpop.eup %8733  ;;  %v9355_v7 = vmul.f32 %v9226_v4, %v628_v63  ;;  %v9365_v35 = vld [vmem:[%s12352_s4 + $0x30] sm:$0xff] }
 0x1fe   :  { %v8736_v14 = vpop.eup %8735  ;;  %8067 = vmatprep.subr.mxu0 %v9365_v35  ;;  %8111 = vmatprep.subr.mxu1 %v9365_v35  ;;  %v481_v18 = vmul.f32 %v8734_v39, %v9144_v13 }
 0x1ff   :  { %v9358_v10 = vmul.f32 %v9226_v4, %v627_v3  ;;  %v9377_v4 = vld [vmem:[%s12352_s4 + $0x28] sm:$0xff]  ;;  %v480_v22 = vmul.f32 %v8736_v14, %v9136_v9  ;;  %8068 = vmatpush3.msra.mxu0 %v9365_v35  ;;  %8112 = vmatpush3.msra.mxu1 %v9365_v35  ;;  %v469_v9 = vadd.f32 1e-06, %v8004_v16  ;;  %v8738_v13 = vpop.eup %8737  ;;  %v707_v14 = vsub.s32 4, %v9216_v58 }
 0x200   :  { %8069 = vmatprep.subr.mxu0 %v9377_v4  ;;  %8113 = vmatprep.subr.mxu1 %v9377_v4  ;;  %v9402_v23 = vmul.f32 %v9383_v20, %v481_v18  ;;  %v483_v51 = vmul.f32 %v8738_v13, %v9160_v21 }
 0x201   :  { %755 = vrot.lane.b32.xlu1 %v9355_v7, %s9006_s27  ;;  %753 = vrot.lane.b32.xlu0 %v9358_v10, %s9006_s27  ;;  %v9405_v36 = vmul.f32 %v9383_v20, %v480_v22  ;;  %8745 = vrsqrt.f32 %v469_v9 }
 0x202   :  { %8070 = vmatpush3.msra.mxu0 %v9377_v4  ;;  %8114 = vmatpush3.msra.mxu1 %v9377_v4  ;;  %v8740_v49 = vpop.eup %8739  ;;  %8747 = vrsqrt.f32 %v464_v30  ;;  %v9445_v21 = vmul.f32 %v9383_v20, %v483_v51 }
 0x203   :  { %8071 = vmatprep.subr.mxu0 %v9392_v26  ;;  %8115 = vmatprep.subr.mxu1 %v9392_v26  ;;  %v482_v53 = vmul.f32 %v8740_v49, %v9152_v17 }
 0x204   :  { %8072 = vmatpush3.msra.mxu0 %v9392_v26  ;;  %8116 = vmatpush3.msra.mxu1 %v9392_v26 }
 0x205   :  { %787 = vrot.lane.b32.xlu1 %v9355_v7, %s9005_s26  ;;  %785 = vrot.lane.b32.xlu0 %v9358_v10, %s9005_s26  ;;  %v8742_v17 = vpop.eup %8741  ;;  %v9448_v31 = vmul.f32 %v9383_v20, %v482_v53 }
 0x206   :  { %8073 = vmatprep.subr.mxu0 %v9411_v40  ;;  %8117 = vmatprep.subr.mxu1 %v9411_v40  ;;  %v485_v61 = vmul.f32 %v8742_v17, %v9176_v29 }
 0x207   :  { %8074 = vmatpush3.msra.mxu0 %v9411_v40  ;;  %8118 = vmatpush3.msra.mxu1 %v9411_v40  ;;  %v8744_v60 = vpop.eup %8743 }
 0x208   :  { %8075 = vmatprep.subr.mxu0 %v9423_v50  ;;  %8119 = vmatprep.subr.mxu1 %v9423_v50  ;;  %v484_v62 = vmul.f32 %v8744_v60, %v9168_v25  ;;  %v9476_v3 = vmul.f32 %v9383_v20, %v485_v61 }
 0x209   :  { %655 = vrot.lane.b32.xlu1 %v9402_v23, %s9006_s27  ;;  %653 = vrot.lane.b32.xlu0 %v9405_v36, %s9006_s27 }
 0x20a   :  { %8076 = vmatpush3.msra.mxu0 %v9423_v50  ;;  %8120 = vmatpush3.msra.mxu1 %v9423_v50  ;;  %v9479_v25 = vmul.f32 %v9383_v20, %v484_v62 }
 0x20b   :  { %8077 = vmatprep.subr.mxu0 %v9435_v54  ;;  %8121 = vmatprep.subr.mxu1 %v9435_v54 }
 0x20c   :  { %8078 = vmatpush3.msra.mxu0 %v9435_v54  ;;  %8122 = vmatpush3.msra.mxu1 %v9435_v54 }
 0x20d   :  { %691 = vrot.lane.b32.xlu1 %v9402_v23, %s9005_s26  ;;  %689 = vrot.lane.b32.xlu0 %v9405_v36, %s9005_s26 }
 0x20e   :  { %8079 = vmatprep.subr.mxu0 %v9454_v27  ;;  %8123 = vmatprep.subr.mxu1 %v9454_v27  ;;  %v8746_v63 = vpop.eup %8745 }
 0x20f   :  { %8080 = vmatpush3.msra.mxu0 %v9454_v27  ;;  %8124 = vmatpush3.msra.mxu1 %v9454_v27  ;;  %v8748_v29 = vpop.eup %8747  ;;  %v487_v0 = vmul.f32 %v8746_v63, %v9192_v37  ;;  %v643_v37 = vsub.s32 2, %v9216_v58 }
 0x210   :  { %8137 = vmatprep.subr.mxu0 %v9239_v8  ;;  %8181 = vmatprep.subr.mxu1 %v9239_v8  ;;  %v486_v39 = vmul.f32 %v8748_v29, %v9184_v33  ;;  %v671_v33 = vsub.s32 3, %v9216_v58 }
 0x211   :  { %659 = vrot.lane.b32.xlu1 %v9445_v21, %s9006_s27  ;;  %657 = vrot.lane.b32.xlu0 %v9448_v31, %s9006_s27  ;;  %v9492_v6 = vmul.f32 %v9383_v20, %v487_v0  ;;  %v9510_v18 = vrot.slane %v9222_v2, %v643_v37 }
 0x212   :  { %v9495_v12 = vmul.f32 %v9383_v20, %v486_v39  ;;  %v9507_v16 = vrot.slane %v9222_v2, %v671_v33  ;;  %v9513_v20 = vrot.slane %v9222_v2, %v707_v14 }
 0x213   :  { %v733_v9 = vmul.f32 %v9510_v18, %v9229_v5  ;;  %v734_v60 = vmul.f32 %v9510_v18, %v9249_v15 }
 0x215   :  { %695 = vrot.lane.b32.xlu1 %v9445_v21, %s9005_s26  ;;  %693 = vrot.lane.b32.xlu0 %v9448_v31, %s9005_s26 }
 0x219   :  { %663 = vrot.lane.b32.xlu1 %v9476_v3, %s9006_s27  ;;  %661 = vrot.lane.b32.xlu0 %v9479_v25, %s9006_s27 }
 0x21d   :  { %699 = vrot.lane.b32.xlu1 %v9476_v3, %s9005_s26  ;;  %697 = vrot.lane.b32.xlu0 %v9479_v25, %s9005_s26 }
 0x221   :  { %667 = vrot.lane.b32.xlu1 %v9492_v6, %s9006_s27  ;;  %665 = vrot.lane.b32.xlu0 %v9495_v12, %s9006_s27  ;;  %s9007_s27 = smov 112  }
 0x225   :  { %701 = vrot.lane.b32.xlu0 %v9495_v12, %s9005_s26 }
 0x25b   :  { %v774_v22 = vpop.permute.xlu1 %773  ;;  %v742_v24 = vpop.permute.xlu0 %741 }
 0x25c   :  { %v757_v13 = vmul.f32 %v742_v24, %v9507_v16  ;;  %v789_v30 = vmul.f32 %v774_v22, %v9513_v20  ;;  %v736_v22 = vmul.f32 %v9510_v18, %v9269_v32  ;;  %v735_v24 = vmul.f32 %v9510_v18, %v9272_v34 }
 0x25e   :  { %v765_v49 = vadd.f32 %v757_v13, %v733_v9 }
 0x25f   :  { %v776_v51 = vpop.permute.xlu1 %775  ;;  %v744_v53 = vpop.permute.xlu0 %743 }
 0x260   :  { %v9519_v17 = vadd.f32 %v789_v30, %v765_v49  ;;  %v758_v2 = vmul.f32 %v744_v53, %v9507_v16  ;;  %v790_v61 = vmul.f32 %v776_v51, %v9513_v20 }
 0x262   :  { %v766_v62 = vadd.f32 %v758_v2, %v734_v60  ;;  %935 = vrot.lane.b32.xlu0 %v9519_v17, %s9007_s27 }
 0x263   :  { %v748_v5 = vpop.permute.xlu1 %747  ;;  %v746_v63 = vpop.permute.xlu0 %745 }
 0x264   :  { %v9527_v29 = vadd.f32 %v790_v61, %v766_v62  ;;  %v760_v39 = vmul.f32 %v748_v5, %v9507_v16  ;;  %v759_v33 = vmul.f32 %v746_v63, %v9507_v16  ;;  %v737_v62 = vmul.f32 %v9510_v18, %v9315_v56 }
 0x266   :  { %937 = vrot.lane.b32.xlu1 %v9527_v29, %s9007_s27  ;;  %703 = vrot.lane.b32.xlu0 %v9492_v6, %s9005_s26  ;;  %v768_v30 = vadd.f32 %v760_v39, %v736_v22  ;;  %v767_v49 = vadd.f32 %v759_v33, %v735_v24  ;;  %s9009_s26 = smov 80  }
 0x267   :  { %v780_v15 = vpop.permute.xlu1 %779  ;;  %v778_v0 = vpop.permute.xlu0 %777 }
 0x268   :  { %v792_v9 = vmul.f32 %v780_v15, %v9513_v20  ;;  %v791_v13 = vmul.f32 %v778_v0, %v9513_v20 }
 0x26a   :  { %1066 = vrot.lane.b32.xlu1 %v9527_v29, %s9008_s15  ;;  %1064 = vrot.lane.b32.xlu0 %v9519_v17, %s9008_s15  ;;  %v9549_v60 = vadd.f32 %v792_v9, %v768_v30  ;;  %v9551_v32 = vadd.f32 %v791_v13, %v767_v49  ;;  %v738_v9 = vmul.f32 %v9510_v18, %v9312_v55 }
 0x26b   :  { %v752_v37 = vpop.permute.xlu1 %751  ;;  %v750_v14 = vpop.permute.xlu0 %749 }
 0x26c   :  { %v761_v34 = vmul.f32 %v750_v14, %v9507_v16  ;;  %v739_v14 = vmul.f32 %v9510_v18, %v9358_v10  ;;  %v762_v22 = vmul.f32 %v752_v37, %v9507_v16 }
 0x26e   :  { %1195 = vrot.lane.b32.xlu1 %v9527_v29, %s9009_s26  ;;  %1193 = vrot.lane.b32.xlu0 %v9519_v17, %s9009_s26  ;;  %v769_v63 = vadd.f32 %v761_v34, %v737_v62  ;;  %v770_v34 = vadd.f32 %v762_v22, %v738_v9  ;;  %v646_v62 = vmul.f32 %v9510_v18, %v9402_v23 }
 0x26f   :  { %v784_v51 = vpop.permute.xlu1 %783  ;;  %v782_v53 = vpop.permute.xlu0 %781 }
 0x270   :  { %v793_v5 = vmul.f32 %v782_v53, %v9513_v20  ;;  %v794_v13 = vmul.f32 %v784_v51, %v9513_v20  ;;  %v740_v51 = vmul.f32 %v9510_v18, %v9355_v7 }
 0x272   :  { %941 = vrot.lane.b32.xlu1 %v9549_v60, %s9007_s27  ;;  %1068 = vrot.lane.b32.xlu0 %v9551_v32, %s9008_s15  ;;  %v9566_v33 = vadd.f32 %v793_v5, %v769_v63  ;;  %v645_v5 = vmul.f32 %v9510_v18, %v9405_v36  ;;  %v9592_v55 = vadd.f32 %v794_v13, %v770_v34 }
 0x273   :  { %v756_v2 = vpop.permute.xlu1 %755  ;;  %v754_v61 = vpop.permute.xlu0 %753  ;;  %v647_v34 = vmul.f32 %v9510_v18, %v9448_v31 }
 0x274   :  { %v763_v15 = vmul.f32 %v754_v61, %v9507_v16  ;;  %v764_v61 = vmul.f32 %v756_v2, %v9507_v16 }
 0x276   :  { %1070 = vrot.lane.b32.xlu1 %v9549_v60, %s9008_s15  ;;  %1197 = vrot.lane.b32.xlu0 %v9551_v32, %s9009_s26  ;;  %v771_v24 = vadd.f32 %v763_v15, %v739_v14 }
 0x277   :  { %v788_v0 = vpop.permute.xlu1 %787  ;;  %v786_v39 = vpop.permute.xlu0 %785 }
 0x278   :  { %v795_v56 = vmul.f32 %v786_v39, %v9513_v20  ;;  %v796_v63 = vmul.f32 %v788_v0, %v9513_v20 }
 0x27a   :  { %1199 = vrot.lane.b32.xlu1 %v9549_v60, %s9009_s26  ;;  %943 = vrot.lane.b32.xlu0 %v9566_v33, %s9007_s27  ;;  %v9579_v53 = vadd.f32 %v795_v56, %v771_v24  ;;  %v772_v56 = vadd.f32 %v764_v61, %v740_v51 }
 0x27b   :  { %v656_v30 = vpop.permute.xlu1 %655  ;;  %v654_v49 = vpop.permute.xlu0 %653 }
 0x27c   :  { %v674_v10 = vmul.f32 %v9507_v16, %v656_v30  ;;  %v673_v37 = vmul.f32 %v9507_v16, %v654_v49  ;;  %v9603_v7 = vadd.f32 %v796_v63, %v772_v56 }
 0x27e   :  { %939 = vrot.lane.b32.xlu1 %v9551_v32, %s9007_s27  ;;  %947 = vrot.lane.b32.xlu0 %v9579_v53, %s9007_s27  ;;  %v682_v39 = vadd.f32 %v674_v10, %v646_v62  ;;  %v681_v23 = vadd.f32 %v673_v37, %v645_v5  ;;  %v648_v37 = vmul.f32 %v9510_v18, %v9445_v21 }
 0x27f   :  { %v692_v2 = vpop.permute.xlu1 %691  ;;  %v690_v15 = vpop.permute.xlu0 %689 }
 0x280   :  { %v710_v14 = vmul.f32 %v9513_v20, %v692_v2  ;;  %v709_v36 = vmul.f32 %v9513_v20, %v690_v15 }
 0x282   :  { %v718_v22 = vadd.f32 %v710_v14, %v682_v39  ;;  %v717_v24 = vadd.f32 %v709_v36, %v681_v23  ;;  %945 = vrot.lane.b32.xlu1 %v9592_v55, %s9007_s27  ;;  %1072 = vrot.lane.b32.xlu0 %v9566_v33, %s9008_s15 }
 0x283   :  { %v660_v0 = vpop.permute.xlu1 %659  ;;  %v658_v9 = vpop.permute.xlu0 %657 }
 0x284   :  { %v9605_v13 = vmul.f32 0.25, %v718_v22  ;;  %v9607_v30 = vmul.f32 0.25, %v717_v24  ;;  %v676_v49 = vmul.f32 %v9507_v16, %v660_v0  ;;  %v675_v10 = vmul.f32 %v9507_v16, %v658_v9 }
 0x285   :  { %v650_v0 = vmul.f32 %v9510_v18, %v9476_v3  ;;  %v649_v9 = vmul.f32 %v9510_v18, %v9479_v25 }
 0x286   :  { %949 = vrot.lane.b32.xlu1 %v9603_v7, %s9007_s27  ;;  %1201 = vrot.lane.b32.xlu0 %v9566_v33, %s9009_s26  ;;  %v822_v61 = vmul.f32 %v9519_v17, %v9607_v30  ;;  %v823_v51 = vmul.f32 %v9527_v29, %v9605_v13  ;;  %v684_v63 = vadd.f32 %v676_v49, %v648_v37 }
 0x287   :  { %v696_v62 = vpop.permute.xlu1 %695  ;;  %v694_v5 = vpop.permute.xlu0 %693  ;;  %v683_v2 = vadd.f32 %v675_v10, %v647_v34 }
 0x288   :  { %v712_v21 = vmul.f32 %v9513_v20, %v696_v62  ;;  %v711_v31 = vmul.f32 %v9513_v20, %v694_v5  ;;  %8081 = vmatprep.mubr.f32.mxu0 %v822_v61 }
 0x289   :  { %8082 = vmatmul.mubr.f32.vlgmr.msra.gmra.mxu0 %v823_v51 }
 0x28a   :  { %v720_v15 = vadd.f32 %v712_v21, %v684_v63  ;;  %v719_v39 = vadd.f32 %v711_v31, %v683_v2  ;;  %1074 = vrot.lane.b32.xlu1 %v9592_v55, %s9008_s15  ;;  %1322 = vrot.lane.b32.xlu0 %v9519_v17, %s9010_s16  ;;  %v652_v63 = vmul.f32 %v9510_v18, %v9492_v6 }
 0x28b   :  { %v664_v23 = vpop.permute.xlu1 %663  ;;  %v662_v14 = vpop.permute.xlu0 %661  ;;  %8138 = vmatpush3.msra.mxu0 %v9239_v8  ;;  %v651_v6 = vmul.f32 %v9510_v18, %v9495_v12 }
 0x28c   :  { %v9630_v36 = vmul.f32 0.25, %v720_v15  ;;  %v9632_v56 = vmul.f32 0.25, %v719_v39  ;;  %v678_v22 = vmul.f32 %v9507_v16, %v664_v23  ;;  %v677_v24 = vmul.f32 %v9507_v16, %v662_v14  ;;  %8139 = vmatprep.subr.mxu0 %v9245_v11 }
 0x28d   :  { %8140 = vmatpush3.msra.mxu0 %v9245_v11 }
 0x28e   :  { %1203 = vrot.lane.b32.xlu1 %v9592_v55, %s9009_s26  ;;  %1451 = vrot.lane.b32.xlu0 %v9519_v17, %s9011_s17  ;;  %v824_v49 = vmul.f32 %v9551_v32, %v9632_v56  ;;  %v686_v10 = vadd.f32 %v678_v22, %v650_v0  ;;  %v825_v3 = vmul.f32 %v9549_v60, %v9630_v36 }
 0x28f   :  { %v700_v37 = vpop.permute.xlu1 %699  ;;  %v698_v34 = vpop.permute.xlu0 %697  ;;  %8141 = vmatprep.subr.mxu0 %v9264_v28  ;;  %v685_v61 = vadd.f32 %v677_v24, %v649_v9 }
 0x290   :  { %v714_v25 = vmul.f32 %v9513_v20, %v700_v37  ;;  %v713_v62 = vmul.f32 %v9513_v20, %v698_v34  ;;  %8084 = vmatprep.mubr.f32.mxu0 %v824_v49  ;;  %8142 = vmatpush3.msra.mxu0 %v9264_v28 }
 0x291   :  { %8085 = vmatmul.mubr.f32.gmra.mxu0 %v825_v3  ;;  %8143 = vmatprep.subr.mxu0 %v9278_v19 }
 0x292   :  { %v722_v5 = vadd.f32 %v714_v25, %v686_v10  ;;  %v721_v51 = vadd.f32 %v713_v62, %v685_v61  ;;  %1078 = vrot.lane.b32.xlu1 %v9603_v7, %s9008_s15  ;;  %1326 = vrot.lane.b32.xlu0 %v9551_v32, %s9010_s16 }
 0x293   :  { %v668_v2 = vpop.permute.xlu1 %667  ;;  %v666_v21 = vpop.permute.xlu0 %665  ;;  %8144 = vmatpush3.msra.mxu0 %v9278_v19 }
 0x294   :  { %v9662_v31 = vmul.f32 0.25, %v722_v5  ;;  %v9664_v15 = vmul.f32 0.25, %v721_v51  ;;  %v680_v39 = vmul.f32 %v9507_v16, %v668_v2  ;;  %v679_v23 = vmul.f32 %v9507_v16, %v666_v21  ;;  %8145 = vmatprep.subr.mxu0 %v9290_v38 }
 0x295   :  { %8146 = vmatpush3.msra.mxu0 %v9290_v38 }
 0x296   :  { %v9670_v14 = vadd.f32 %v680_v39, %v652_v63  ;;  %1207 = vrot.lane.b32.xlu1 %v9603_v7, %s9009_s26  ;;  %1455 = vrot.lane.b32.xlu0 %v9551_v32, %s9011_s17  ;;  %v826_v22 = vmul.f32 %v9566_v33, %v9664_v15  ;;  %v827_v16 = vmul.f32 %v9592_v55, %v9662_v31 }
 0x297   :  { %v702_v24 = vpop.permute.xlu0 %701  ;;  %8147 = vmatprep.subr.mxu0 %v9301_v52  ;;  %v687_v0 = vadd.f32 %v679_v23, %v651_v6 }
 0x298   :  { %v715_v9 = vmul.f32 %v9513_v20, %v702_v24  ;;  %8087 = vmatprep.mubr.f32.mxu0 %v826_v22  ;;  %8148 = vmatpush3.msra.mxu0 %v9301_v52 }
 0x299   :  { %8088 = vmatmul.mubr.f32.gmra.mxu0 %v827_v16  ;;  %8149 = vmatprep.subr.mxu0 %v9321_v57 }
 0x29a   :  { %v723_v12 = vadd.f32 %v715_v9, %v687_v0  ;;  %1324 = vrot.lane.b32.xlu1 %v9527_v29, %s9010_s16  ;;  %1076 = vrot.lane.b32.xlu0 %v9579_v53, %s9008_s15 }
 0x29b   :  { %8150 = vmatpush3.msra.mxu0 %v9321_v57 }
 0x29c   :  { %v9691_v18 = vmul.f32 0.25, %v723_v12  ;;  %8151 = vmatprep.subr.mxu0 %v9333_v59 }
 0x29d   :  { %8152 = vmatpush3.msra.mxu0 %v9333_v59 }
 0x29e   :  { %1453 = vrot.lane.b32.xlu1 %v9527_v29, %s9011_s17  ;;  %1205 = vrot.lane.b32.xlu0 %v9579_v53, %s9009_s26  ;;  %v828_v49 = vmul.f32 %v9579_v53, %v9691_v18 }
 0x29f   :  { %8153 = vmatprep.subr.mxu0 %v9344_v1 }
 0x2a0   :  { %8090 = vmatprep.mubr.f32.mxu0 %v828_v49  ;;  %8154 = vmatpush3.msra.mxu0 %v9344_v1 }
 0x2a1   :  { %8155 = vmatprep.subr.mxu0 %v9365_v35 }
 0x2a2   :  { %1328 = vrot.lane.b32.xlu1 %v9549_v60, %s9010_s16  ;;  %1330 = vrot.lane.b32.xlu0 %v9566_v33, %s9010_s16 }
 0x2a3   :  { %8156 = vmatpush3.msra.mxu0 %v9365_v35 }
 0x2a4   :  { %8157 = vmatprep.subr.mxu0 %v9377_v4 }
 0x2a5   :  { %8158 = vmatpush3.msra.mxu0 %v9377_v4 }
 0x2a6   :  { %1457 = vrot.lane.b32.xlu1 %v9549_v60, %s9011_s17  ;;  %1459 = vrot.lane.b32.xlu0 %v9566_v33, %s9011_s17 }
 0x2a7   :  { %8159 = vmatprep.subr.mxu0 %v9392_v26 }
 0x2a8   :  { %8160 = vmatpush3.msra.mxu0 %v9392_v26 }
 0x2a9   :  { %8161 = vmatprep.subr.mxu0 %v9411_v40 }
 0x2aa   :  { %1332 = vrot.lane.b32.xlu1 %v9592_v55, %s9010_s16  ;;  %1580 = vrot.lane.b32.xlu0 %v9519_v17, %s9012_s18 }
 0x2ab   :  { %8162 = vmatpush3.msra.mxu0 %v9411_v40 }
 0x2ac   :  { %8163 = vmatprep.subr.mxu0 %v9423_v50 }
 0x2ad   :  { %8164 = vmatpush3.msra.mxu0 %v9423_v50 }
 0x2ae   :  { %1461 = vrot.lane.b32.xlu1 %v9592_v55, %s9011_s17  ;;  %1709 = vrot.lane.b32.xlu0 %v9519_v17, %s9013_s0 }
 0x2af   :  { %8165 = vmatprep.subr.mxu0 %v9435_v54 }
 0x2b0   :  { %8166 = vmatpush3.msra.mxu0 %v9435_v54 }
 0x2b1   :  { %8167 = vmatprep.subr.mxu0 %v9454_v27 }
 0x2b2   :  { %1336 = vrot.lane.b32.xlu1 %v9603_v7, %s9010_s16  ;;  %1584 = vrot.lane.b32.xlu0 %v9551_v32, %s9012_s18 }
 0x2b3   :  { %8168 = vmatpush3.msra.mxu0 %v9454_v27 }
 0x2b4   :  { %8225 = vmatprep.subr.mxu0 %v9239_v8 }
 0x2b6   :  { %1465 = vrot.lane.b32.xlu1 %v9603_v7, %s9011_s17  ;;  %1713 = vrot.lane.b32.xlu0 %v9551_v32, %s9013_s0 }
 0x2ba   :  { %1582 = vrot.lane.b32.xlu1 %v9527_v29, %s9012_s18  ;;  %1334 = vrot.lane.b32.xlu0 %v9579_v53, %s9010_s16 }
 0x2be   :  { %1711 = vrot.lane.b32.xlu1 %v9527_v29, %s9013_s0  ;;  %1463 = vrot.lane.b32.xlu0 %v9579_v53, %s9011_s17 }
 0x2c2   :  { %1586 = vrot.lane.b32.xlu1 %v9549_v60, %s9012_s18  ;;  %1588 = vrot.lane.b32.xlu0 %v9566_v33, %s9012_s18 }
 0x2c6   :  { %1715 = vrot.lane.b32.xlu1 %v9549_v60, %s9013_s0  ;;  %1717 = vrot.lane.b32.xlu0 %v9566_v33, %s9013_s0 }
 0x2ca   :  { %1590 = vrot.lane.b32.xlu1 %v9592_v55, %s9012_s18  ;;  %1592 = vrot.lane.b32.xlu0 %v9579_v53, %s9012_s18 }
 0x2ce   :  { %1719 = vrot.lane.b32.xlu1 %v9592_v55, %s9013_s0  ;;  %1721 = vrot.lane.b32.xlu0 %v9579_v53, %s9013_s0 }
 0x2d2   :  { %1594 = vrot.lane.b32.xlu1 %v9603_v7, %s9012_s18  ;;  %2304 = vrot.lane.b32.xlu0 %v9202_v42, %s9007_s27 }
 0x2d4   :  { %v936_v17 = vpop.permute.xlu0 %935 }
 0x2d5   :  { %v951_v29 = vmul.f32 %v936_v17, %v9607_v30 }
 0x2d6   :  { %1723 = vrot.lane.b32.xlu1 %v9603_v7, %s9013_s0  ;;  %2473 = vrot.lane.b32.xlu0 %v9202_v42, %s9008_s15 }
 0x2d7   :  { %8125 = vmatprep.mubr.f32.mxu1 %v951_v29 }
 0x2d8   :  { %v938_v60 = vpop.permute.xlu1 %937  ;;  %v704_v32 = vpop.permute.xlu0 %703 }
 0x2d9   :  { %v952_v33 = vmul.f32 %v938_v60, %v9605_v13  ;;  %v716_v53 = vmul.f32 %v9513_v20, %v704_v32 }
 0x2da   :  { %2306 = vrot.lane.b32.xlu1 %v9200_v41, %s9007_s27  ;;  %2308 = vrot.lane.b32.xlu0 %v9206_v44, %s9007_s27 }
 0x2db   :  { %v724_v55 = vadd.f32 %v716_v53, %v9670_v14  ;;  %8126 = vmatmul.mubr.f32.vlgmr.msra.gmra.mxu1 %v952_v33 }
 0x2dc   :  { %v1067_v10 = vpop.permute.xlu1 %1066  ;;  %v1065_v37 = vpop.permute.xlu0 %1064  ;;  %8182 = vmatpush3.msra.mxu1 %v9239_v8 }
 0x2dd   :  { %v9783_v34 = vmul.f32 0.25, %v724_v55  ;;  %8183 = vmatprep.subr.mxu1 %v9245_v11  ;;  %v1080_v25 = vmul.f32 %v1065_v37, %v9607_v30 }
 0x2de   :  { %2475 = vrot.lane.b32.xlu1 %v9200_v41, %s9008_s15  ;;  %2310 = vrot.lane.b32.xlu0 %v9204_v43, %s9007_s27 }
 0x2df   :  { %v829_v20 = vmul.f32 %v9603_v7, %v9783_v34  ;;  %8184 = vmatpush3.msra.mxu1 %v9245_v11  ;;  %v1081_v7 = vmul.f32 %v1067_v10, %v9605_v13  ;;  %v9897_v10 = vld [vmem:[%s12352_s4 + $0x78] sm:$0xff] }
 0x2e0   :  { %v9793_v3 = vpop.permute.xlu1 %1195  ;;  %v9795_v61 = vpop.permute.xlu0 %1193  ;;  %8185 = vmatprep.subr.mxu1 %v9264_v28 }
 0x2e1   :  { %8091 = vmatmul.mubr.f32.gmra.mxu0 %v829_v20  ;;  %8186 = vmatpush3.msra.mxu1 %v9264_v28  ;;  %v1209_v60 = vmul.f32 %v9795_v61, %v9607_v30  ;;  %v1210_v53 = vmul.f32 %v9793_v3, %v9605_v13 }
 0x2e2   :  { %2642 = vrot.lane.b32.xlu1 %v9202_v42, %s9009_s26  ;;  %2477 = vrot.lane.b32.xlu0 %v9206_v44, %s9008_s15 }
 0x2e3   :  { %8169 = vmatprep.mubr.f32.mxu0 %v1080_v25  ;;  %8187 = vmatprep.subr.mxu1 %v9278_v19 }
 0x2e4   :  { %v942_v62 = vpop.permute.xlu1 %941  ;;  %v1069_v5 = vpop.permute.xlu0 %1068  ;;  %8188 = vmatpush3.msra.mxu1 %v9278_v19 }
 0x2e5   :  { %v1082_v51 = vmul.f32 %v1069_v5, %v9632_v56  ;;  %8170 = vmatmul.mubr.f32.vlgmr.msra.gmra.mxu0 %v1081_v7  ;;  %8189 = vmatprep.subr.mxu1 %v9290_v38  ;;  %v954_v6 = vmul.f32 %v942_v62, %v9630_v36  ;;  %v9928_v7 = vld [vmem:[%s12352_s4 + $0x68] sm:$0xff]  ;;  %v9937_v62 = vld [vmem:[%s12352_s4 + $0x60] sm:$0xff] }
 0x2e6   :  { %2644 = vrot.lane.b32.xlu1 %v9200_v41, %s9009_s26  ;;  %2479 = vrot.lane.b32.xlu0 %v9204_v43, %s9008_s15 }
 0x2e7   :  { %8172 = vmatprep.mubr.f32.mxu0 %v1082_v51  ;;  %8190 = vmatpush3.msra.mxu1 %v9290_v38 }
 0x2e8   :  { %v1071_v63 = vpop.permute.xlu1 %1070  ;;  %v9814_v2 = vpop.permute.xlu0 %1197  ;;  %8191 = vmatprep.subr.mxu1 %v9301_v52  ;;  %8226 = vmatpush3.msra.mxu0 %v9239_v8 }
 0x2e9   :  { %v1083_v21 = vmul.f32 %v1071_v63, %v9630_v36  ;;  %8192 = vmatpush3.msra.mxu1 %v9301_v52  ;;  %8227 = vmatprep.subr.mxu0 %v9245_v11  ;;  %v1211_v55 = vmul.f32 %v9814_v2, %v9632_v56 }
 0x2ea   :  { %2811 = vrot.lane.b32.xlu1 %v9202_v42, %s9010_s16  ;;  %2312 = vrot.lane.b32.xlu0 %v9210_v46, %s9007_s27 }
 0x2eb   :  { %8173 = vmatmul.mubr.f32.gmra.mxu0 %v1083_v21  ;;  %8193 = vmatprep.subr.mxu1 %v9321_v57  ;;  %v9975_v21 = vld [vmem:[%s12352_s4 + $0x48] sm:$0xff] }
 0x2ec   :  { %v9826_v39 = vpop.permute.xlu1 %1199  ;;  %v944_v23 = vpop.permute.xlu0 %943  ;;  %8194 = vmatpush3.msra.mxu1 %v9321_v57  ;;  %8228 = vmatpush3.msra.mxu0 %v9245_v11 }
 0x2ed   :  { %8195 = vmatprep.subr.mxu1 %v9333_v59  ;;  %8229 = vmatprep.subr.mxu0 %v9264_v28  ;;  %v1212_v3 = vmul.f32 %v9826_v39, %v9630_v36 }
 0x2ee   :  { %2813 = vrot.lane.b32.xlu1 %v9200_v41, %s9010_s16  ;;  %2980 = vrot.lane.b32.xlu0 %v9202_v42, %s9011_s17 }
 0x2ef   :  { %8196 = vmatpush3.msra.mxu1 %v9333_v59  ;;  %8230 = vmatpush3.msra.mxu0 %v9264_v28  ;;  %v955_v28 = vmul.f32 %v944_v23, %v9664_v15 }
 0x2f0   :  { %8197 = vmatprep.subr.mxu1 %v9344_v1  ;;  %v940_v8 = vpop.permute.xlu1 %939  ;;  %v948_v14 = vpop.permute.xlu0 %947  ;;  %8231 = vmatprep.subr.mxu0 %v9278_v19 }
 0x2f1   :  { %v953_v11 = vmul.f32 %v940_v8, %v9632_v56  ;;  %8198 = vmatpush3.msra.mxu1 %v9344_v1  ;;  %8232 = vmatpush3.msra.mxu0 %v9278_v19  ;;  %v957_v12 = vmul.f32 %v948_v14, %v9691_v18  ;;  %v10001_v14 = vld [vmem:[%s12352_s4 + $0x38] sm:$0xff] }
 0x2f2   :  { %8199 = vmatprep.subr.mxu1 %v9365_v35  ;;  %2646 = vrot.lane.b32.xlu1 %v9206_v44, %s9009_s26 }
 0x2f3   :  { %2648 = vrot.lane.b32.xlu0 %v9204_v43, %s9009_s26  ;;  %8200 = vmatpush3.msra.mxu1 %v9365_v35 }
 0x2f4   :  { %8128 = vmatprep.mubr.f32.mxu1 %v953_v11  ;;  %8201 = vmatprep.subr.mxu1 %v9377_v4  ;;  %v946_v22 = vpop.permute.xlu1 %945  ;;  %v1073_v24 = vpop.permute.xlu0 %1072 }
 0x2f5   :  { %v1084_v19 = vmul.f32 %v1073_v24, %v9664_v15  ;;  %8129 = vmatmul.mubr.f32.gmra.mxu1 %v954_v6  ;;  %8233 = vmatprep.subr.mxu0 %v9290_v38  ;;  %v956_v16 = vmul.f32 %v946_v22, %v9662_v31 }
 0x2f6   :  { %8202 = vmatpush3.msra.mxu1 %v9377_v4  ;;  %8131 = vmatprep.mubr.f32.mxu1 %v955_v28  ;;  %v10013_v28 = vld [vmem:[%s12352_s4 + $0x30] sm:$0xff] }
 0x2f7   :  { %8203 = vmatprep.subr.mxu1 %v9392_v26  ;;  %2314 = vrot.lane.b32.xlu1 %v9208_v45, %s9007_s27 }
 0x2f8   :  { %2481 = vrot.lane.b32.xlu0 %v9210_v46, %s9008_s15  ;;  %8204 = vmatpush3.msra.mxu1 %v9392_v26  ;;  %v950_v0 = vpop.permute.xlu1 %949  ;;  %v1202_v9 = vpop.permute.xlu0 %1201 }
 0x2f9   :  { %8175 = vmatprep.mubr.f32.mxu0 %v1084_v19  ;;  %8205 = vmatprep.subr.mxu1 %v9411_v40  ;;  %v958_v49 = vmul.f32 %v950_v0, %v9783_v34  ;;  %v1213_v25 = vmul.f32 %v1202_v9, %v9664_v15 }
 0x2fa   :  { %8132 = vmatmul.mubr.f32.gmra.mxu1 %v956_v16  ;;  %8234 = vmatpush3.msra.mxu0 %v9290_v38  ;;  %v10033_v16 = vld [vmem:[%s12352_s4 + $0x28] sm:$0xff] }
 0x2fb   :  { %8206 = vmatpush3.msra.mxu1 %v9411_v40  ;;  %8134 = vmatprep.mubr.f32.mxu1 %v957_v12  ;;  %v10045_v12 = vld [vmem:[%s12352_s4 + $0x20] sm:$0xff] }
 0x2fc   :  { %8207 = vmatprep.subr.mxu1 %v9423_v50  ;;  %2982 = vrot.lane.b32.xlu1 %v9200_v41, %s9011_s17  ;;  %v1075_v17 = vpop.permute.xlu1 %1074  ;;  %v9870_v29 = vpop.permute.xlu0 %1322 }
 0x2fd   :  { %3149 = vrot.lane.b32.xlu0 %v9202_v42, %s9012_s18  ;;  %8208 = vmatpush3.msra.mxu1 %v9423_v50  ;;  %v1085_v38 = vmul.f32 %v1075_v17, %v9662_v31  ;;  %v1338_v11 = vmul.f32 %v9870_v29, %v9607_v30  ;;  %v10061_v29 = vld [vmem:[%s12352_s4 + $0x18] sm:$0xff] }
 0x2fe   :  { %8209 = vmatprep.subr.mxu1 %v9435_v54  ;;  %8135 = vmatmul.mubr.f32.gmra.mxu1 %v958_v49 }
 0x2ff   :  { %8210 = vmatpush3.msra.mxu1 %v9435_v54  ;;  %8213 = vmatprep.mubr.f32.mxu1 %v1209_v60 }
 0x300   :  { %8211 = vmatprep.subr.mxu1 %v9454_v27  ;;  %2815 = vrot.lane.b32.xlu1 %v9206_v44, %s9010_s16  ;;  %v1204_v32 = vpop.permute.xlu1 %1203  ;;  %v9883_v33 = vpop.permute.xlu0 %1451 }
 0x301   :  { %2817 = vrot.lane.b32.xlu0 %v9204_v43, %s9010_s16  ;;  %8212 = vmatpush3.msra.mxu1 %v9454_v27  ;;  %v1214_v51 = vmul.f32 %v1204_v32, %v9662_v31  ;;  %v1467_v9 = vmul.f32 %v9883_v33, %v9607_v30  ;;  %v10073_v32 = vld [vmem:[%s12352_s4 + $0x10] sm:$0xff] }
 0x302   :  { %8235 = vmatprep.subr.mxu0 %v9301_v52  ;;  %8176 = vmatmul.mubr.f32.gmra.mxu0 %v1085_v38 }
 0x303   :  { %8236 = vmatpush3.msra.mxu0 %v9301_v52  ;;  %8269 = vmatprep.subr.mxu1 %v9897_v10  ;;  %v9908_v52 = vld [vmem:[%s12352_s4 + $0x70] sm:$0xff] }
 0x304   :  { %8214 = vmatmul.mubr.f32.vlgmr.msra.gmra.mxu1 %v1210_v53  ;;  %8237 = vmatprep.subr.mxu0 %v9321_v57  ;;  %v1079_v37 = vpop.permute.xlu1 %1078  ;;  %v9901_v20 = vpop.permute.xlu0 %1326  ;;  %v10088_v53 = vld [vmem:[%s12352_s4 + $0x8] sm:$0xff] }
 0x305   :  { %8270 = vmatpush3.msra.mxu1 %v9897_v10  ;;  %8216 = vmatprep.mubr.f32.mxu1 %v1211_v55  ;;  %v1340_v19 = vmul.f32 %v9901_v20, %v9632_v56 }
 0x306   :  { %8238 = vmatpush3.msra.mxu0 %v9321_v57  ;;  %8271 = vmatprep.subr.mxu1 %v9908_v52 }
 0x307   :  { %2483 = vrot.lane.b32.xlu1 %v9208_v45, %s9008_s15  ;;  %2316 = vrot.lane.b32.xlu0 %v9214_v48, %s9007_s27 }
 0x308   :  { %8239 = vmatprep.subr.mxu0 %v9333_v59  ;;  %8272 = vmatpush3.msra.mxu1 %v9908_v52  ;;  %v9919_v57 = vpop.permute.xlu1 %1207  ;;  %v9921_v61 = vpop.permute.xlu0 %1455 }
 0x309   :  { %8240 = vmatpush3.msra.mxu0 %v9333_v59  ;;  %8273 = vmatprep.subr.mxu1 %v9928_v7 }
 0x30a   :  { %8217 = vmatmul.mubr.f32.gmra.mxu1 %v1212_v3  ;;  %8241 = vmatprep.subr.mxu0 %v9344_v1 }
 0x30b   :  { %8274 = vmatpush3.msra.mxu1 %v9928_v7  ;;  %8219 = vmatprep.mubr.f32.mxu1 %v1213_v25 }
 0x30c   :  { %8242 = vmatpush3.msra.mxu0 %v9344_v1  ;;  %8275 = vmatprep.subr.mxu1 %v9937_v62  ;;  %v1325_v59 = vpop.permute.xlu1 %1324  ;;  %v1077_v5 = vpop.permute.xlu0 %1076  ;;  %v9951_v1 = vld [vmem:[%s12352_s4 + $0x58] sm:$0xff] }
 0x30d   :  { %3151 = vrot.lane.b32.xlu1 %v9200_v41, %s9012_s18  ;;  %2984 = vrot.lane.b32.xlu0 %v9206_v44, %s9011_s17  ;;  %v1086_v39 = vmul.f32 %v1077_v5, %v9691_v18  ;;  %v1339_v24 = vmul.f32 %v1325_v59, %v9605_v13 }
 0x30e   :  { %8243 = vmatprep.subr.mxu0 %v9365_v35  ;;  %8276 = vmatpush3.msra.mxu1 %v9937_v62 }
 0x30f   :  { %8244 = vmatpush3.msra.mxu0 %v9365_v35  ;;  %8277 = vmatprep.subr.mxu1 %v9951_v1  ;;  %v9962_v35 = vld [vmem:[%s12352_s4 + $0x50] sm:$0xff] }
 0x310   :  { %8220 = vmatmul.mubr.f32.gmra.mxu1 %v1214_v51  ;;  %8245 = vmatprep.subr.mxu0 %v9377_v4  ;;  %v9955_v63 = vpop.permute.xlu1 %1453  ;;  %v1206_v2 = vpop.permute.xlu0 %1205 }
 0x311   :  { %8278 = vmatpush3.msra.mxu1 %v9951_v1  ;;  %8246 = vmatpush3.msra.mxu0 %v9377_v4  ;;  %v1215_v6 = vmul.f32 %v1206_v2, %v9691_v18  ;;  %v1468_v3 = vmul.f32 %v9955_v63, %v9605_v13 }
 0x312   :  { %8279 = vmatprep.subr.mxu1 %v9962_v35  ;;  %2650 = vrot.lane.b32.xlu1 %v9210_v46, %s9009_s26 }
 0x313   :  { %2318 = vrot.lane.b32.xlu0 %v9212_v47, %s9007_s27  ;;  %8247 = vmatprep.subr.mxu0 %v9392_v26 }
 0x314   :  { %8280 = vmatpush3.msra.mxu1 %v9962_v35  ;;  %8248 = vmatpush3.msra.mxu0 %v9392_v26  ;;  %v1329_v4 = vpop.permute.xlu1 %1328  ;;  %v9985_v26 = vld [vmem:[%s12352_s4 + $0x40] sm:$0xff]  ;;  %v1331_v23 = vpop.permute.xlu0 %1330 }
 0x315   :  { %8281 = vmatprep.subr.mxu1 %v9975_v21  ;;  %8249 = vmatprep.subr.mxu0 %v9411_v40  ;;  %v1341_v17 = vmul.f32 %v1329_v4, %v9630_v36  ;;  %v1342_v38 = vmul.f32 %v1331_v23, %v9664_v15 }
 0x316   :  { %8282 = vmatpush3.msra.mxu1 %v9975_v21  ;;  %8250 = vmatpush3.msra.mxu0 %v9411_v40  ;;  %v1087_v40 = vmul.f32 %v1079_v37, %v9783_v34 }
 0x317   :  { %8283 = vmatprep.subr.mxu1 %v9985_v26  ;;  %3318 = vrot.lane.b32.xlu1 %v9202_v42, %s9013_s0 }
 0x318   :  { %2986 = vrot.lane.b32.xlu0 %v9204_v43, %s9011_s17  ;;  %8251 = vmatprep.subr.mxu0 %v9423_v50  ;;  %v9993_v8 = vpop.permute.xlu1 %1457  ;;  %v10020_v22 = vpop.permute.xlu0 %1459 }
 0x319   :  { %8284 = vmatpush3.msra.mxu1 %v9985_v26  ;;  %8178 = vmatprep.mubr.f32.mxu0 %v1086_v39  ;;  %v1470_v59 = vmul.f32 %v9993_v8, %v9630_v36  ;;  %v1471_v5 = vmul.f32 %v10020_v22, %v9664_v15 }
 0x31a   :  { %8252 = vmatpush3.msra.mxu0 %v9423_v50  ;;  %8285 = vmatprep.subr.mxu1 %v10001_v14 }
 0x31b   :  { %8179 = vmatmul.mubr.f32.gmra.mxu0 %v1087_v40  ;;  %8253 = vmatprep.subr.mxu0 %v9435_v54 }
 0x31c   :  { %8286 = vmatpush3.msra.mxu1 %v10001_v14  ;;  %8254 = vmatpush3.msra.mxu0 %v9435_v54  ;;  %v1333_v50 = vpop.permute.xlu1 %1332  ;;  %v1216_v54 = vmul.f32 %v9919_v57, %v9783_v34  ;;  %v10048_v49 = vpop.permute.xlu0 %1580  ;;  %v10110_v57 = vld [vmem:[%s12352_s4] sm:$0xff] }
 0x31d   :  { %8257 = vmatprep.mubr.f32.mxu0 %v1338_v11  ;;  %8287 = vmatprep.subr.mxu1 %v10013_v28  ;;  %v1343_v37 = vmul.f32 %v1333_v50, %v9662_v31  ;;  %v1596_v4 = vmul.f32 %v10048_v49, %v9607_v30 }
 0x31e   :  { %2652 = vrot.lane.b32.xlu1 %v9208_v45, %s9009_s26  ;;  %2485 = vrot.lane.b32.xlu0 %v9214_v48, %s9008_s15 }
 0x31f   :  { %8255 = vmatprep.subr.mxu0 %v9454_v27  ;;  %8288 = vmatpush3.msra.mxu1 %v10013_v28 }
 0x320   :  { %8222 = vmatprep.mubr.f32.mxu1 %v1215_v6  ;;  %8256 = vmatpush3.msra.mxu0 %v9454_v27  ;;  %v10036_v0 = vpop.permute.xlu1 %1461  ;;  %v10076_v33 = vpop.permute.xlu0 %1709 }
 0x321   :  { %8289 = vmatprep.subr.mxu1 %v10033_v16  ;;  %8223 = vmatmul.mubr.f32.gmra.mxu1 %v1216_v54  ;;  %v1725_v11 = vmul.f32 %v10076_v33, %v9607_v30 }
 0x322   :  { %8258 = vmatmul.mubr.f32.vlgmr.msra.gmra.mxu0 %v1339_v24  ;;  %8290 = vmatpush3.msra.mxu1 %v10033_v16 }
 0x323   :  { %8313 = vmatprep.subr.mxu0 %v9897_v10  ;;  %8260 = vmatprep.mubr.f32.mxu0 %v1340_v19 }
 0x324   :  { %8291 = vmatprep.subr.mxu1 %v10045_v12  ;;  %8301 = vmatprep.mubr.f32.mxu1 %v1467_v9  ;;  %v10064_v60 = vpop.permute.xlu1 %1336  ;;  %v10101_v20 = vpop.permute.xlu0 %1584 }
 0x325   :  { %8314 = vmatpush3.msra.mxu0 %v9897_v10  ;;  %3320 = vrot.lane.b32.xlu1 %v9200_v41, %s9013_s0  ;;  %v1345_v2 = vmul.f32 %v10064_v60, %v9783_v34  ;;  %v1598_v40 = vmul.f32 %v10101_v20, %v9632_v56 }
 0x326   :  { %3153 = vrot.lane.b32.xlu0 %v9206_v44, %s9012_s18  ;;  %8292 = vmatpush3.msra.mxu1 %v10045_v12 }
 0x327   :  { %8315 = vmatprep.subr.mxu0 %v9908_v52  ;;  %8293 = vmatprep.subr.mxu1 %v10061_v29 }
 0x328   :  { %8316 = vmatpush3.msra.mxu0 %v9908_v52  ;;  %8294 = vmatpush3.msra.mxu1 %v10061_v29  ;;  %v10091_v55 = vpop.permute.xlu1 %1465 }
 0x329   :  { %8261 = vmatmul.mubr.f32.gmra.mxu0 %v1341_v17  ;;  %8317 = vmatprep.subr.mxu0 %v9928_v7  ;;  %v1474_v23 = vmul.f32 %v10091_v55, %v9783_v34 }
 0x32a   :  { %8263 = vmatprep.mubr.f32.mxu0 %v1342_v38  ;;  %8295 = vmatprep.subr.mxu1 %v10073_v32 }
 0x32b   :  { %8318 = vmatpush3.msra.mxu0 %v9928_v7  ;;  %2819 = vrot.lane.b32.xlu1 %v9210_v46, %s9010_s16 }
 0x32c   :  { %2821 = vrot.lane.b32.xlu0 %v9208_v45, %s9010_s16  ;;  %8296 = vmatpush3.msra.mxu1 %v10073_v32  ;;  %v10117_v25 = vpop.permute.xlu1 %1582 }
 0x32d   :  { %8319 = vmatprep.subr.mxu0 %v9937_v62  ;;  %8297 = vmatprep.subr.mxu1 %v10088_v53  ;;  %v1597_v8 = vmul.f32 %v10117_v25, %v9605_v13 }
 0x32e   :  { %8320 = vmatpush3.msra.mxu0 %v9937_v62  ;;  %8298 = vmatpush3.msra.mxu1 %v10088_v53 }
 0x32f   :  { %8321 = vmatprep.subr.mxu0 %v9951_v1  ;;  %8299 = vmatprep.subr.mxu1 %v9454_v27  ;;  %v1469_v27 = vmul.f32 %v9921_v61, %v9632_v56  ;;  %v10124_v61 = vpop.permute.xlu0 %1713 }
 0x330   :  { %8322 = vmatpush3.msra.mxu0 %v9951_v1  ;;  %2487 = vrot.lane.b32.xlu1 %v9212_v47, %s9008_s15 }
 0x331   :  { %2654 = vrot.lane.b32.xlu0 %v9214_v48, %s9009_s26  ;;  %8300 = vmatpush3.msra.mxu1 %v10110_v57 }
 0x332   :  { %8323 = vmatprep.subr.mxu0 %v9962_v35  ;;  %8264 = vmatmul.mubr.f32.gmra.mxu0 %v1343_v37 }
 0x333   :  { %8302 = vmatmul.mubr.f32.vlgmr.msra.gmra.mxu1 %v1468_v3  ;;  %8324 = vmatpush3.msra.mxu0 %v9962_v35  ;;  %v1335_v51 = vpop.permute.xlu0 %1334 }
 0x334   :  { %8357 = vmatprep.subr.mxu1 %v9897_v10  ;;  %8304 = vmatprep.mubr.f32.mxu1 %v1469_v27 }
 0x335   :  { %8325 = vmatprep.subr.mxu0 %v9975_v21  ;;  %8358 = vmatpush3.msra.mxu1 %v9897_v10  ;;  %v10137_v10 = vpop.permute.xlu1 %1711 }
 0x336   :  { %8326 = vmatpush3.msra.mxu0 %v9975_v21  ;;  %8359 = vmatprep.subr.mxu1 %v9908_v52  ;;  %v1726_v19 = vmul.f32 %v10137_v10, %v9605_v13 }
 0x337   :  { %3155 = vrot.lane.b32.xlu1 %v9204_v43, %s9012_s18  ;;  %3322 = vrot.lane.b32.xlu0 %v9206_v44, %s9013_s0  ;;  %v1464_v63 = vpop.permute.xlu0 %1463 }
 0x338   :  { %8327 = vmatprep.subr.mxu0 %v9985_v26  ;;  %8360 = vmatpush3.msra.mxu1 %v9908_v52  ;;  %v1472_v52 = vmul.f32 %v10036_v0, %v9662_v31  ;;  %v1473_v39 = vmul.f32 %v1464_v63, %v9691_v18 }
 0x339   :  { %8305 = vmatmul.mubr.f32.gmra.mxu1 %v1470_v59  ;;  %8328 = vmatpush3.msra.mxu0 %v9985_v26 }
 0x33a   :  { %8361 = vmatprep.subr.mxu1 %v9928_v7  ;;  %8307 = vmatprep.mubr.f32.mxu1 %v1471_v5 }
 0x33b   :  { %8329 = vmatprep.subr.mxu0 %v10001_v14  ;;  %8362 = vmatpush3.msra.mxu1 %v9928_v7  ;;  %v1587_v7 = vpop.permute.xlu1 %1586 }
 0x33c   :  { %8330 = vmatpush3.msra.mxu0 %v10001_v14  ;;  %8363 = vmatprep.subr.mxu1 %v9937_v62  ;;  %v1599_v6 = vmul.f32 %v1587_v7, %v9630_v36 }
 0x33d   :  { %2988 = vrot.lane.b32.xlu1 %v9210_v46, %s9011_s17  ;;  %2990 = vrot.lane.b32.xlu0 %v9208_v45, %s9011_s17 }
 0x33e   :  { %8331 = vmatprep.subr.mxu0 %v10013_v28  ;;  %8364 = vmatpush3.msra.mxu1 %v9937_v62  ;;  %v1344_v62 = vmul.f32 %v1335_v51, %v9691_v18 }
 0x33f   :  { %8308 = vmatmul.mubr.f32.gmra.mxu1 %v1472_v52  ;;  %8332 = vmatpush3.msra.mxu0 %v10013_v28 }
 0x340   :  { %8365 = vmatprep.subr.mxu1 %v9951_v1  ;;  %8333 = vmatprep.subr.mxu0 %v10033_v16 }
 0x341   :  { %8366 = vmatpush3.msra.mxu1 %v9951_v1  ;;  %8334 = vmatpush3.msra.mxu0 %v10033_v16  ;;  %v10168_v1 = vpop.permute.xlu1 %1715 }
 0x342   :  { %8367 = vmatprep.subr.mxu1 %v9962_v35  ;;  %2656 = vrot.lane.b32.xlu1 %v9212_v47, %s9009_s26  ;;  %v1728_v0 = vmul.f32 %v10168_v1, %v9630_v36 }
 0x343   :  { %2823 = vrot.lane.b32.xlu0 %v9214_v48, %s9010_s16  ;;  %8335 = vmatprep.subr.mxu0 %v10045_v12 }
 0x344   :  { %8368 = vmatpush3.msra.mxu1 %v9962_v35  ;;  %8336 = vmatpush3.msra.mxu0 %v10045_v12  ;;  %v1589_v35 = vpop.permute.xlu0 %1588 }
 0x345   :  { %8369 = vmatprep.subr.mxu1 %v9975_v21  ;;  %8337 = vmatprep.subr.mxu0 %v10061_v29 }
 0x346   :  { %8370 = vmatpush3.msra.mxu1 %v9975_v21  ;;  %8338 = vmatpush3.msra.mxu0 %v10061_v29  ;;  %v1591_v21 = vpop.permute.xlu1 %1590 }
 0x347   :  { %8371 = vmatprep.subr.mxu1 %v9985_v26  ;;  %3324 = vrot.lane.b32.xlu1 %v9204_v43, %s9013_s0  ;;  %v1601_v30 = vmul.f32 %v1591_v21, %v9662_v31 }
 0x348   :  { %2825 = vrot.lane.b32.xlu0 %v9212_v47, %s9010_s16  ;;  %8339 = vmatprep.subr.mxu0 %v10073_v32 }
 0x349   :  { %8372 = vmatpush3.msra.mxu1 %v9985_v26  ;;  %8266 = vmatprep.mubr.f32.mxu0 %v1344_v62  ;;  %v1718_v26 = vpop.permute.xlu0 %1717 }
 0x34a   :  { %8340 = vmatpush3.msra.mxu0 %v10073_v32  ;;  %8373 = vmatprep.subr.mxu1 %v10001_v14  ;;  %v1729_v13 = vmul.f32 %v1718_v26, %v9664_v15 }
 0x34b   :  { %8267 = vmatmul.mubr.f32.gmra.mxu0 %v1345_v2  ;;  %8341 = vmatprep.subr.mxu0 %v10088_v53 }
 0x34c   :  { %8374 = vmatpush3.msra.mxu1 %v10001_v14  ;;  %8342 = vmatpush3.msra.mxu0 %v10088_v53  ;;  %v1720_v14 = vpop.permute.xlu1 %1719 }
 0x34d   :  { %8345 = vmatprep.mubr.f32.mxu0 %v1596_v4  ;;  %8375 = vmatprep.subr.mxu1 %v10013_v28  ;;  %v1593_v50 = vpop.permute.xlu0 %1592 }
 0x34e   :  { %3157 = vrot.lane.b32.xlu1 %v9210_v46, %s9012_s18  ;;  %2992 = vrot.lane.b32.xlu0 %v9214_v48, %s9011_s17  ;;  %v1602_v22 = vmul.f32 %v1593_v50, %v9691_v18 }
 0x34f   :  { %8343 = vmatprep.subr.mxu0 %v10110_v57  ;;  %8376 = vmatpush3.msra.mxu1 %v10013_v28  ;;  %v1600_v28 = vmul.f32 %v1589_v35, %v9664_v15 }
 0x350   :  { %8310 = vmatprep.mubr.f32.mxu1 %v1473_v39  ;;  %8344 = vmatpush3.msra.mxu0 %v10110_v57  ;;  %v1595_v54 = vpop.permute.xlu1 %1594  ;;  %v10315_v39 = vld [vmem:[%s12353_s5] sm:$0xff] }
 0x351   :  { %8377 = vmatprep.subr.mxu1 %v10033_v16  ;;  %8311 = vmatmul.mubr.f32.gmra.mxu1 %v1474_v23  ;;  %v1603_v24 = vmul.f32 %v1595_v54, %v9783_v34  ;;  %v1722_v9 = vpop.permute.xlu0 %1721  ;;  %12396 = vst [vmem:[#allocation29_spill] sm:$0xff] %v10315_v39 }
 0x352   :  { %8346 = vmatmul.mubr.f32.vlgmr.msra.gmra.mxu0 %v1597_v8  ;;  %8378 = vmatpush3.msra.mxu1 %v10033_v16  ;;  %v1727_v16 = vmul.f32 %v10124_v61, %v9632_v56  ;;  %v1731_v49 = vmul.f32 %v1722_v9, %v9691_v18 }
 0x353   :  { %8348 = vmatprep.mubr.f32.mxu0 %v1598_v40  ;;  %8379 = vmatprep.subr.mxu1 %v10045_v12 }
 0x354   :  { %8389 = vmatprep.mubr.f32.mxu1 %v1725_v11  ;;  %3159 = vrot.lane.b32.xlu1 %v9208_v45, %s9012_s18  ;;  %v1724_v56 = vpop.permute.xlu1 %1723 }
 0x355   :  { %2994 = vrot.lane.b32.xlu0 %v9212_v47, %s9011_s17  ;;  %8380 = vmatpush3.msra.mxu1 %v10045_v12  ;;  %v1730_v12 = vmul.f32 %v1720_v14, %v9662_v31  ;;  %v1732_v17 = vmul.f32 %v1724_v56, %v9783_v34 }
 0x356   :  { %8381 = vmatprep.subr.mxu1 %v10061_v29  ;;  %8349 = vmatmul.mubr.f32.gmra.mxu0 %v1599_v6 }
 0x357   :  { %8382 = vmatpush3.msra.mxu1 %v10061_v29  ;;  %8351 = vmatprep.mubr.f32.mxu0 %v1600_v28  ;;  %v10250_v29 = vpop.f32.mrf.mxu0 }
 0x358   :  { %8383 = vmatprep.subr.mxu1 %v10073_v32  ;;  %3326 = vrot.lane.b32.xlu1 %v9210_v46, %s9013_s0 }
 0x359   :  { %3161 = vrot.lane.b32.xlu0 %v9214_v48, %s9012_s18  ;;  %8384 = vmatpush3.msra.mxu1 %v10073_v32  ;;  %v10254_v60 = vpop.f32.mrf.mxu0 }
 0x35a   :  { %8385 = vmatprep.subr.mxu1 %v10088_v53  ;;  %8352 = vmatmul.mubr.f32.gmra.mxu0 %v1601_v30 }
 0x35b   :  { %8386 = vmatpush3.msra.mxu1 %v10088_v53  ;;  %8354 = vmatprep.mubr.f32.mxu0 %v1602_v22  ;;  %v10258_v31 = vpop.f32.mrf.mxu0 }
 0x35c   :  { %8387 = vmatprep.subr.mxu1 %v10110_v57  ;;  %3328 = vrot.lane.b32.xlu1 %v9208_v45, %s9013_s0 }
 0x35d   :  { %3330 = vrot.lane.b32.xlu0 %v9214_v48, %s9013_s0  ;;  %8388 = vmatpush3.msra.mxu1 %v10110_v57  ;;  %v10262_v18 = vpop.f32.mrf.mxu0 }
 0x35e   :  { %8390 = vmatmul.mubr.f32.vlgmr.msra.gmra.mxu1 %v1726_v19  ;;  %8355 = vmatmul.mubr.f32.gmra.mxu0 %v1603_v24 }
 0x35f   :  { %8392 = vmatprep.mubr.f32.mxu1 %v1727_v16  ;;  %v10264_v33 = vpop.f32.mrf.mxu0  ;;  %8401 = vmatprep.subr.mxu1 %v10315_v39 }
 0x360   :  { %3163 = vrot.lane.b32.xlu1 %v9212_v47, %s9012_s18  ;;  %8429 = vmatprep.subr.mxu0 %v10315_v39 }
 0x361   :  { %v10268_v53 = vpop.f32.mrf.mxu0  ;;  %8402 = vmatpush3.msra.mxu1 %v10315_v39  ;;  %8430 = vmatpush3.msra.mxu0 %v10315_v39 }
 0x362   :  { %8393 = vmatmul.mubr.f32.gmra.mxu1 %v1728_v0  ;;  %8415 = vmatprep.subr.mxu1 %v10315_v39 }
 0x363   :  { %8395 = vmatprep.mubr.f32.mxu1 %v1729_v13  ;;  %8457 = vmatprep.subr.mxu0 %v10315_v39 }
 0x364   :  { %3332 = vrot.lane.b32.xlu1 %v9212_v47, %s9013_s0 }
 0x366   :  { %8396 = vmatmul.mubr.f32.gmra.mxu1 %v1730_v12 }
 0x367   :  { %8398 = vmatprep.mubr.f32.mxu1 %v1731_v49 }
 0x36a   :  { %8399 = vmatmul.mubr.f32.gmra.mxu1 %v1732_v17 }
 0x39b   :  { %v10248_v36 = vpop.f32.mrf.mxu1 }
 0x39c   :  { %v1839_v24 = vmax.f32 %v10250_v29, %v10248_v36 }
 0x39d   :  { %v10252_v15 = vpop.f32.mrf.mxu1 }
 0x39e   :  { %v1838_v0 = vmax.f32 %v10254_v60, %v10252_v15 }
 0x3a1   :  { %v10272_v37 = vpop.f32.mrf.mxu0 }
 0x3a2   :  { %12388 = vst [vmem:[#allocation21_spill] sm:$0xff] %v10272_v37 }
 0x3a3   :  { %v10276_v3 = vpop.f32.mrf.mxu0 }
 0x3a4   :  { %12390 = vst [vmem:[#allocation23_spill] sm:$0xff] %v10276_v3 }
 0x3a5   :  { %v10280_v27 = vpop.f32.mrf.mxu0 }
 0x3a6   :  { %v1847_v19 = vmax.f32 %v1839_v24, %v10280_v27 }
 0x3a7   :  { %v10284_v61 = vpop.f32.mrf.mxu0 }
 0x3a8   :  { %v1846_v56 = vmax.f32 %v1838_v0, %v10284_v61 }
 0x3ab   :  { %v10286_v59 = vpop.f32.mrf.mxu0 }
 0x3ad   :  { %v10290_v10 = vpop.f32.mrf.mxu0 }
 0x3b5   :  { %v10256_v38 = vpop.f32.mrf.mxu1 }
 0x3b6   :  { %v1841_v12 = vmax.f32 %v10258_v31, %v10256_v38 }
 0x3b7   :  { %v10260_v32 = vpop.f32.mrf.mxu1 }
 0x3b8   :  { %v1840_v49 = vmax.f32 %v10262_v18, %v10260_v32  ;;  %v1849_v47 = vmax.f32 %v1841_v12, %v10286_v59 }
 0x3ba   :  { %v10266_v34 = vpop.f32.mrf.mxu1  ;;  %v1848_v46 = vmax.f32 %v1840_v49, %v10290_v10 }
 0x3bb   :  { %v1843_v43 = vmax.f32 %v10264_v33, %v10266_v34 }
 0x3bc   :  { %v10270_v55 = vpop.f32.mrf.mxu1 }
 0x3be   :  { %v10274_v20 = vpop.f32.mrf.mxu1 }
 0x3bf   :  { %12389 = vst [vmem:[#allocation22_spill] sm:$0xff] %v10274_v20  ;;  %v1845_v0 = vmax.f32 %v10272_v37, %v10274_v20 }
 0x3c0   :  { %v10278_v57 = vpop.f32.mrf.mxu1 }
 0x3c1   :  { %12391 = vst [vmem:[#allocation24_spill] sm:$0xff] %v10278_v57  ;;  %v1844_v41 = vmax.f32 %v10276_v3, %v10278_v57 }
 0x3c2   :  { %v10294_v52 = vpop.f32.mrf.mxu0 }
 0x3c4   :  { %v10282_v25 = vpop.f32.mrf.mxu1  ;;  %v10298_v63 = vpop.f32.mrf.mxu0 }
 0x3c5   :  { %v1855_v9 = vmax.f32 %v1847_v19, %v10282_v25  ;;  %v1842_v19 = vmax.f32 %v10268_v53, %v10270_v55 }
 0x3c6   :  { %v10288_v5 = vpop.f32.mrf.mxu1 }
 0x3c7   :  { %v1854_v42 = vmax.f32 %v1846_v56, %v10288_v5  ;;  %v1850_v44 = vmax.f32 %v1842_v19, %v10298_v63 }
 0x3ca   :  { %v10292_v51 = vpop.f32.mrf.mxu1 }
 0x3cc   :  { %v10296_v7 = vpop.f32.mrf.mxu1 }
 0x3cd   :  { %v1856_v12 = vmax.f32 %v1848_v46, %v10296_v7 }
 0x3d0   :  { %v10302_v1 = vpop.f32.mrf.mxu1 }
 0x3d2   :  { %v10306_v2 = vpop.f32.mrf.mxu1 }
 0x3d3   :  { %12394 = vst [vmem:[#allocation27_spill] sm:$0xff] %v10306_v2  ;;  %v1858_v37 = vmax.f32 %v1850_v44, %v10306_v2 }
 0x3db   :  { %v10300_v62 = vpop.f32.mrf.mxu0 }
 0x3dc   :  { %12392 = vst [vmem:[#allocation25_spill] sm:$0xff] %v10300_v62  ;;  %v1853_v39 = vmax.f32 %v1845_v0, %v10300_v62 }
 0x3dd   :  { %v10304_v35 = vpop.f32.mrf.mxu0 }
 0x3de   :  { %12393 = vst [vmem:[#allocation26_spill] sm:$0xff] %v10304_v35  ;;  %v1852_v20 = vmax.f32 %v1844_v41, %v10304_v35 }
 0x3e1   :  { %v10308_v4 = vpop.f32.mrf.mxu1 }
 0x3e2   :  { %12395 = vst [vmem:[#allocation28_spill] sm:$0xff] %v10308_v4  ;;  %v10310_v21 = vpop.f32.mrf.mxu0  ;;  %v1861_v19 = vmax.f32 %v1853_v39, %v10308_v4 }
 0x3e3   :  { %v10319_v26 = vpop.f32.mrf.mxu1  ;;  %v1863_v24 = vmax.f32 %v1855_v9, %v10310_v21  ;;  %v1851_v9 = vmax.f32 %v1843_v43, %v10294_v52  ;;  %v1857_v43 = vmax.f32 %v1849_v47, %v10292_v51 }
 0x3e4   :  { %12397 = vst [vmem:[#allocation30_spill] sm:$0xff] %v10319_v26  ;;  %v10323_v23 = vpop.f32.mrf.mxu0  ;;  %v1860_v0 = vmax.f32 %v1852_v20, %v10319_v26 }
 0x3e5   :  { %v1862_v45 = vmax.f32 %v1854_v42, %v10323_v23  ;;  %v1859_v49 = vmax.f32 %v1851_v9, %v10302_v1 }
 0x3e9   :  { %v10329_v40 = vpop.f32.mrf.mxu0 }
 0x3eb   :  { %v10333_v11 = vpop.f32.mrf.mxu0 }
 0x3ec   :  { %v1864_v35 = vmax.f32 %v1856_v12, %v10333_v11 }
 0x3f2   :  { %v10337_v50 = vpop.f32.mrf.mxu0 }
 0x3f3   :  { %v10327_v8 = vpop.f32.mrf.mxu1  ;;  %v1867_v47 = vmax.f32 %v1859_v49, %v10337_v50 }
 0x3f4   :  { %v10341_v30 = vpop.f32.mrf.mxu0  ;;  %v1871_v48 = vmax.f32 %v1863_v24, %v10327_v8 }
 0x3f5   :  { %v10331_v14 = vpop.f32.mrf.mxu1 }
 0x3f6   :  { %v1870_v42 = vmax.f32 %v1862_v45, %v10331_v14 }
 0x3f9   :  { %v10335_v6 = vpop.f32.mrf.mxu1 }
 0x3fb   :  { %v10339_v28 = vpop.f32.mrf.mxu1 }
 0x3fc   :  { %v1872_v12 = vmax.f32 %v1864_v35, %v10339_v28 }
 0x3ff   :  { %v10345_v54 = vpop.f32.mrf.mxu1 }
 0x401   :  { %v10354_v13 = vpop.f32.mrf.mxu1 }
 0x40b   :  { %v10343_v22 = vpop.f32.mrf.mxu0 }
 0x40d   :  { %v10350_v16 = vpop.f32.mrf.mxu0 }
 0x411   :  { %v10362_v17 = vpop.f32.mrf.mxu1 }
 0x412   :  { %v10365_v58 = vpop.f32.mrf.mxu0 }
 0x413   :  { %v10381_v56 = vpop.f32.mrf.mxu1  ;;  %v1879_v57 = vmax.f32 %v1871_v48, %v10365_v58  ;;  %v1865_v48 = vmax.f32 %v1857_v43, %v10329_v40 }
 0x414   :  { %v10387_v3 = vpop.f32.mrf.mxu0 }
 0x415   :  { %v1878_v46 = vmax.f32 %v1870_v42, %v10387_v3  ;;  %v1873_v43 = vmax.f32 %v1865_v48, %v10335_v6 }
 0x416   :  { %v10402_v9 = vpop.f32.mrf.mxu0 }
 0x418   :  { %v10418_v48 = vpop.f32.mrf.mxu0 }
 0x41e   :  { %v8391_v24 = vpop.f32.mrf.mxu1 }
 0x41f   :  { %v1887_v41 = vmax.f32 %v1879_v57, %v8391_v24  ;;  %v1866_v57 = vmax.f32 %v1858_v37, %v10341_v30  ;;  %v1869_v37 = vmax.f32 %v1861_v19, %v10343_v22  ;;  %v10429_v19 = vpop.f32.mrf.mxu0 }
 0x420   :  { %v10400_v62 = vpop.f32.mrf.mxu1 }
 0x421   :  { %v1895_v45 = vsub.f32 %v10250_v29, %v1887_v41  ;;  %v1919_v44 = vsub.f32 %v10248_v36, %v1887_v41  ;;  %v1943_v39 = vsub.f32 %v10280_v27, %v1887_v41  ;;  %v1967_v20 = vsub.f32 %v10282_v25, %v1887_v41 }
 0x422   :  { %v1991_v49 = vsub.f32 %v10310_v21, %v1887_v41  ;;  %v2015_v4 = vsub.f32 %v10327_v8, %v1887_v41  ;;  %v1886_v29 = vmax.f32 %v1878_v46, %v10400_v62  ;;  %v1875_v36 = vmax.f32 %v1867_v47, %v10345_v54  ;;  %v10425_v46 = vpop.f32.mrf.mxu1 }
 0x423   :  { %v1904_v42 = vmul.f32 1.442695, %v1895_v45  ;;  %v1928_v26 = vmul.f32 1.442695, %v1919_v44  ;;  %v1874_v27 = vmax.f32 %v1866_v57, %v10354_v13  ;;  %v1952_v2 = vmul.f32 1.442695, %v1943_v39 }
 0x424   :  { %v2039_v25 = vsub.f32 %v10365_v58, %v1887_v41  ;;  %v1976_v35 = vmul.f32 1.442695, %v1967_v20  ;;  %v1894_v21 = vsub.f32 %v10254_v60, %v1886_v29  ;;  %v10422_v45 = vmax.f32 %v1860_v0, %v10350_v16 }
 0x425   :  { %8749 = vpow2.f32 %v1904_v42  ;;  %v2000_v8 = vmul.f32 1.442695, %v1991_v49  ;;  %v1918_v47 = vsub.f32 %v10252_v15, %v1886_v29  ;;  %v1877_v44 = vmax.f32 %v1869_v37, %v10362_v17 }
 0x426   :  { %8751 = vpow2.f32 %v1928_v26  ;;  %v1881_v58 = vmax.f32 %v1873_v43, %v10402_v9  ;;  %v2024_v39 = vmul.f32 1.442695, %v2015_v4  ;;  %v2063_v57 = vsub.f32 %v8391_v24, %v1887_v41  ;;  %v10441_v24 = vpop.f32.mrf.mxu0 }
 0x427   :  { %8753 = vpow2.f32 %v1952_v2  ;;  %v2048_v20 = vmul.f32 1.442695, %v2039_v25  ;;  %v1942_v60 = vsub.f32 %v10284_v61, %v1886_v29  ;;  %v1966_v0 = vsub.f32 %v10288_v5, %v1886_v29 }
 0x428   :  { %8755 = vpow2.f32 %v1976_v35  ;;  %v1902_v26 = vmul.f32 1.442695, %v1894_v21  ;;  %v1990_v15 = vsub.f32 %v10323_v23, %v1886_v29  ;;  %v10435_v49 = vmax.f32 %v1881_v58, %v10425_v46  ;;  %v10448_v21 = vpop.f32.mrf.mxu1 }
 0x429   :  { %v1876_v43 = vmax.f32 %v10422_v45, %v10381_v56  ;;  %v1880_v42 = vmax.f32 %v1872_v12, %v10418_v48  ;;  %8757 = vpow2.f32 %v2000_v8  ;;  %v1926_v4 = vmul.f32 1.442695, %v1918_v47 }
 0x42a   :  { %v1883_v2 = vmax.f32 %v1875_v36, %v10429_v19  ;;  %8759 = vpow2.f32 %v2024_v39  ;;  %v2072_v61 = vmul.f32 1.442695, %v2063_v57  ;;  %v2014_v5 = vsub.f32 %v10331_v14, %v1886_v29  ;;  %v10450_v36 = vpop.f32.mrf.mxu0 }
 0x42b   :  { %8761 = vpow2.f32 %v2048_v20  ;;  %v1950_v23 = vmul.f32 1.442695, %v1942_v60  ;;  %v1974_v41 = vmul.f32 1.442695, %v1966_v0  ;;  %v2038_v25 = vsub.f32 %v10387_v3, %v1886_v29 }
 0x42c   :  { %8763 = vpow2.f32 %v1902_v26  ;;  %v1998_v37 = vmul.f32 1.442695, %v1990_v15  ;;  %v2062_v35 = vsub.f32 %v10400_v62, %v1886_v29  ;;  %v1897_v12 = vsub.f32 %v10258_v31, %v10435_v49 }
 0x42d   :  { %8765 = vpow2.f32 %v1926_v4  ;;  %v1921_v14 = vsub.f32 %v10256_v38, %v10435_v49  ;;  %v1945_v8 = vsub.f32 %v10286_v59, %v10435_v49  ;;  %v1969_v3 = vsub.f32 %v10292_v51, %v10435_v49 }
 0x42e   :  { %8767 = vpow2.f32 %v2072_v61  ;;  %v10459_v62 = vmax.f32 %v1874_v27, %v10441_v24  ;;  %v2022_v29 = vmul.f32 1.442695, %v2014_v5  ;;  %v1993_v31 = vsub.f32 %v10329_v40, %v10435_v49  ;;  %v10471_v27 = vpop.f32.mrf.mxu1 }
 0x42f   :  { %8769 = vpow2.f32 %v1950_v23  ;;  %v2046_v47 = vmul.f32 1.442695, %v2038_v25  ;;  %v10464_v58 = vmax.f32 %v1880_v42, %v10448_v21  ;;  %v10467_v38 = vmax.f32 %v1877_v44, %v10450_v36 }
 0x430   :  { %8771 = vpow2.f32 %v1974_v41  ;;  %v2070_v59 = vmul.f32 1.442695, %v2062_v35  ;;  %v1908_v39 = vmul.f32 1.442695, %v1897_v12  ;;  %v2017_v51 = vsub.f32 %v10335_v6, %v10435_v49 }
 0x431   :  { %8773 = vpow2.f32 %v1998_v37  ;;  %v1932_v40 = vmul.f32 1.442695, %v1921_v14  ;;  %v1956_v20 = vmul.f32 1.442695, %v1945_v8  ;;  %v1980_v60 = vmul.f32 1.442695, %v1969_v3 }
 0x432   :  { %v10473_v57 = vpop.eup %8749  ;;  %8775 = vpow2.f32 %v2022_v29  ;;  %v2004_v26 = vmul.f32 1.442695, %v1993_v31  ;;  %v2041_v44 = vsub.f32 %v10402_v9, %v10435_v49  ;;  %v2065_v15 = vsub.f32 %v10425_v46, %v10435_v49 }
 0x433   :  { %v10475_v0 = vpop.eup %8751  ;;  %8777 = vpow2.f32 %v2046_v47  ;;  %v1896_v42 = vsub.f32 %v10262_v18, %v10464_v58  ;;  %v10486_v4 = vmax.f32 %v1883_v2, %v10471_v27  ;;  %v2028_v5 = vmul.f32 1.442695, %v2017_v51 }
 0x434   :  { %v2087_v6 = vadd.f32 %v10475_v0, %v10473_v57  ;;  %v10488_v61 = vpop.eup %8753  ;;  %8779 = vpow2.f32 %v1908_v39  ;;  %v1920_v9 = vsub.f32 %v10260_v32, %v10464_v58  ;;  %v1944_v46 = vsub.f32 %v10290_v10, %v10464_v58 }
 0x435   :  { %v10494_v49 = vpop.eup %8755  ;;  %8781 = vpow2.f32 %v1932_v40  ;;  %v1968_v18 = vsub.f32 %v10296_v7, %v10464_v58  ;;  %v1992_v2 = vsub.f32 %v10333_v11, %v10464_v58  ;;  %v2052_v25 = vmul.f32 1.442695, %v2041_v44 }
 0x436   :  { %v2095_v23 = vadd.f32 %v10488_v61, %v2087_v6  ;;  %v10501_v41 = vpop.eup %8757  ;;  %8783 = vpow2.f32 %v2070_v59  ;;  %v2076_v37 = vmul.f32 1.442695, %v2065_v15  ;;  %v2016_v32 = vsub.f32 %v10339_v28, %v10464_v58 }
 0x437   :  { %v10505_v10 = vpop.eup %8759  ;;  %8785 = vpow2.f32 %v1956_v20  ;;  %v1906_v12 = vmul.f32 1.442695, %v1896_v42  ;;  %v2040_v7 = vsub.f32 %v10418_v48, %v10464_v58  ;;  %v1930_v11 = vmul.f32 1.442695, %v1920_v9 }
 0x438   :  { %v2103_v35 = vadd.f32 %v10494_v49, %v2095_v23  ;;  %v10510_v14 = vpop.eup %8761  ;;  %8787 = vpow2.f32 %v1980_v60  ;;  %v1954_v8 = vmul.f32 1.442695, %v1944_v46  ;;  %v2064_v3 = vsub.f32 %v10448_v21, %v10464_v58  ;;  %v10528_v60 = vpop.f32.mrf.mxu1 }
 0x439   :  { %v10514_v29 = vpop.eup %8763  ;;  %8789 = vpow2.f32 %v2004_v26  ;;  %v1978_v31 = vmul.f32 1.442695, %v1968_v18  ;;  %v2002_v47 = vmul.f32 1.442695, %v1992_v2  ;;  %v2026_v39 = vmul.f32 1.442695, %v2016_v32 }
 0x43a   :  { %v2111_v28 = vadd.f32 %v10501_v41, %v2103_v35  ;;  %v10517_v59 = vpop.eup %8765  ;;  %8791 = vpow2.f32 %v2028_v5  ;;  %v1899_v48 = vsub.f32 %v10264_v33, %v10486_v4  ;;  %v1923_v51 = vsub.f32 %v10266_v34, %v10486_v4  ;;  %v10558_v35 = vpop.f32.mrf.mxu0 }
 0x43b   :  { %v10523_v40 = vpop.eup %8767  ;;  %v2086_v58 = vadd.f32 %v10517_v59, %v10514_v29  ;;  %8793 = vpow2.f32 %v2052_v25  ;;  %v2050_v20 = vmul.f32 1.442695, %v2040_v7  ;;  %v2074_v44 = vmul.f32 1.442695, %v2064_v3  ;;  %v10554_v25 = vpop.f32.mrf.mxu1 }
 0x43c   :  { %v2119_v21 = vadd.f32 %v10505_v10, %v2111_v28  ;;  %v10530_v26 = vpop.eup %8769  ;;  %8795 = vpow2.f32 %v1906_v12  ;;  %v1947_v33 = vsub.f32 %v10294_v52, %v10486_v4  ;;  %v1971_v34 = vsub.f32 %v10302_v1, %v10486_v4 }
 0x43d   :  { %v10536_v15 = vpop.eup %8771  ;;  %v2094_v42 = vadd.f32 %v10530_v26, %v2086_v58  ;;  %8797 = vpow2.f32 %v1930_v11  ;;  %v1995_v5 = vsub.f32 %v10337_v50, %v10486_v4  ;;  %v2019_v46 = vsub.f32 %v10345_v54, %v10486_v4 }
 0x43e   :  { %v2127_v6 = vadd.f32 %v10510_v14, %v2119_v21  ;;  %v10542_v9 = vpop.eup %8773  ;;  %8799 = vpow2.f32 %v2076_v37  ;;  %v2043_v52 = vsub.f32 %v10429_v19, %v10486_v4  ;;  %v2067_v1 = vsub.f32 %v10471_v27, %v10486_v4  ;;  %v10580_v21 = vpop.f32.mrf.mxu1 }
 0x43f   :  { %v10550_v23 = vpop.eup %8775  ;;  %v2102_v2 = vadd.f32 %v10536_v15, %v2094_v42  ;;  %8801 = vpow2.f32 %v1954_v8  ;;  %v1912_v50 = vmul.f32 1.442695, %v1899_v48  ;;  %v1936_v54 = vmul.f32 1.442695, %v1923_v51 }
 0x440   :  { %v2135_v18 = vadd.f32 %v10523_v40, %v2127_v6  ;;  %v10556_v37 = vpop.eup %8777  ;;  %8803 = vpow2.f32 %v1978_v31  ;;  %v1960_v32 = vmul.f32 1.442695, %v1947_v33  ;;  %v10562_v19 = vmax.f32 %v10459_v62, %v10528_v60 }
 0x441   :  { %v10564_v27 = vpop.eup %8779  ;;  %v2110_v4 = vadd.f32 %v10542_v9, %v2102_v2  ;;  %v1984_v12 = vmul.f32 1.442695, %v1971_v34  ;;  %v2008_v7 = vmul.f32 1.442695, %v1995_v5  ;;  %v2032_v8 = vmul.f32 1.442695, %v2019_v46 }
 0x442   :  { %8805 = vrcp.f32 %v2135_v18  ;;  %v10567_v11 = vpop.eup %8781  ;;  %v2056_v3 = vmul.f32 1.442695, %v2043_v52  ;;  %v10569_v28 = vmul.f32 1.442695, %v2067_v1  ;;  %v1884_v51 = vmax.f32 %v1876_v43, %v10558_v35  ;;  %v12398_v43 = vld [vmem:[#allocation27_spill] sm:$0xff] }
 0x443   :  { %8807 = vpow2.f32 %v2002_v47  ;;  %v10571_v31 = vpop.eup %8783  ;;  %v2118_v48 = vadd.f32 %v10550_v23, %v2110_v4  ;;  %v2089_v62 = vadd.f32 %v10567_v11, %v10564_v27  ;;  %v1898_v58 = vsub.f32 %v10268_v53, %v10562_v19 }
 0x444   :  { %8809 = vpow2.f32 %v2026_v39  ;;  %v10582_v47 = vpop.eup %8785  ;;  %v1922_v33 = vsub.f32 %v10270_v55, %v10562_v19  ;;  %v1946_v34 = vsub.f32 %v10298_v63, %v10562_v19  ;;  %v1970_v42 = vsub.f32 %v12398_v43, %v10562_v19 }
 0x445   :  { %8811 = vpow2.f32 %v2050_v20  ;;  %v10590_v39 = vpop.eup %8787  ;;  %v2126_v6 = vadd.f32 %v10556_v37, %v2118_v48  ;;  %v2097_v45 = vadd.f32 %v10582_v47, %v2089_v62  ;;  %v1994_v53 = vsub.f32 %v10341_v30, %v10562_v19 }
 0x446   :  { %8813 = vpow2.f32 %v1912_v50  ;;  %v10596_v20 = vpop.eup %8789  ;;  %v10602_v55 = vmax.f32 %v10467_v38, %v10554_v25  ;;  %v10605_v63 = vmax.f32 %v1884_v51, %v10580_v21  ;;  %v2018_v1 = vsub.f32 %v10354_v13, %v10562_v19 }
 0x447   :  { %8815 = vpow2.f32 %v1936_v54  ;;  %v10607_v5 = vpop.eup %8791  ;;  %v2134_v46 = vadd.f32 %v10571_v31, %v2126_v6  ;;  %v2105_v52 = vadd.f32 %v10590_v39, %v2097_v45  ;;  %v1910_v30 = vmul.f32 1.442695, %v1898_v58  ;;  %v12400_v45 = vld [vmem:[#allocation22_spill] sm:$0xff] }
 0x448   :  { %8817 = vpow2.f32 %v2074_v44  ;;  %v10613_v18 = vpop.eup %8793  ;;  %v1934_v2 = vmul.f32 1.442695, %v1922_v33  ;;  %v2042_v38 = vsub.f32 %v10441_v24, %v10562_v19  ;;  %v1958_v4 = vmul.f32 1.442695, %v1946_v34 }
 0x449   :  { %8819 = vpow2.f32 %v1960_v32  ;;  %v10617_v50 = vpop.eup %8795  ;;  %v2113_v54 = vadd.f32 %v10596_v20, %v2105_v52  ;;  %v1982_v48 = vmul.f32 1.442695, %v1970_v42  ;;  %v2006_v44 = vmul.f32 1.442695, %v1994_v53  ;;  %v12399_v32 = vld [vmem:[#allocation21_spill] sm:$0xff] }
 0x44a   :  { %8821 = vrcp.f32 %v2134_v46  ;;  %v10620_v62 = vpop.eup %8797  ;;  %v2066_v13 = vsub.f32 %v10528_v60, %v10562_v19  ;;  %v1901_v51 = vsub.f32 %v12399_v32, %v10602_v55  ;;  %v2030_v34 = vmul.f32 1.442695, %v2018_v1  ;;  %v12401_v60 = vld [vmem:[#allocation25_spill] sm:$0xff] }
 0x44b   :  { %8823 = vpow2.f32 %v1984_v12  ;;  %v10626_v58 = vpop.eup %8799  ;;  %v2121_v24 = vadd.f32 %v10607_v5, %v2113_v54  ;;  %v2088_v33 = vadd.f32 %v10620_v62, %v10617_v50  ;;  %v2054_v12 = vmul.f32 1.442695, %v2042_v38 }
 0x44c   :  { %8825 = vpow2.f32 %v2008_v7  ;;  %v10631_v6 = vpop.eup %8801  ;;  %v1925_v43 = vsub.f32 %v12400_v45, %v10602_v55  ;;  %v1949_v19 = vsub.f32 %v12401_v60, %v10602_v55  ;;  %v12402_v7 = vld [vmem:[#allocation28_spill] sm:$0xff]  ;;  %v2021_v38 = vsub.f32 %v10362_v17, %v10602_v55 }
 0x44d   :  { %8827 = vpow2.f32 %v2032_v8  ;;  %v10637_v42 = vpop.eup %8803  ;;  %v2129_v53 = vadd.f32 %v10613_v18, %v2121_v24  ;;  %v2096_v46 = vadd.f32 %v10631_v6, %v2088_v33  ;;  %v1973_v52 = vsub.f32 %v12402_v7, %v10602_v55 }
 0x44e   :  { %8829 = vpow2.f32 %v2056_v3  ;;  %v1997_v8 = vsub.f32 %v10343_v22, %v10602_v55  ;;  %v2045_v54 = vsub.f32 %v10450_v36, %v10602_v55  ;;  %v2078_v22 = vmul.f32 1.442695, %v2066_v13 }
 0x44f   :  { %v10643_v1 = vpop.eup %8805  ;;  %8831 = vpow2.f32 %v1910_v30  ;;  %v2137_v24 = vadd.f32 %v10626_v58, %v2129_v53  ;;  %v2104_v30 = vadd.f32 %v10637_v42, %v2096_v46  ;;  %v1916_v17 = vmul.f32 1.442695, %v1901_v51 }
 0x450   :  { %v10651_v32 = vpop.eup %8807  ;;  %v10655_v3 = vmul.f32 %v10643_v1, %v10523_v40  ;;  %8833 = vpow2.f32 %v1934_v2  ;;  %v2069_v36 = vsub.f32 %v10554_v25, %v10602_v55  ;;  %v1940_v40 = vmul.f32 1.442695, %v1925_v43  ;;  %v12405_v55 = vld [vmem:[#allocation23_spill] sm:$0xff] }
 0x451   :  { %v10659_v33 = vpop.eup %8809  ;;  %8835 = vpow2.f32 %v1958_v4  ;;  %v2112_v60 = vadd.f32 %v10651_v32, %v2104_v30  ;;  %v1964_v7 = vmul.f32 1.442695, %v1949_v19  ;;  %v1988_v2 = vmul.f32 1.442695, %v1973_v52  ;;  %v12406_v52 = vld [vmem:[#allocation24_spill] sm:$0xff]  ;;  %v12408_v30 = vld [vmem:[#allocation30_spill] sm:$0xff] }
 0x452   :  { %12403 = vst [vmem:[#allocation27_spill] sm:$0xff] %v10655_v3  ;;  %v10663_v45 = vpop.eup %8811  ;;  %8837 = vrcp.f32 %v2137_v24  ;;  %v2012_v53 = vmul.f32 1.442695, %v1997_v8  ;;  %v10669_v46 = vmul.f32 1.442695, %v2021_v38  ;;  %v1900_v51 = vsub.f32 %v12405_v55, %v10605_v63 }
 0x453   :  { %v10666_v3 = vpop.eup %8813  ;;  %8839 = vpow2.f32 %v10569_v28  ;;  %v2120_v13 = vadd.f32 %v10659_v33, %v2112_v60  ;;  %v10674_v25 = vmul.f32 1.442695, %v2045_v54  ;;  %v10682_v28 = vmul.f32 1.442695, %v2069_v36  ;;  %v12407_v54 = vld [vmem:[#allocation26_spill] sm:$0xff] }
 0x454   :  { %v10671_v4 = vpop.eup %8815  ;;  %8841 = vpow2.f32 %v1982_v48  ;;  %v1924_v8 = vsub.f32 %v12406_v52, %v10605_v63  ;;  %v1948_v24 = vsub.f32 %v12407_v54, %v10605_v63  ;;  %v1972_v60 = vsub.f32 %v12408_v30, %v10605_v63 }
 0x455   :  { %12404 = vst [vmem:[#allocation21_spill] sm:$0xff] %v10671_v4  ;;  %v10678_v43 = vpop.eup %8817  ;;  %v2091_v19 = vadd.f32 %v10671_v4, %v10666_v3  ;;  %8843 = vpow2.f32 %v2006_v44  ;;  %v2128_v48 = vadd.f32 %v10663_v45, %v2120_v13  ;;  %v2159_v44 = vmul.f32 %v10643_v1, %v10473_v57 }
 0x456   :  { %v10686_v38 = vpop.eup %8819  ;;  %8845 = vpow2.f32 %v2030_v34  ;;  %v10698_v36 = vmul.f32 %v10643_v1, %v10475_v0  ;;  %v2490_v54 = vmul.f32 %v10643_v1, %v10488_v61  ;;  %v10721_v61 = vmul.f32 %v10643_v1, %v10501_v41 }
 0x457   :  { %v8822_v55 = vpop.eup %8821  ;;  %v2099_v4 = vadd.f32 %v10686_v38, %v2091_v19  ;;  %8847 = vpow2.f32 %v2054_v12  ;;  %v2136_v34 = vadd.f32 %v10678_v43, %v2128_v48 }
 0x458   :  { %v10700_v52 = vpop.eup %8823  ;;  %8849 = vpow2.f32 %v1916_v17  ;;  %v2158_v13 = vmul.f32 %v8822_v55, %v10514_v29  ;;  %v2489_v57 = vmul.f32 %v8822_v55, %v10530_v26  ;;  %v10711_v0 = vmul.f32 %v8822_v55, %v10517_v59 }
 0x459   :  { %v10706_v30 = vpop.eup %8825  ;;  %v2107_v12 = vadd.f32 %v10700_v52, %v2099_v4  ;;  %8851 = vpow2.f32 %v1940_v40  ;;  %v10717_v29 = vmul.f32 %v8822_v55, %v10542_v9  ;;  %v10724_v17 = vmul.f32 %v8822_v55, %v10536_v15  ;;  %v12409_v15 = vld [vmem:[#allocation29_spill] sm:$0xff] }
 0x45a   :  { %v10713_v19 = vpop.eup %8827  ;;  %8853 = vrcp.f32 %v2136_v34  ;;  %8403 = vmatprep.mubr.msk.f32.mxu1 %vm2166_vm0, %v2158_v13  ;;  %8431 = vmatprep.mubr.msk.f32.mxu0 %vm2166_vm0, %v2489_v57  ;;  %v10732_v26 = vmul.f32 %v8822_v55, %v10556_v37  ;;  %v10736_v9 = vmul.f32 %v10643_v1, %v10494_v49  ;;  %v10747_v4 = vmul.f32 %v8822_v55, %v10550_v23 }
 0x45b   :  { %v10726_v40 = vpop.eup %8829  ;;  %v2115_v59 = vadd.f32 %v10706_v30, %v2107_v12  ;;  %8855 = vpow2.f32 %v1964_v7  ;;  %8404 = vmatmul.mubr.msk.f32.vlgmr.msra.gmra.mxu1 %vm2166_vm0, %v2159_v44  ;;  %8432 = vmatmul.mubr.msk.f32.vlgmr.msra.gmra.mxu0 %vm2166_vm0, %v2490_v54  ;;  %v10744_v7 = vmul.f32 %v10643_v1, %v10510_v14  ;;  %v10751_v37 = vmul.f32 %v10643_v1, %v10505_v10 }
 0x45c   :  { %v10738_v41 = vpop.eup %8831  ;;  %8857 = vpow2.f32 %v2078_v22  ;;  %8416 = vmatpush3.msra.mxu1 %v12409_v15  ;;  %v1914_v22 = vmul.f32 1.442695, %v1900_v51  ;;  %8458 = vmatpush3.msra.mxu0 %v12409_v15  ;;  %v10759_v14 = vmul.f32 %v8822_v55, %v10571_v31  ;;  %v1938_v10 = vmul.f32 1.442695, %v1924_v8 }
 0x45d   :  { %v10753_v49 = vpop.eup %8833  ;;  %v2123_v48 = vadd.f32 %v10713_v19, %v2115_v59  ;;  %8859 = vpow2.f32 %v1988_v2  ;;  %8443 = vmatprep.subr.mxu1 %v12409_v15  ;;  %v1996_v1 = vsub.f32 %v10350_v16, %v10605_v63  ;;  %8485 = vmatprep.subr.mxu0 %v12409_v15  ;;  %v1962_v34 = vmul.f32 1.442695, %v1948_v24 }
 0x45e   :  { %v10761_v44 = vpop.eup %8835  ;;  %v2090_v23 = vadd.f32 %v10753_v49, %v10738_v41  ;;  %8861 = vpow2.f32 %v2012_v53  ;;  %v2020_v31 = vsub.f32 %v10381_v56, %v10605_v63  ;;  %v1986_v53 = vmul.f32 1.442695, %v1972_v60 }
 0x45f   :  { %v8838_v2 = vpop.eup %8837  ;;  %v2131_v51 = vadd.f32 %v10726_v40, %v2123_v48  ;;  %8863 = vpow2.f32 %v10669_v46  ;;  %v2044_v16 = vsub.f32 %v10558_v35, %v10605_v63  ;;  %v2010_v48 = vmul.f32 1.442695, %v1996_v1 }
 0x460   :  { %v10772_v55 = vpop.eup %8839  ;;  %v2098_v13 = vadd.f32 %v10761_v44, %v2090_v23  ;;  %8865 = vpow2.f32 %v10674_v25  ;;  %v10782_v46 = vmul.f32 %v8838_v2, %v10567_v11  ;;  %v10785_v56 = vmul.f32 %v8838_v2, %v10596_v20 }
 0x461   :  { %v10778_v8 = vpop.eup %8841  ;;  %v2139_v54 = vadd.f32 %v10772_v55, %v2131_v51  ;;  %8867 = vpow2.f32 %v1914_v22  ;;  %v10791_v25 = vmul.f32 %v8838_v2, %v10590_v39  ;;  %v10794_v35 = vmul.f32 %v8838_v2, %v10613_v18 }
 0x462   :  { %v10787_v24 = vpop.eup %8843  ;;  %v2106_v12 = vadd.f32 %v10778_v8, %v2098_v13  ;;  %8869 = vpow2.f32 %v1938_v10  ;;  %v2068_v11 = vsub.f32 %v10580_v21, %v10605_v63  ;;  %v10801_v20 = vmul.f32 %v8838_v2, %v10607_v5 }
 0x463   :  { %v10796_v60 = vpop.eup %8845  ;;  %8871 = vrcp.f32 %v2139_v54  ;;  %v10804_v57 = vmul.f32 %v8838_v2, %v10626_v58  ;;  %v2034_v63 = vmul.f32 1.442695, %v2020_v31  ;;  %v2058_v23 = vmul.f32 1.442695, %v2044_v16 }
 0x464   :  { %v10806_v59 = vpop.eup %8847  ;;  %v2114_v39 = vadd.f32 %v10787_v24, %v2106_v12  ;;  %8873 = vpow2.f32 %v1962_v34  ;;  %v2082_v10 = vmul.f32 1.442695, %v2068_v11  ;;  %v2161_v51 = vmul.f32 %v8838_v2, %v10564_v27 }
 0x465   :  { %12410 = vst [vmem:[#allocation22_spill] sm:$0xff] %v10804_v57  ;;  %v10809_v18 = vpop.eup %8849  ;;  %8875 = vpow2.f32 %v10682_v28 }
 0x466   :  { %v10812_v22 = vpop.eup %8851  ;;  %v2122_v21 = vadd.f32 %v10796_v60, %v2114_v39  ;;  %8877 = vpow2.f32 %v1986_v53  ;;  %v2492_v53 = vmul.f32 %v8838_v2, %v10582_v47 }
 0x467   :  { %v8854_v5 = vpop.eup %8853  ;;  %v2093_v58 = vadd.f32 %v10812_v22, %v10809_v18  ;;  %8879 = vpow2.f32 %v2010_v48 }
 0x468   :  { %v10818_v34 = vpop.eup %8855  ;;  %v2130_v1 = vadd.f32 %v10806_v59, %v2122_v21  ;;  %v2160_v28 = vmul.f32 %v8854_v5, %v10617_v50  ;;  %v2491_v13 = vmul.f32 %v8854_v5, %v10631_v6  ;;  %v10826_v12 = vmul.f32 %v8854_v5, %v10620_v62 }
 0x469   :  { %v8858_v54 = vpop.eup %8857  ;;  %v2101_v31 = vadd.f32 %v10818_v34, %v2093_v58  ;;  %v10829_v16 = vmul.f32 %v8854_v5, %v10651_v32  ;;  %8881 = vpow2.f32 %v2034_v63  ;;  %v10834_v50 = vmul.f32 %v8854_v5, %v10637_v42 }
 0x46a   :  { %v8860_v27 = vpop.eup %8859  ;;  %v2138_v11 = vadd.f32 %v8858_v54, %v2130_v1  ;;  %8406 = vmatprep.mubr.msk.f32.mxu1 %vm2166_vm0, %v2160_v28  ;;  %8434 = vmatprep.mubr.msk.f32.mxu0 %vm2166_vm0, %v2491_v13  ;;  %v10837_v6 = vmul.f32 %v8854_v5, %v10663_v45  ;;  %8883 = vpow2.f32 %v2058_v23  ;;  %v10842_v62 = vmul.f32 %v8854_v5, %v10659_v33 }
 0x46b   :  { %v8862_v47 = vpop.eup %8861  ;;  %v2109_v2 = vadd.f32 %v8860_v27, %v2101_v31  ;;  %8407 = vmatmul.mubr.msk.f32.gmra.mxu1 %vm2166_vm0, %v2161_v51  ;;  %8435 = vmatmul.mubr.msk.f32.gmra.mxu0 %vm2166_vm0, %v2492_v53  ;;  %v10845_v32 = vmul.f32 %v8854_v5, %v10678_v43 }
 0x46c   :  { %v8864_v39 = vpop.eup %8863  ;;  %8885 = vrcp.f32 %v2138_v11 }
 0x46d   :  { %12411 = vst [vmem:[#allocation25_spill] sm:$0xff] %v10845_v32  ;;  %v10847_v42 = vpop.eup %8865  ;;  %v2117_v48 = vadd.f32 %v8862_v47, %v2109_v2  ;;  %8887 = vpow2.f32 %v2082_v10 }
 0x46e   :  { %v8868_v45 = vpop.eup %8867 }
 0x46f   :  { %v10849_v21 = vpop.eup %8869  ;;  %v2125_v63 = vadd.f32 %v8864_v39, %v2117_v48 }
 0x470   :  { %v10851_v58 = vpop.eup %8871  ;;  %v2092_v23 = vadd.f32 %v10849_v21, %v8868_v45 }
 0x471   :  { %v8874_v51 = vpop.eup %8873  ;;  %v2133_v33 = vadd.f32 %v10847_v42, %v2125_v63  ;;  %v10857_v13 = vmul.f32 %v10851_v58, %v10713_v19  ;;  %v10861_v10 = vmul.f32 %v10851_v58, %v10772_v55 }
 0x472   :  { %v8876_v1 = vpop.eup %8875  ;;  %v2100_v43 = vadd.f32 %v8874_v51, %v2092_v23  ;;  %v2163_v23 = vmul.f32 %v10851_v58, %v10666_v3 }
 0x473   :  { %v8878_v5 = vpop.eup %8877  ;;  %v2141_v28 = vadd.f32 %v8876_v1, %v2133_v33  ;;  %12412 = vst [vmem:[#allocation28_spill] sm:$0xff] %v10861_v10 }
 0x474   :  { %v2108_v31 = vadd.f32 %v8878_v5, %v2100_v43  ;;  %v8880_v53 = vpop.eup %8879 }
 0x475   :  { %8889 = vrcp.f32 %v2141_v28  ;;  %v2494_v28 = vmul.f32 %v10851_v58, %v10686_v38 }
 0x476   :  { %v2116_v11 = vadd.f32 %v8880_v53, %v2108_v31  ;;  %v8882_v2 = vpop.eup %8881 }
 0x477   :  { %v10863_v48 = vpop.eup %8883 }
 0x478   :  { %v2124_v63 = vadd.f32 %v8882_v2, %v2116_v11 }
 0x479   :  { %v8886_v57 = vpop.eup %8885 }
 0x47a   :  { %v2132_v33 = vadd.f32 %v10863_v48, %v2124_v63  ;;  %v2162_v19 = vmul.f32 %v8886_v57, %v10738_v41  ;;  %v2493_v32 = vmul.f32 %v8886_v57, %v10761_v44  ;;  %v2324_v55 = vmul.f32 %v8886_v57, %v10753_v49  ;;  %v8888_v43 = vpop.eup %8887 }
 0x47b   :  { %v10874_v31 = vmul.f32 %v8886_v57, %v10778_v8  ;;  %v10877_v11 = vmul.f32 %v8886_v57, %v10806_v59  ;;  %v10880_v3 = vmul.f32 %v8886_v57, %v10796_v60  ;;  %v10884_v41 = vmul.f32 %v8886_v57, %v8858_v54 }
 0x47c   :  { %v2140_v63 = vadd.f32 %v8888_v43, %v2132_v33  ;;  %8409 = vmatprep.mubr.msk.f32.mxu1 %vm2166_vm0, %v2162_v19  ;;  %8437 = vmatprep.mubr.msk.f32.mxu0 %vm2166_vm0, %v2493_v32 }
 0x47d   :  { %12413 = vst [vmem:[#allocation23_spill] sm:$0xff] %v10884_v41  ;;  %8410 = vmatmul.mubr.msk.f32.gmra.mxu1 %vm2166_vm0, %v2163_v23  ;;  %8438 = vmatmul.mubr.msk.f32.gmra.mxu0 %vm2166_vm0, %v2494_v28 }
 0x47e   :  { %8891 = vrcp.f32 %v2140_v63 }
 0x482   :  { %v8890_v38 = vpop.eup %8889 }
 0x483   :  { %v2834_v49 = vmul.f32 %v8890_v38, %v8862_v47  ;;  %v2665_v44 = vmul.f32 %v8890_v38, %v8860_v27  ;;  %v10888_v8 = vmul.f32 %v8890_v38, %v8864_v39  ;;  %v10890_v59 = vmul.f32 %v8890_v38, %v8876_v1 }
 0x484   :  { %v2165_v19 = vmul.f32 %v8890_v38, %v10809_v18  ;;  %v2496_v54 = vmul.f32 %v8890_v38, %v10818_v34 }
 0x48b   :  { %v8892_v60 = vpop.eup %8891 }
 0x48c   :  { %v2164_v33 = vmul.f32 %v8892_v60, %v8868_v45  ;;  %v2495_v10 = vmul.f32 %v8892_v60, %v8874_v51  ;;  %v2664_v32 = vmul.f32 %v8892_v60, %v8878_v5  ;;  %v3002_v41 = vmul.f32 %v8892_v60, %v8882_v2 }
 0x48d   :  { %v10894_v23 = vmul.f32 %v8892_v60, %v8888_v43 }
 0x48e   :  { %8412 = vmatprep.mubr.msk.f32.mxu1 %vm2166_vm0, %v2164_v33  ;;  %8440 = vmatprep.mubr.msk.f32.mxu0 %vm2166_vm0, %v2495_v10 }
 0x48f   :  { %8413 = vmatmul.mubr.msk.f32.gmra.mxu1 %vm2166_vm0, %v2165_v19  ;;  %8441 = vmatmul.mubr.msk.f32.gmra.mxu0 %vm2166_vm0, %v2496_v54 }
 0x490   :  { %8417 = vmatprep.mubr.msk.f32.mxu1 %vm2166_vm0, %v10711_v0  ;;  %8459 = vmatprep.mubr.msk.f32.mxu0 %vm2166_vm0, %v10717_v29  ;;  %v2831_v0 = vmul.f32 %v8886_v57, %v10787_v24  ;;  %v2326_v24 = vmul.f32 %v8892_v60, %v10849_v21  ;;  %v2833_v57 = vmul.f32 %v8892_v60, %v8880_v53 }
 0x493   :  { %8418 = vmatmul.mubr.msk.f32.vlgmr.msra.gmra.mxu1 %vm2166_vm0, %v10698_v36  ;;  %8460 = vmatmul.mubr.msk.f32.vlgmr.msra.gmra.mxu0 %vm2166_vm0, %v10721_v61  ;;  %v12414_v36 = vld [vmem:[#allocation21_spill] sm:$0xff]  ;;  %v2832_v61 = vmul.f32 %v10851_v58, %v10706_v30  ;;  %v8909_v30 = vld [vmem:[%s12353_s5] sm:$0xff] }
 0x494   :  { %8444 = vmatpush3.msra.mxu1 %v12409_v15  ;;  %8420 = vmatprep.mubr.msk.f32.mxu1 %vm2166_vm0, %v10826_v12  ;;  %v2325_v29 = vmul.f32 %v10851_v58, %v12414_v36 }
 0x495   :  { %8462 = vmatprep.mubr.msk.f32.mxu0 %vm2166_vm0, %v10829_v16  ;;  %8471 = vmatprep.subr.mxu1 %v12409_v15 }
 0x496   :  { %8486 = vmatpush3.msra.mxu0 %v12409_v15  ;;  %v2327_v15 = vmul.f32 %v8890_v38, %v10812_v22 }
 0x497   :  { %8421 = vmatmul.mubr.msk.f32.gmra.mxu1 %vm2166_vm0, %v10782_v46  ;;  %8463 = vmatmul.mubr.msk.f32.gmra.mxu0 %vm2166_vm0, %v10785_v56  ;;  %v12419_v46 = vld [vmem:[#allocation28_spill] sm:$0xff] }
 0x498   :  { %8423 = vmatprep.mubr.msk.f32.mxu1 %vm2166_vm0, %v2324_v55  ;;  %8465 = vmatprep.mubr.msk.f32.mxu0 %vm2166_vm0, %v2831_v0 }
 0x49b   :  { %8424 = vmatmul.mubr.msk.f32.gmra.mxu1 %vm2166_vm0, %v2325_v29  ;;  %8466 = vmatmul.mubr.msk.f32.gmra.mxu0 %vm2166_vm0, %v2832_v61 }
 0x49c   :  { %8426 = vmatprep.mubr.msk.f32.mxu1 %vm2166_vm0, %v2326_v24  ;;  %8468 = vmatprep.mubr.msk.f32.mxu0 %vm2166_vm0, %v2833_v57 }
 0x49f   :  { %8427 = vmatmul.mubr.msk.f32.gmra.mxu1 %vm2166_vm0, %v2327_v15  ;;  %8469 = vmatmul.mubr.msk.f32.gmra.mxu0 %vm2166_vm0, %v2834_v49 }
 0x4a0   :  { %8445 = vmatprep.mubr.msk.f32.mxu1 %vm2166_vm0, %v10724_v17  ;;  %8487 = vmatprep.mubr.msk.f32.mxu0 %vm2166_vm0, %v10732_v26  ;;  %v2663_v17 = vmul.f32 %v10851_v58, %v10700_v52  ;;  %v3170_v26 = vmul.f32 %v10851_v58, %v10726_v40  ;;  %v12415_v52 = vld [vmem:[#allocation27_spill] sm:$0xff]  ;;  %v12416_v40 = vld [vmem:[#allocation25_spill] sm:$0xff] }
 0x4a3   :  { %8446 = vmatmul.mubr.msk.f32.vlgmr.msra.gmra.mxu1 %vm2166_vm0, %v10736_v9  ;;  %8488 = vmatmul.mubr.msk.f32.vlgmr.msra.gmra.mxu0 %vm2166_vm0, %v10744_v7  ;;  %v3171_v9 = vmul.f32 %v8892_v60, %v10863_v48  ;;  %v3172_v7 = vmul.f32 %v8890_v38, %v10847_v42 }
 0x4a4   :  { %8472 = vmatpush3.msra.mxu1 %v8909_v30  ;;  %8448 = vmatprep.mubr.msk.f32.mxu1 %vm2166_vm0, %v10834_v50 }
 0x4a5   :  { %8490 = vmatprep.mubr.msk.f32.mxu0 %vm2166_vm0, %v10837_v6  ;;  %8499 = vmatprep.subr.mxu1 %v8909_v30 }
 0x4a7   :  { %8449 = vmatmul.mubr.msk.f32.gmra.mxu1 %vm2166_vm0, %v10791_v25  ;;  %8491 = vmatmul.mubr.msk.f32.gmra.mxu0 %vm2166_vm0, %v10794_v35  ;;  %v11004_v35 = vpop.permute.xlu1 %2306 }
 0x4a8   :  { %8451 = vmatprep.mubr.msk.f32.mxu1 %vm2166_vm0, %v10874_v31  ;;  %8493 = vmatprep.mubr.msk.f32.mxu0 %vm2166_vm0, %v10877_v11 }
 0x4ab   :  { %8452 = vmatmul.mubr.msk.f32.gmra.mxu1 %vm2166_vm0, %v2663_v17  ;;  %8494 = vmatmul.mubr.msk.f32.gmra.mxu0 %vm2166_vm0, %v3170_v26  ;;  %v11008_v18 = vpop.permute.xlu1 %2475 }
 0x4ac   :  { %8454 = vmatprep.mubr.msk.f32.mxu1 %vm2166_vm0, %v2664_v32  ;;  %8496 = vmatprep.mubr.msk.f32.mxu0 %vm2166_vm0, %v3171_v9 }
 0x4af   :  { %8455 = vmatmul.mubr.msk.f32.gmra.mxu1 %vm2166_vm0, %v2665_v44  ;;  %8497 = vmatmul.mubr.msk.f32.gmra.mxu0 %vm2166_vm0, %v3172_v7  ;;  %v11012_v34 = vpop.permute.xlu1 %2642 }
 0x4b0   :  { %8473 = vmatprep.mubr.msk.f32.mxu1 %vm2166_vm0, %v10747_v4  ;;  %v12417_v4 = vld [vmem:[#allocation22_spill] sm:$0xff] }
 0x4b3   :  { %8474 = vmatmul.mubr.msk.f32.vlgmr.msra.gmra.mxu1 %vm2166_vm0, %v10751_v37  ;;  %v12418_v37 = vld [vmem:[#allocation23_spill] sm:$0xff]  ;;  %v11016_v16 = vpop.permute.xlu1 %2644 }
 0x4b4   :  { %8500 = vmatpush3.msra.mxu1 %v8909_v30  ;;  %8476 = vmatprep.mubr.msk.f32.mxu1 %vm2166_vm0, %v10842_v62 }
 0x4b7   :  { %8477 = vmatmul.mubr.msk.f32.gmra.mxu1 %vm2166_vm0, %v10801_v20  ;;  %v11018_v50 = vpop.permute.xlu1 %2811 }
 0x4b8   :  { %8479 = vmatprep.mubr.msk.f32.mxu1 %vm2166_vm0, %v10880_v3 }
 0x4bb   :  { %8480 = vmatmul.mubr.msk.f32.gmra.mxu1 %vm2166_vm0, %v10857_v13  ;;  %v11022_v47 = vpop.permute.xlu1 %2813 }
 0x4bc   :  { %8482 = vmatprep.mubr.msk.f32.mxu1 %vm2166_vm0, %v3002_v41 }
 0x4bf   :  { %8483 = vmatmul.mubr.msk.f32.gmra.mxu1 %vm2166_vm0, %v10888_v8  ;;  %v11026_v39 = vpop.permute.xlu1 %2646 }
 0x4c0   :  { %8501 = vmatprep.mubr.msk.f32.mxu1 %vm2166_vm0, %v10759_v14  ;;  %v11000_v14 = vpop.permute.xlu0 %2304  ;;  %12423 = vst [vmem:[#allocation29_spill] sm:$0xff] %v11026_v39 }
 0x4c3   :  { %8502 = vmatmul.mubr.msk.f32.vlgmr.msra.gmra.mxu1 %vm2166_vm0, %v12415_v52  ;;  %v2315_v45 = vpop.permute.xlu1 %2314  ;;  %v12434_v52 = vld [vmem:[#allocation15_spill] sm:$0xff] }
 0x4c4   :  { %8504 = vmatprep.mubr.msk.f32.mxu1 %vm2166_vm0, %v12416_v40  ;;  %v11002_v56 = vpop.permute.xlu0 %2473 }
 0x4c7   :  { %8505 = vmatmul.mubr.msk.f32.gmra.mxu1 %vm2166_vm0, %v12417_v4  ;;  %v11030_v58 = vpop.permute.xlu1 %2982 }
 0x4c8   :  { %8507 = vmatprep.mubr.msk.f32.mxu1 %vm2166_vm0, %v12418_v37  ;;  %v2309_v25 = vpop.permute.xlu0 %2308 }
 0x4cb   :  { %8508 = vmatmul.mubr.msk.f32.gmra.mxu1 %vm2166_vm0, %v12419_v46  ;;  %v11034_v1 = vpop.permute.xlu1 %2815 }
 0x4cc   :  { %8510 = vmatprep.mubr.msk.f32.mxu1 %vm2166_vm0, %v10894_v23  ;;  %v11006_v20 = vpop.permute.xlu0 %2310  ;;  %12426 = vst [vmem:[#allocation25_spill] sm:$0xff] %v11034_v1 }
 0x4cf   :  { %8511 = vmatmul.mubr.msk.f32.gmra.mxu1 %vm2166_vm0, %v10890_v59  ;;  %v2484_v13 = vpop.permute.xlu1 %2483 }
 0x4d0   :  { %v11010_v22 = vpop.permute.xlu0 %2477 }
 0x4d1   :  { %12420 = vst [vmem:[#allocation24_spill] sm:$0xff] %v11010_v22 }
 0x4d3   :  { %v11044_v48 = vpop.permute.xlu1 %3151 }
 0x4d4   :  { %v11014_v12 = vpop.permute.xlu0 %2479 }
 0x4d5   :  { %12421 = vst [vmem:[#allocation26_spill] sm:$0xff] %v11014_v12 }
 0x4d7   :  { %v11050_v31 = vpop.permute.xlu1 %2650 }
 0x4d8   :  { %v2313_v27 = vpop.permute.xlu0 %2312 }
 0x4db   :  { %v11060_v49 = vpop.permute.xlu1 %3318 }
 0x4dc   :  { %v11020_v6 = vpop.permute.xlu0 %2980  ;;  %12431 = vst [vmem:[#allocation32_spill] sm:$0xff] %v11060_v49 }
 0x4df   :  { %v2653_v60 = vpop.permute.xlu1 %2652 }
 0x4e0   :  { %v11024_v62 = vpop.permute.xlu0 %2648 }
 0x4e1   :  { %12422 = vst [vmem:[#allocation30_spill] sm:$0xff] %v11024_v62 }
 0x4e3   :  { %v11064_v0 = vpop.permute.xlu1 %3320 }
 0x4e4   :  { %v2482_v42 = vpop.permute.xlu0 %2481 }
 0x4e7   :  { %v2820_v30 = vpop.permute.xlu1 %2819 }
 0x4e8   :  { %v11028_v21 = vpop.permute.xlu0 %3149 }
 0x4e9   :  { %12424 = vst [vmem:[#allocation21_spill] sm:$0xff] %v11028_v21 }
 0x4eb   :  { %v2488_v46 = vpop.permute.xlu1 %2487 }
 0x4ec   :  { %v11032_v51 = vpop.permute.xlu0 %2817 }
 0x4ed   :  { %12425 = vst [vmem:[#allocation27_spill] sm:$0xff] %v11032_v51  ;;  %v12437_v51 = vld [vmem:[#allocation17_spill] sm:$0xff] }
 0x4f0   :  { %v11036_v5 = vpop.permute.xlu0 %2316 }
 0x4f4   :  { %v11038_v10 = vpop.permute.xlu0 %2984 }
 0x4f5   :  { %12427 = vst [vmem:[#allocation22_spill] sm:$0xff] %v11038_v10 }
 0x4f8   :  { %v2319_v55 = vpop.permute.xlu0 %2318 }
 0x4fc   :  { %v11056_v63 = vpop.permute.xlu0 %2986 }
 0x4fd   :  { %12429 = vst [vmem:[#allocation28_spill] sm:$0xff] %v11056_v63 }
 0x500   :  { %v2486_v44 = vpop.permute.xlu0 %2485 }
 0x504   :  { %v11062_v54 = vpop.permute.xlu0 %3153 }
 0x505   :  { %12432 = vst [vmem:[#allocation33_spill] sm:$0xff] %v11062_v54  ;;  %v12435_v54 = vld [vmem:[#allocation16_spill] sm:$0xff] }
 0x508   :  { %v11066_v61 = vpop.permute.xlu0 %2821 }
 0x509   :  { %12433 = vst [vmem:[#allocation34_spill] sm:$0xff] %v11066_v61 }
 0x50c   :  { %v2655_v26 = vpop.permute.xlu0 %2654 }
 0x510   :  { %v11082_v22 = vpop.permute.xlu0 %3322 }
 0x511   :  { %12436 = vst [vmem:[#allocation15_spill] sm:$0xff] %v11082_v22 }
 0x51b   :  { %v11040_v53 = vpop.f32.mrf.mxu1  ;;  %v11042_v2 = vpop.f32.mrf.mxu0 }
 0x51d   :  { %v11046_v43 = vpop.f32.mrf.mxu1  ;;  %v11048_v28 = vpop.f32.mrf.mxu0 }
 0x52b   :  { %v11052_v11 = vpop.f32.mrf.mxu1  ;;  %v11054_v3 = vpop.f32.mrf.mxu0 }
 0x52c   :  { %12428 = vst [vmem:[#allocation23_spill] sm:$0xff] %v11054_v3 }
 0x52d   :  { %v2267_v41 = vpop.f32.mrf.mxu1  ;;  %v11058_v38 = vpop.f32.mrf.mxu0 }
 0x52e   :  { %12430 = vst [vmem:[#allocation31_spill] sm:$0xff] %v11058_v38  ;;  %v2298_v40 = vmul.f32 %v2267_v41, %v12434_v52 }
 0x53d   :  { %v8411_v8 = vpop.f32.mrf.mxu1  ;;  %v8439_v59 = vpop.f32.mrf.mxu0 }
 0x53e   :  { %v2301_v10 = vmul.f32 %v8411_v8, %v12435_v54  ;;  %v2631_v63 = vmul.f32 %v8439_v59, %v2484_v13 }
 0x53f   :  { %v2277_v33 = vpop.f32.mrf.mxu1  ;;  %v2607_v19 = vpop.f32.mrf.mxu0 }
 0x540   :  { %v2300_v62 = vmul.f32 %v2277_v33, %v12437_v51  ;;  %v2630_v49 = vmul.f32 %v2607_v19, %v2482_v42  ;;  %v11092_v42 = vpop.permute.xlu0 %2990 }
 0x54f   :  { %v8414_v32 = vpop.f32.mrf.mxu1  ;;  %v8442_v23 = vpop.f32.mrf.mxu0 }
 0x550   :  { %v2633_v54 = vmul.f32 %v8442_v23, %v2488_v46 }
 0x551   :  { %v2287_v36 = vpop.f32.mrf.mxu1  ;;  %v2617_v29 = vpop.f32.mrf.mxu0 }
 0x553   :  { %v8419_v24 = vpop.f32.mrf.mxu1  ;;  %v11068_v57 = vpop.f32.mrf.mxu0 }
 0x555   :  { %v11070_v15 = vpop.f32.mrf.mxu1  ;;  %v11074_v9 = vpop.f32.mrf.mxu0 }
 0x557   :  { %v11072_v17 = vpop.f32.mrf.mxu1  ;;  %v11080_v39 = vpop.f32.mrf.mxu0 }
 0x559   :  { %v2428_v7 = vpop.f32.mrf.mxu1 }
 0x55a   :  { %v2459_v4 = vmul.f32 %v2428_v7, %v2309_v25  ;;  %v12438_v25 = vld [vmem:[#allocation18_spill] sm:$0xff] }
 0x55b   :  { %v8425_v37 = vpop.f32.mrf.mxu1  ;;  %v2303_v7 = vmul.f32 %v8414_v32, %v12438_v25 }
 0x55c   :  { %v11078_v61 = vadd.f32 %v2459_v4, %v2298_v40  ;;  %v2462_v1 = vmul.f32 %v8425_v37, %v2315_v45  ;;  %v11086_v40 = vpop.f32.mrf.mxu0  ;;  %v11088_v4 = vpop.permute.xlu1 %3155  ;;  %v12439_v37 = vld [vmem:[#allocation19_spill] sm:$0xff] }
 0x55d   :  { %v2438_v38 = vpop.f32.mrf.mxu1  ;;  %v2302_v22 = vmul.f32 %v2287_v36, %v12439_v37 }
 0x55e   :  { %v2470_v3 = vadd.f32 %v2462_v1, %v2301_v10  ;;  %v2461_v12 = vmul.f32 %v2438_v38, %v2313_v27  ;;  %v2632_v10 = vmul.f32 %v2617_v29, %v2486_v44 }
 0x55f   :  { %v8428_v41 = vpop.f32.mrf.mxu1 }
 0x560   :  { %v2469_v52 = vadd.f32 %v2461_v12, %v2300_v62  ;;  %v2464_v21 = vmul.f32 %v8428_v41, %v2319_v55  ;;  %v2639_v8 = vadd.f32 %v2631_v63, %v2470_v3  ;;  %v11094_v62 = vpop.f32.mrf.mxu0  ;;  %v2989_v59 = vpop.permute.xlu1 %2988  ;;  %v2458_v41 = vmul.f32 %v8419_v24, %v11004_v35 }
 0x561   :  { %v2448_v45 = vpop.f32.mrf.mxu1  ;;  %v2627_v35 = vmul.f32 %v11042_v2, %v11008_v18 }
 0x562   :  { %v2472_v13 = vadd.f32 %v2464_v21, %v2303_v7  ;;  %v2463_v51 = vmul.f32 %v2448_v45, %v11036_v5  ;;  %v2638_v1 = vadd.f32 %v2630_v49, %v2469_v52  ;;  %v2945_v33 = vpop.f32.mrf.mxu0  ;;  %v2824_v21 = vpop.permute.xlu0 %2823 }
 0x563   :  { %v8447_v27 = vpop.f32.mrf.mxu1  ;;  %v2968_v25 = vmul.f32 %v2945_v33, %v2820_v30 }
 0x564   :  { %v2471_v38 = vadd.f32 %v2463_v51, %v2302_v22  ;;  %v2641_v12 = vadd.f32 %v2633_v54, %v2472_v13  ;;  %v8470_v49 = vpop.f32.mrf.mxu0  ;;  %v2657_v44 = vpop.permute.xlu1 %2656  ;;  %v12441_v54 = vld [vmem:[#allocation12_spill] sm:$0xff]  ;;  %v2796_v24 = vmul.f32 %v8447_v27, %v11016_v16  ;;  %v12442_v16 = vld [vmem:[#allocation13_spill] sm:$0xff] }
 0x565   :  { %v2756_v55 = vpop.f32.mrf.mxu1  ;;  %v2297_v45 = vmul.f32 %v11040_v53, %v12441_v54  ;;  %v2296_v27 = vmul.f32 %v11046_v43, %v12442_v16 }
 0x566   :  { %v2640_v3 = vadd.f32 %v2632_v10, %v2471_v38  ;;  %v2826_v46 = vpop.permute.xlu0 %2825  ;;  %v2955_v37 = vpop.f32.mrf.mxu0 }
 0x567   :  { %v11096_v63 = vpop.f32.mrf.mxu1 }
 0x568   :  { %v3325_v16 = vpop.permute.xlu1 %3324 }
 0x569   :  { %v11098_v19 = vpop.f32.mrf.mxu1 }
 0x56a   :  { %v2993_v53 = vpop.permute.xlu0 %2992 }
 0x56b   :  { %v8453_v32 = vpop.f32.mrf.mxu1 }
 0x56c   :  { %v2800_v5 = vmul.f32 %v8453_v32, %v2653_v60  ;;  %v2971_v60 = vmul.f32 %v8470_v49, %v2826_v46  ;;  %v2466_v32 = vadd.f32 %v2458_v41, %v2297_v45  ;;  %v8489_v46 = vpop.f32.mrf.mxu0 }
 0x56d   :  { %v2776_v23 = vpop.f32.mrf.mxu1 }
 0x56e   :  { %v11100_v36 = vadd.f32 %v2800_v5, %v2639_v8  ;;  %v2799_v22 = vmul.f32 %v2776_v23, %v11050_v31  ;;  %v2970_v31 = vmul.f32 %v2955_v37, %v2824_v21  ;;  %v2635_v33 = vadd.f32 %v2627_v35, %v2466_v32  ;;  %v2995_v2 = vpop.permute.xlu0 %2994  ;;  %v12448_v35 = vld [vmem:[#allocation30_spill] sm:$0xff] }
 0x56f   :  { %v8456_v29 = vpop.f32.mrf.mxu1  ;;  %v2965_v21 = vmul.f32 %v11068_v57, %v11022_v47  ;;  %v2626_v47 = vmul.f32 %v11048_v28, %v11002_v56  ;;  %v2795_v57 = vmul.f32 %v2756_v55, %v11012_v34  ;;  %v2964_v56 = vmul.f32 %v11074_v9, %v11018_v50  ;;  %v3263_v28 = vpop.f32.mrf.mxu0  ;;  %v12443_v50 = vld [vmem:[#allocation14_spill] sm:$0xff]  ;;  %v12444_v9 = vld [vmem:[#allocation21_spill] sm:$0xff] }
 0x570   :  { %12440 = vst [vmem:[#allocation16_spill] sm:$0xff] %v11100_v36  ;;  %v2807_v7 = vadd.f32 %v2799_v22, %v2638_v1  ;;  %v2802_v52 = vmul.f32 %v8456_v29, %v2657_v44 }
 0x571   :  { %v2786_v13 = vpop.f32.mrf.mxu1 }
 0x572   :  { %v2810_v51 = vadd.f32 %v2802_v52, %v2641_v12  ;;  %v2801_v10 = vmul.f32 %v2786_v13, %v2655_v26  ;;  %v2976_v8 = vadd.f32 %v2968_v25, %v2807_v7  ;;  %v2804_v12 = vadd.f32 %v2796_v24, %v2635_v33  ;;  %v12449_v33 = vld [vmem:[#allocation27_spill] sm:$0xff] }
 0x573   :  { %v8475_v38 = vpop.f32.mrf.mxu1  ;;  %v2798_v24 = vmul.f32 %v11096_v63, %v12448_v35 }
 0x574   :  { %v2809_v5 = vadd.f32 %v2801_v10, %v2640_v3  ;;  %v2979_v23 = vadd.f32 %v2971_v60, %v2810_v51  ;;  %v2457_v3 = vmul.f32 %v11070_v15, %v11000_v14  ;;  %v3134_v49 = vmul.f32 %v8475_v38, %v11030_v58  ;;  %v12445_v38 = vld [vmem:[#allocation32_spill] sm:$0xff] }
 0x575   :  { %v3094_v36 = vpop.f32.mrf.mxu1  ;;  %v2973_v44 = vadd.f32 %v2965_v21, %v2804_v12  ;;  %v3303_v58 = vmul.f32 %v8489_v46, %v11044_v48  ;;  %v2967_v12 = vmul.f32 %v11080_v39, %v12449_v33  ;;  %v12450_v21 = vld [vmem:[#allocation28_spill] sm:$0xff] }
 0x576   :  { %v2978_v30 = vadd.f32 %v2970_v31, %v2809_v5  ;;  %v2465_v25 = vadd.f32 %v2457_v3, %v2296_v27  ;;  %v3133_v48 = vmul.f32 %v3094_v36, %v11020_v6  ;;  %v2299_v6 = vmul.f32 %v11052_v11, %v12443_v50  ;;  %v12451_v39 = vld [vmem:[#allocation24_spill] sm:$0xff]  ;;  %v12452_v27 = vld [vmem:[#allocation31_spill] sm:$0xff] }
 0x577   :  { %v8478_v1 = vpop.f32.mrf.mxu1  ;;  %v3142_v7 = vadd.f32 %v3134_v49, %v2973_v44  ;;  %v3302_v36 = vmul.f32 %v3263_v28, %v12444_v9  ;;  %v8492_v49 = vpop.f32.mrf.mxu0  ;;  %v12458_v28 = vld [vmem:[#allocation34_spill] sm:$0xff] }
 0x578   :  { %v3136_v3 = vmul.f32 %v8478_v1, %v12450_v21  ;;  %v2628_v1 = vmul.f32 %v12452_v27, %v12451_v39  ;;  %v3305_v44 = vmul.f32 %v8492_v49, %v11088_v4  ;;  %v12455_v4 = vld [vmem:[#allocation22_spill] sm:$0xff]  ;;  %v3162_v21 = vpop.permute.xlu0 %3161 }
 0x579   :  { %v11109_v22 = vpop.f32.mrf.mxu1  ;;  %v3311_v13 = vadd.f32 %v3303_v58, %v3142_v7 }
 0x57b   :  { %v11111_v26 = vpop.f32.mrf.mxu1 }
 0x57d   :  { %v3114_v18 = vpop.f32.mrf.mxu1 }
 0x57e   :  { %v3137_v29 = vmul.f32 %v3114_v18, %v2989_v59  ;;  %v2634_v59 = vadd.f32 %v2626_v47, %v2465_v25  ;;  %v2636_v25 = vadd.f32 %v2628_v1, %v11078_v61  ;;  %v3158_v61 = vpop.permute.xlu1 %3157 }
 0x57f   :  { %v8484_v41 = vpop.f32.mrf.mxu1 }
 0x580   :  { %v11120_v52 = vadd.f32 %v3137_v29, %v2976_v8  ;;  %v3140_v54 = vmul.f32 %v8484_v41, %v2995_v2  ;;  %v2803_v51 = vadd.f32 %v2795_v57, %v2634_v59  ;;  %v12453_v29 = vld [vmem:[#allocation29_spill] sm:$0xff]  ;;  %v3135_v57 = vmul.f32 %v11109_v22, %v12455_v4  ;;  %v12457_v22 = vld [vmem:[#allocation15_spill] sm:$0xff] }
 0x581   :  { %v3124_v14 = vpop.f32.mrf.mxu1  ;;  %v2797_v46 = vmul.f32 %v11098_v19, %v12453_v29 }
 0x582   :  { %v11126_v15 = vadd.f32 %v3140_v54, %v2979_v23  ;;  %v3139_v43 = vmul.f32 %v3124_v14, %v2993_v53  ;;  %v2972_v34 = vadd.f32 %v2964_v56, %v2803_v51  ;;  %v12454_v14 = vld [vmem:[#allocation25_spill] sm:$0xff]  ;;  %v3160_v56 = vpop.permute.xlu1 %3159 }
 0x583   :  { %v8503_v45 = vpop.f32.mrf.mxu1  ;;  %v2805_v54 = vadd.f32 %v2797_v46, %v2636_v25  ;;  %v2966_v58 = vmul.f32 %v11086_v40, %v12454_v14  ;;  %v12456_v40 = vld [vmem:[#allocation33_spill] sm:$0xff] }
 0x584   :  { %v11128_v37 = vadd.f32 %v3139_v43, %v2978_v30  ;;  %v3472_v60 = vmul.f32 %v8503_v45, %v11064_v0  ;;  %v2460_v0 = vmul.f32 %v11072_v17, %v11006_v20  ;;  %v3141_v8 = vadd.f32 %v3133_v48, %v2972_v34  ;;  %v12446_v20 = vld [vmem:[#allocation26_spill] sm:$0xff]  ;;  %v12447_v17 = vld [vmem:[#allocation23_spill] sm:$0xff]  ;;  %v3273_v43 = vpop.f32.mrf.mxu0 }
 0x585   :  { %v3432_v55 = vpop.f32.mrf.mxu1  ;;  %v2629_v23 = vmul.f32 %v12447_v17, %v12446_v20  ;;  %v2974_v19 = vadd.f32 %v2966_v58, %v2805_v54  ;;  %v12460_v54 = vld [vmem:[#allocation20_spill] sm:$0xff] }
 0x586   :  { %v11131_v10 = vadd.f32 %v3472_v60, %v3311_v13  ;;  %v3471_v32 = vmul.f32 %v3432_v55, %v12445_v38  ;;  %v2468_v31 = vadd.f32 %v2460_v0, %v2299_v6  ;;  %v3310_v5 = vadd.f32 %v3302_v36, %v3141_v8  ;;  %v3327_v34 = vpop.permute.xlu1 %3326  ;;  %v12459_v8 = vld [vmem:[#allocation16_spill] sm:$0xff]  ;;  %v8495_v6 = vpop.f32.mrf.mxu0 }
 0x587   :  { %v8506_v18 = vpop.f32.mrf.mxu1  ;;  %v3143_v59 = vadd.f32 %v3135_v57, %v2974_v19  ;;  %v3304_v13 = vmul.f32 %v3273_v43, %v12456_v40  ;;  %v2969_v55 = vmul.f32 %v11094_v62, %v12458_v28  ;;  %v3138_v0 = vmul.f32 %v11111_v26, %v11092_v42 }
 0x588   :  { %3521 = vrot.lane.b32.xlu0 %v11131_v10, %s9008_s15  ;;  %3497 = vrot.lane.b32.xlu1 %v11131_v10, %s9007_s27  ;;  %v11158_v30 = vadd.f32 %v3471_v32, %v3310_v5  ;;  %v2637_v11 = vadd.f32 %v2629_v23, %v2468_v31  ;;  %v3474_v41 = vmul.f32 %v8506_v18, %v3325_v16  ;;  %v3283_v31 = vpop.f32.mrf.mxu0 }
 0x589   :  { %v3442_v45 = vpop.f32.mrf.mxu1  ;;  %v3312_v51 = vadd.f32 %v3304_v13, %v3143_v59  ;;  %v2977_v50 = vadd.f32 %v2969_v55, %v12459_v8  ;;  %v3307_v38 = vmul.f32 %v8495_v6, %v3160_v56  ;;  %v3306_v20 = vmul.f32 %v3283_v31, %v3158_v61 }
 0x58a   :  { %v2806_v53 = vadd.f32 %v2798_v24, %v2637_v11  ;;  %v3473_v60 = vmul.f32 %v3442_v45, %v12457_v22  ;;  %v3329_v62 = vpop.permute.xlu1 %3328 }
 0x58b   :  { %v8509_v9 = vpop.f32.mrf.mxu1  ;;  %v3146_v36 = vadd.f32 %v3138_v0, %v2977_v50  ;;  %v3314_v23 = vadd.f32 %v3306_v20, %v11120_v52  ;;  %v8498_v52 = vpop.f32.mrf.mxu0 }
 0x58c   :  { %3569 = vrot.lane.b32.xlu0 %v11131_v10, %s9010_s16  ;;  %3545 = vrot.lane.b32.xlu1 %v11131_v10, %s9009_s26  ;;  %v2975_v63 = vadd.f32 %v2967_v12, %v2806_v53  ;;  %v11205_v48 = vadd.f32 %v3473_v60, %v3312_v51  ;;  %v3476_v42 = vmul.f32 %v8509_v9, %v3329_v62 }
 0x58d   :  { %v3315_v26 = vadd.f32 %v3307_v38, %v3146_v36  ;;  %v3452_v5 = vpop.f32.mrf.mxu1  ;;  %v3293_v49 = vpop.f32.mrf.mxu0 }
 0x58e   :  { %v3144_v2 = vadd.f32 %v3136_v3, %v2975_v63  ;;  %v3475_v17 = vmul.f32 %v3452_v5, %v3327_v34  ;;  %v3164_v24 = vpop.permute.xlu1 %3163  ;;  %v3308_v16 = vmul.f32 %v3293_v49, %v3162_v21 }
 0x58f   :  { %v11228_v32 = vadd.f32 %v3476_v42, %v3315_v26  ;;  %v8512_v11 = vpop.f32.mrf.mxu1  ;;  %v3309_v33 = vmul.f32 %v8498_v52, %v3164_v24 }
 0x590   :  { %3617 = vrot.lane.b32.xlu0 %v11131_v10, %s9012_s18  ;;  %3593 = vrot.lane.b32.xlu1 %v11131_v10, %s9011_s17  ;;  %v3313_v7 = vadd.f32 %v3305_v44, %v3144_v2  ;;  %v11243_v35 = vadd.f32 %v3475_v17, %v3314_v23  ;;  %v3331_v2 = vpop.permute.xlu0 %3330  ;;  %v9015_v44 = vmov 1934713408  }
 0x591   :  { %v3317_v3 = vadd.f32 %v3309_v33, %v11126_v15  ;;  %v3462_v18 = vpop.f32.mrf.mxu1  ;;  %v3316_v15 = vadd.f32 %v3308_v16, %v11128_v37  ;;  %v9014_v37 = vmov 1983009808   ;;  %v3730_v29 = vunpack.c.l.s4 %v9015_v44 }
 0x592   :  { %v11185_v47 = vadd.f32 %v3474_v41, %v3313_v7  ;;  %v3333_v53 = vpop.permute.xlu1 %3332  ;;  %v3477_v39 = vmul.f32 %v3462_v18, %v3331_v2  ;;  %v3666_v1 = vunpack.c.l.s4 %v9014_v37 }
 0x593   :  { %v3478_v12 = vmul.f32 %v8512_v11, %v3333_v53  ;;  %v3731_v7 = vunpack.c.0.s8 %v3730_v29 }
 0x594   :  { %3641 = vrot.lane.b32.xlu1 %v11131_v10, %s9013_s0  ;;  %3495 = vrot.lane.b32.xlu0 %v11158_v30, %s9007_s27  ;;  %v11273_v27 = vadd.f32 %v3477_v39, %v3316_v15  ;;  %v3667_v46 = vunpack.c.0.s8 %v3666_v1 }
 0x595   :  { %v11262_v63 = vadd.f32 %v3478_v12, %v3317_v3  ;;  %v11301_v45 = vsub.s32 %v3731_v7, %v12460_v54 }
 0x596   :  { %v11296_v14 = vsub.s32 %v3667_v46, %v12460_v54 }
 0x598   :  { %3519 = vrot.lane.b32.xlu1 %v11158_v30, %s9008_s15  ;;  %3543 = vrot.lane.b32.xlu0 %v11158_v30, %s9009_s26 }
 0x59c   :  { %3567 = vrot.lane.b32.xlu1 %v11158_v30, %s9010_s16  ;;  %3591 = vrot.lane.b32.xlu0 %v11158_v30, %s9011_s17 }
 0x5a0   :  { %3615 = vrot.lane.b32.xlu1 %v11158_v30, %s9012_s18  ;;  %3639 = vrot.lane.b32.xlu0 %v11158_v30, %s9013_s0 }
 0x5a4   :  { %3525 = vrot.lane.b32.xlu0 %v11185_v47, %s9008_s15  ;;  %3501 = vrot.lane.b32.xlu1 %v11185_v47, %s9007_s27 }
 0x5a8   :  { %3573 = vrot.lane.b32.xlu0 %v11185_v47, %s9010_s16  ;;  %3549 = vrot.lane.b32.xlu1 %v11185_v47, %s9009_s26 }
 0x5ac   :  { %3621 = vrot.lane.b32.xlu0 %v11185_v47, %s9012_s18  ;;  %3597 = vrot.lane.b32.xlu1 %v11185_v47, %s9011_s17 }
 0x5b0   :  { %3645 = vrot.lane.b32.xlu1 %v11185_v47, %s9013_s0  ;;  %3499 = vrot.lane.b32.xlu0 %v11205_v48, %s9007_s27 }
 0x5b4   :  { %3523 = vrot.lane.b32.xlu1 %v11205_v48, %s9008_s15  ;;  %3547 = vrot.lane.b32.xlu0 %v11205_v48, %s9009_s26 }
 0x5b8   :  { %3571 = vrot.lane.b32.xlu1 %v11205_v48, %s9010_s16  ;;  %3595 = vrot.lane.b32.xlu0 %v11205_v48, %s9011_s17 }
 0x5bc   :  { %3619 = vrot.lane.b32.xlu1 %v11205_v48, %s9012_s18  ;;  %3643 = vrot.lane.b32.xlu0 %v11205_v48, %s9013_s0 }
 0x5c0   :  { %3529 = vrot.lane.b32.xlu0 %v11228_v32, %s9008_s15  ;;  %3505 = vrot.lane.b32.xlu1 %v11228_v32, %s9007_s27 }
 0x5c4   :  { %3577 = vrot.lane.b32.xlu0 %v11228_v32, %s9010_s16  ;;  %3553 = vrot.lane.b32.xlu1 %v11228_v32, %s9009_s26 }
 0x5c8   :  { %3625 = vrot.lane.b32.xlu0 %v11228_v32, %s9012_s18  ;;  %3601 = vrot.lane.b32.xlu1 %v11228_v32, %s9011_s17 }
 0x5cc   :  { %3649 = vrot.lane.b32.xlu1 %v11228_v32, %s9013_s0  ;;  %3503 = vrot.lane.b32.xlu0 %v11243_v35, %s9007_s27 }
 0x5d0   :  { %3527 = vrot.lane.b32.xlu1 %v11243_v35, %s9008_s15  ;;  %3551 = vrot.lane.b32.xlu0 %v11243_v35, %s9009_s26 }
 0x5d4   :  { %3575 = vrot.lane.b32.xlu1 %v11243_v35, %s9010_s16  ;;  %3599 = vrot.lane.b32.xlu0 %v11243_v35, %s9011_s17 }
 0x5d8   :  { %3623 = vrot.lane.b32.xlu1 %v11243_v35, %s9012_s18  ;;  %3647 = vrot.lane.b32.xlu0 %v11243_v35, %s9013_s0 }
 0x5dc   :  { %3533 = vrot.lane.b32.xlu0 %v11262_v63, %s9008_s15  ;;  %3509 = vrot.lane.b32.xlu1 %v11262_v63, %s9007_s27 }
 0x5e0   :  { %3581 = vrot.lane.b32.xlu0 %v11262_v63, %s9010_s16  ;;  %3557 = vrot.lane.b32.xlu1 %v11262_v63, %s9009_s26 }
 0x5e4   :  { %3605 = vrot.lane.b32.xlu1 %v11262_v63, %s9011_s17  ;;  %3507 = vrot.lane.b32.xlu0 %v11273_v27, %s9007_s27 }
 0x5e8   :  { %3531 = vrot.lane.b32.xlu1 %v11273_v27, %s9008_s15  ;;  %3555 = vrot.lane.b32.xlu0 %v11273_v27, %s9009_s26 }
 0x5ec   :  { %3579 = vrot.lane.b32.xlu1 %v11273_v27, %s9010_s16  ;;  %3603 = vrot.lane.b32.xlu0 %v11273_v27, %s9011_s17 }
 0x5f0   :  { %3627 = vrot.lane.b32.xlu1 %v11273_v27, %s9012_s18  ;;  %3651 = vrot.lane.b32.xlu0 %v11273_v27, %s9013_s0 }
 0x5f4   :  { %3653 = vrot.lane.b32.xlu1 %v11262_v63, %s9013_s0  ;;  %3629 = vrot.lane.b32.xlu0 %v11262_v63, %s9012_s18 }
 0x5fa   :  { %v3522_v41 = vpop.permute.xlu0 %3521  ;;  %v3498_v25 = vpop.permute.xlu1 %3497 }
 0x5fb   :  { %v3799_v58 = vcombine.low %v11131_v10, %v3522_v41  ;;  %v3800_v4 = vcombine.high %v11131_v10, %v3522_v41 }
 0x5fd   :  { %v3807_v59 = vrot.slane %v3799_v58, %v11296_v14  ;;  %v3814_v40 = vrot.slane %v3800_v4, %v11296_v14 }
 0x5fe   :  { %v3570_v57 = vpop.permute.xlu0 %3569  ;;  %v3546_v61 = vpop.permute.xlu1 %3545 }
 0x5ff   :  { %v3815_v19 = vcombine.low %v3498_v25, %v3546_v61  ;;  %v3816_v43 = vcombine.high %v3498_v25, %v3546_v61 }
 0x601   :  { %v3823_v13 = vrot.slane %v3815_v19, %v11296_v14  ;;  %v3830_v22 = vrot.slane %v3816_v43, %v11296_v14 }
 0x602   :  { %v3618_v60 = vpop.permute.xlu0 %3617  ;;  %v3594_v51 = vpop.permute.xlu1 %3593 }
 0x603   :  { %v3863_v56 = vcombine.low %v3807_v59, %v3823_v13  ;;  %v3864_v34 = vcombine.high %v3807_v59, %v3823_v13  ;;  %v3879_v10 = vcombine.low %v3814_v40, %v3830_v22  ;;  %v3880_v28 = vcombine.high %v3814_v40, %v3830_v22 }
 0x604   :  { %v3831_v6 = vcombine.low %v3570_v57, %v3618_v60  ;;  %v3832_v9 = vcombine.high %v3570_v57, %v3618_v60 }
 0x605   :  { %v3871_v55 = vrot.slane %v3863_v56, %v11301_v45  ;;  %v3878_v0 = vrot.slane %v3864_v34, %v11301_v45  ;;  %v3887_v8 = vrot.slane %v3879_v10, %v11301_v45  ;;  %v3894_v50 = vrot.slane %v3880_v28, %v11301_v45 }
 0x606   :  { %v3642_v36 = vpop.permute.xlu1 %3641  ;;  %v3496_v62 = vpop.permute.xlu0 %3495  ;;  %v3839_v11 = vrot.slane %v3831_v6, %v11296_v14  ;;  %v3846_v53 = vrot.slane %v3832_v9, %v11296_v14 }
 0x607   :  { %v7437_v38 = vcombine.low %v3871_v55, %v3878_v0  ;;  %v7439_v42 = vcombine.high %v3871_v55, %v3878_v0  ;;  %v7441_v26 = vcombine.low %v3887_v8, %v3894_v50  ;;  %v7443_v31 = vcombine.high %v3887_v8, %v3894_v50 }
 0x608   :  { %v3847_v5 = vcombine.low %v3594_v51, %v3642_v36  ;;  %v3848_v20 = vcombine.high %v3594_v51, %v3642_v36 }
 0x609   :  { %v4895_v17 = vrot.slane %v7437_v38, %v11296_v14  ;;  %v4911_v23 = vrot.slane %v7439_v42, %v11296_v14  ;;  %v4927_v24 = vrot.slane %v7441_v26, %v11296_v14  ;;  %v4943_v52 = vrot.slane %v7443_v31, %v11296_v14 }
 0x60a   :  { %v3855_v33 = vrot.slane %v3847_v5, %v11296_v14  ;;  %v3862_v12 = vrot.slane %v3848_v20, %v11296_v14  ;;  %v3520_v21 = vpop.permute.xlu1 %3519  ;;  %v3544_v3 = vpop.permute.xlu0 %3543 }
 0x60b   :  { %v4951_v39 = vcombine.low %v4895_v17, %v4911_v23  ;;  %v4952_v15 = vcombine.high %v4895_v17, %v4911_v23  ;;  %v4983_v37 = vcombine.low %v4927_v24, %v4943_v52  ;;  %v4984_v1 = vcombine.high %v4927_v24, %v4943_v52 }
 0x60c   :  { %v3895_v49 = vcombine.low %v3839_v11, %v3855_v33  ;;  %v3896_v18 = vcombine.high %v3839_v11, %v3855_v33  ;;  %v3911_v2 = vcombine.low %v3846_v53, %v3862_v12  ;;  %v3912_v16 = vcombine.high %v3846_v53, %v3862_v12 }
 0x60d   :  { %v3663_v58 = vcombine.low %v11158_v30, %v3520_v21  ;;  %v3664_v4 = vcombine.high %v11158_v30, %v3520_v21  ;;  %v3679_v57 = vcombine.low %v3496_v62, %v3544_v3  ;;  %v3680_v61 = vcombine.high %v3496_v62, %v3544_v3 }
 0x60e   :  { %v3903_v44 = vrot.slane %v3895_v49, %v11301_v45  ;;  %v3910_v29 = vrot.slane %v3896_v18, %v11301_v45  ;;  %v3919_v46 = vrot.slane %v3911_v2, %v11301_v45  ;;  %v3926_v41 = vrot.slane %v3912_v16, %v11301_v45  ;;  %v3568_v25 = vpop.permute.xlu1 %3567  ;;  %v3592_v7 = vpop.permute.xlu0 %3591 }
 0x60f   :  { %v3671_v13 = vrot.slane %v3663_v58, %v11296_v14  ;;  %v3678_v22 = vrot.slane %v3664_v4, %v11296_v14  ;;  %v3687_v60 = vrot.slane %v3679_v57, %v11296_v14  ;;  %v3694_v51 = vrot.slane %v3680_v61, %v11296_v14 }
 0x610   :  { %v7438_v19 = vcombine.low %v3903_v44, %v3910_v29  ;;  %v7440_v43 = vcombine.high %v3903_v44, %v3910_v29  ;;  %v7442_v59 = vcombine.low %v3919_v46, %v3926_v41  ;;  %v7444_v40 = vcombine.high %v3919_v46, %v3926_v41 }
 0x611   :  { %v3727_v0 = vcombine.low %v3671_v13, %v3687_v60  ;;  %v3728_v8 = vcombine.high %v3671_v13, %v3687_v60  ;;  %v3743_v50 = vcombine.low %v3678_v22, %v3694_v51  ;;  %v3744_v6 = vcombine.high %v3678_v22, %v3694_v51 }
 0x612   :  { %v4902_v56 = vrot.slane %v7438_v19, %v11296_v14  ;;  %v4918_v34 = vrot.slane %v7440_v43, %v11296_v14  ;;  %v4934_v30 = vrot.slane %v7442_v59, %v11296_v14  ;;  %v4950_v10 = vrot.slane %v7444_v40, %v11296_v14  ;;  %v3616_v28 = vpop.permute.xlu1 %3615  ;;  %v3640_v55 = vpop.permute.xlu0 %3639 }
 0x613   :  { %v11334_v9 = vrot.slane %v4951_v39, %v11301_v45  ;;  %v11337_v36 = vrot.slane %v4952_v15, %v11301_v45  ;;  %v11340_v62 = vrot.slane %v4983_v37, %v11301_v45  ;;  %v11343_v38 = vrot.slane %v4984_v1, %v11301_v45 }
 0x614   :  { %v3735_v42 = vrot.slane %v3727_v0, %v11301_v45  ;;  %v3742_v26 = vrot.slane %v3728_v8, %v11301_v45  ;;  %v3751_v31 = vrot.slane %v3743_v50, %v11301_v45  ;;  %v3758_v5 = vrot.slane %v3744_v6, %v11301_v45 }
 0x615   :  { %v4967_v20 = vcombine.low %v4902_v56, %v4918_v34  ;;  %v4968_v17 = vcombine.high %v4902_v56, %v4918_v34  ;;  %v4999_v23 = vcombine.low %v4934_v30, %v4950_v10  ;;  %v5000_v24 = vcombine.high %v4934_v30, %v4950_v10 }
 0x616   :  { %v3526_v52 = vpop.permute.xlu0 %3525  ;;  %v3502_v11 = vpop.permute.xlu1 %3501  ;;  %v7429_v53 = vcombine.low %v3735_v42, %v3742_v26  ;;  %v7431_v33 = vcombine.high %v3735_v42, %v3742_v26  ;;  %v7433_v12 = vcombine.low %v3751_v31, %v3758_v5  ;;  %v7435_v21 = vcombine.high %v3751_v31, %v3758_v5 }
 0x617   :  { %v3695_v3 = vcombine.low %v3568_v25, %v3616_v28  ;;  %v3696_v49 = vcombine.high %v3568_v25, %v3616_v28  ;;  %v3711_v18 = vcombine.low %v3592_v7, %v3640_v55  ;;  %v3712_v2 = vcombine.high %v3592_v7, %v3640_v55 }
 0x618   :  { %v4759_v16 = vrot.slane %v7429_v53, %v11296_v14  ;;  %v4775_v39 = vrot.slane %v7431_v33, %v11296_v14  ;;  %v4791_v15 = vrot.slane %v7433_v12, %v11296_v14  ;;  %v4807_v37 = vrot.slane %v7435_v21, %v11296_v14 }
 0x619   :  { %v3703_v1 = vrot.slane %v3695_v3, %v11296_v14  ;;  %v3710_v44 = vrot.slane %v3696_v49, %v11296_v14  ;;  %v3719_v29 = vrot.slane %v3711_v18, %v11296_v14  ;;  %v3726_v46 = vrot.slane %v3712_v2, %v11296_v14 }
 0x61a   :  { %v11357_v41 = vpop.permute.xlu0 %3573  ;;  %v3550_v25 = vpop.permute.xlu1 %3549  ;;  %v11360_v7 = vrot.slane %v4967_v20, %v11301_v45  ;;  %v11363_v58 = vrot.slane %v4968_v17, %v11301_v45  ;;  %v11366_v4 = vrot.slane %v4999_v23, %v11301_v45  ;;  %v11369_v57 = vrot.slane %v5000_v24, %v11301_v45 }
 0x61b   :  { %v3759_v61 = vcombine.low %v3703_v1, %v3719_v29  ;;  %v3760_v19 = vcombine.high %v3703_v1, %v3719_v29  ;;  %v3775_v43 = vcombine.low %v3710_v44, %v3726_v46  ;;  %v3776_v59 = vcombine.high %v3710_v44, %v3726_v46 }
 0x61c   :  { %v4815_v40 = vcombine.low %v4759_v16, %v4775_v39  ;;  %v4816_v13 = vcombine.high %v4759_v16, %v4775_v39  ;;  %v4847_v22 = vcombine.low %v4791_v15, %v4807_v37  ;;  %v4848_v60 = vcombine.high %v4791_v15, %v4807_v37 }
 0x61d   :  { %v3767_v51 = vrot.slane %v3759_v61, %v11301_v45  ;;  %v3774_v56 = vrot.slane %v3760_v19, %v11301_v45  ;;  %v3783_v34 = vrot.slane %v3775_v43, %v11301_v45  ;;  %v3790_v30 = vrot.slane %v3776_v59, %v11301_v45 }
 0x61e   :  { %v3622_v10 = vpop.permute.xlu0 %3621  ;;  %v3598_v28 = vpop.permute.xlu1 %3597  ;;  %v4071_v55 = vcombine.low %v11185_v47, %v3526_v52  ;;  %v4072_v0 = vcombine.high %v11185_v47, %v3526_v52  ;;  %v4087_v8 = vcombine.low %v3502_v11, %v3550_v25  ;;  %v4088_v50 = vcombine.high %v3502_v11, %v3550_v25 }
 0x61f   :  { %v7430_v6 = vcombine.low %v3767_v51, %v3774_v56  ;;  %v7432_v42 = vcombine.high %v3767_v51, %v3774_v56  ;;  %v7434_v26 = vcombine.low %v3783_v34, %v3790_v30  ;;  %v7436_v31 = vcombine.high %v3783_v34, %v3790_v30 }
 0x620   :  { %v4079_v5 = vrot.slane %v4071_v55, %v11296_v14  ;;  %v4086_v20 = vrot.slane %v4072_v0, %v11296_v14  ;;  %v4095_v17 = vrot.slane %v4087_v8, %v11296_v14  ;;  %v4102_v23 = vrot.slane %v4088_v50, %v11296_v14 }
 0x621   :  { %v4766_v24 = vrot.slane %v7430_v6, %v11296_v14  ;;  %v4782_v53 = vrot.slane %v7432_v42, %v11296_v14  ;;  %v4798_v47 = vrot.slane %v7434_v26, %v11296_v14  ;;  %v4814_v52 = vrot.slane %v7436_v31, %v11296_v14 }
 0x622   :  { %v4135_v11 = vcombine.low %v4079_v5, %v4095_v17  ;;  %v4136_v33 = vcombine.high %v4079_v5, %v4095_v17  ;;  %v4151_v12 = vcombine.low %v4086_v20, %v4102_v23  ;;  %v4152_v21 = vcombine.high %v4086_v20, %v4102_v23  ;;  %v3646_v3 = vpop.permute.xlu1 %3645  ;;  %v3500_v49 = vpop.permute.xlu0 %3499 }
 0x623   :  { %v11386_v18 = vrot.slane %v4815_v40, %v11301_v45  ;;  %v11389_v2 = vrot.slane %v4816_v13, %v11301_v45  ;;  %v11392_v16 = vrot.slane %v4847_v22, %v11301_v45  ;;  %v11395_v39 = vrot.slane %v4848_v60, %v11301_v45 }
 0x624   :  { %v4143_v15 = vrot.slane %v4135_v11, %v11301_v45  ;;  %v4150_v37 = vrot.slane %v4136_v33, %v11301_v45  ;;  %v4159_v1 = vrot.slane %v4151_v12, %v11301_v45  ;;  %v4166_v44 = vrot.slane %v4152_v21, %v11301_v45 }
 0x625   :  { %v4831_v29 = vcombine.low %v4766_v24, %v4782_v53  ;;  %v4832_v46 = vcombine.high %v4766_v24, %v4782_v53  ;;  %v4863_v25 = vcombine.low %v4798_v47, %v4814_v52  ;;  %v4864_v61 = vcombine.high %v4798_v47, %v4814_v52 }
 0x626   :  { %v7453_v19 = vcombine.low %v4143_v15, %v4150_v37  ;;  %v7455_v43 = vcombine.high %v4143_v15, %v4150_v37  ;;  %v7457_v59 = vcombine.low %v4159_v1, %v4166_v44  ;;  %v7459_v40 = vcombine.high %v4159_v1, %v4166_v44  ;;  %v3524_v0 = vpop.permute.xlu1 %3523  ;;  %v3548_v8 = vpop.permute.xlu0 %3547 }
 0x627   :  { %v4103_v13 = vcombine.low %v11357_v41, %v3622_v10  ;;  %v4104_v22 = vcombine.high %v11357_v41, %v3622_v10  ;;  %v4119_v60 = vcombine.low %v3598_v28, %v3646_v3  ;;  %v4120_v51 = vcombine.high %v3598_v28, %v3646_v3 }
 0x628   :  { %v5167_v56 = vrot.slane %v7453_v19, %v11296_v14  ;;  %v5183_v34 = vrot.slane %v7455_v43, %v11296_v14  ;;  %v5199_v30 = vrot.slane %v7457_v59, %v11296_v14  ;;  %v5215_v55 = vrot.slane %v7459_v40, %v11296_v14 }
 0x629   :  { %v4111_v50 = vrot.slane %v4103_v13, %v11296_v14  ;;  %v4118_v6 = vrot.slane %v4104_v22, %v11296_v14  ;;  %v4127_v42 = vrot.slane %v4119_v60, %v11296_v14  ;;  %v4134_v41 = vrot.slane %v4120_v51, %v11296_v14 }
 0x62a   :  { %v11412_v10 = vrot.slane %v4831_v29, %v11301_v45  ;;  %v11415_v28 = vrot.slane %v4832_v46, %v11301_v45  ;;  %v11418_v26 = vrot.slane %v4863_v25, %v11301_v45  ;;  %v11421_v31 = vrot.slane %v4864_v61, %v11301_v45  ;;  %v3572_v44 = vpop.permute.xlu1 %3571  ;;  %v3596_v29 = vpop.permute.xlu0 %3595 }
 0x62b   :  { %v4167_v5 = vcombine.low %v4111_v50, %v4127_v42  ;;  %v4168_v20 = vcombine.high %v4111_v50, %v4127_v42  ;;  %v4183_v17 = vcombine.low %v4118_v6, %v4134_v41  ;;  %v4184_v23 = vcombine.high %v4118_v6, %v4134_v41 }
 0x62c   :  { %v5223_v24 = vcombine.low %v5167_v56, %v5183_v34  ;;  %v5224_v53 = vcombine.high %v5167_v56, %v5183_v34  ;;  %v5255_v47 = vcombine.low %v5199_v30, %v5215_v55  ;;  %v5256_v52 = vcombine.high %v5199_v30, %v5215_v55 }
 0x62d   :  { %v4175_v11 = vrot.slane %v4167_v5, %v11301_v45  ;;  %v4182_v33 = vrot.slane %v4168_v20, %v11301_v45  ;;  %v4191_v12 = vrot.slane %v4183_v17, %v11301_v45  ;;  %v4198_v21 = vrot.slane %v4184_v23, %v11301_v45 }
 0x62e   :  { %v3935_v3 = vcombine.low %v11205_v48, %v3524_v0  ;;  %v3936_v15 = vcombine.high %v11205_v48, %v3524_v0  ;;  %v3951_v37 = vcombine.low %v3500_v49, %v3548_v8  ;;  %v3952_v1 = vcombine.high %v3500_v49, %v3548_v8  ;;  %v3620_v20 = vpop.permute.xlu1 %3619  ;;  %v3644_v17 = vpop.permute.xlu0 %3643 }
 0x62f   :  { %v7454_v46 = vcombine.low %v4175_v11, %v4182_v33  ;;  %v7456_v25 = vcombine.high %v4175_v11, %v4182_v33  ;;  %v7458_v61 = vcombine.low %v4191_v12, %v4198_v21  ;;  %v7460_v19 = vcombine.high %v4191_v12, %v4198_v21 }
 0x630   :  { %v3943_v43 = vrot.slane %v3935_v3, %v11296_v14  ;;  %v3950_v59 = vrot.slane %v3936_v15, %v11296_v14  ;;  %v3959_v40 = vrot.slane %v3951_v37, %v11296_v14  ;;  %v3966_v13 = vrot.slane %v3952_v1, %v11296_v14 }
 0x631   :  { %v5174_v22 = vrot.slane %v7454_v46, %v11296_v14  ;;  %v5190_v48 = vrot.slane %v7456_v25, %v11296_v14  ;;  %v5206_v49 = vrot.slane %v7458_v61, %v11296_v14  ;;  %v5222_v60 = vrot.slane %v7460_v19, %v11296_v14 }
 0x632   :  { %v3999_v51 = vcombine.low %v3943_v43, %v3959_v40  ;;  %v4000_v56 = vcombine.high %v3943_v43, %v3959_v40  ;;  %v4015_v34 = vcombine.low %v3950_v59, %v3966_v13  ;;  %v4016_v30 = vcombine.high %v3950_v59, %v3966_v13 }
 0x633   :  { %v11438_v55 = vrot.slane %v5223_v24, %v11301_v45  ;;  %v11441_v0 = vrot.slane %v5224_v53, %v11301_v45  ;;  %v11444_v8 = vrot.slane %v5255_v47, %v11301_v45  ;;  %v11447_v50 = vrot.slane %v5256_v52, %v11301_v45 }
 0x634   :  { %v4007_v6 = vrot.slane %v3999_v51, %v11301_v45  ;;  %v4014_v42 = vrot.slane %v4000_v56, %v11301_v45  ;;  %v4023_v41 = vrot.slane %v4015_v34, %v11301_v45  ;;  %v4030_v5 = vrot.slane %v4016_v30, %v11301_v45 }
 0x635   :  { %v5239_v23 = vcombine.low %v5174_v22, %v5190_v48  ;;  %v5240_v24 = vcombine.high %v5174_v22, %v5190_v48  ;;  %v5271_v53 = vcombine.low %v5206_v49, %v5222_v60  ;;  %v5272_v11 = vcombine.high %v5206_v49, %v5222_v60 }
 0x636   :  { %v7445_v33 = vcombine.low %v4007_v6, %v4014_v42  ;;  %v7447_v47 = vcombine.high %v4007_v6, %v4014_v42  ;;  %v7449_v12 = vcombine.low %v4023_v41, %v4030_v5  ;;  %v7451_v21 = vcombine.high %v4023_v41, %v4030_v5 }
 0x637   :  { %v3967_v52 = vcombine.low %v3572_v44, %v3620_v20  ;;  %v3968_v3 = vcombine.high %v3572_v44, %v3620_v20  ;;  %v3983_v15 = vcombine.low %v3596_v29, %v3644_v17  ;;  %v3984_v37 = vcombine.high %v3596_v29, %v3644_v17 }
 0x638   :  { %v5031_v1 = vrot.slane %v7445_v33, %v11296_v14  ;;  %v5047_v46 = vrot.slane %v7447_v47, %v11296_v14  ;;  %v5063_v25 = vrot.slane %v7449_v12, %v11296_v14  ;;  %v5079_v61 = vrot.slane %v7451_v21, %v11296_v14 }
 0x639   :  { %v3975_v19 = vrot.slane %v3967_v52, %v11296_v14  ;;  %v3982_v43 = vrot.slane %v3968_v3, %v11296_v14  ;;  %v3991_v59 = vrot.slane %v3983_v15, %v11296_v14  ;;  %v3998_v40 = vrot.slane %v3984_v37, %v11296_v14  ;;  %v11489_v37 = vpop.permute.xlu1 %3505 }
 0x63a   :  { %v11462_v44 = vrot.slane %v5239_v23, %v11301_v45  ;;  %v11465_v29 = vrot.slane %v5240_v24, %v11301_v45  ;;  %v11468_v13 = vrot.slane %v5271_v53, %v11301_v45  ;;  %v11471_v22 = vrot.slane %v5272_v11, %v11301_v45 }
 0x63b   :  { %v4031_v48 = vcombine.low %v3975_v19, %v3991_v59  ;;  %v4032_v49 = vcombine.high %v3975_v19, %v3991_v59  ;;  %v4047_v60 = vcombine.low %v3982_v43, %v3998_v40  ;;  %v4048_v51 = vcombine.high %v3982_v43, %v3998_v40 }
 0x63c   :  { %v5087_v56 = vcombine.low %v5031_v1, %v5047_v46  ;;  %v5088_v34 = vcombine.high %v5031_v1, %v5047_v46  ;;  %v5119_v30 = vcombine.low %v5063_v25, %v5079_v61  ;;  %v5120_v6 = vcombine.high %v5063_v25, %v5079_v61 }
 0x63d   :  { %v4039_v42 = vrot.slane %v4031_v48, %v11301_v45  ;;  %v4046_v41 = vrot.slane %v4032_v49, %v11301_v45  ;;  %v4055_v5 = vrot.slane %v4047_v60, %v11301_v45  ;;  %v4062_v20 = vrot.slane %v4048_v51, %v11301_v45  ;;  %v11526_v60 = vpop.permute.xlu0 %3529 }
 0x63e   :  { %v7493_v17 = vcombine.low %v11386_v18, %v11389_v2  ;;  %v7495_v23 = vcombine.high %v11386_v18, %v11389_v2  ;;  %v7497_v24 = vcombine.low %v11412_v10, %v11415_v28  ;;  %v7499_v53 = vcombine.high %v11412_v10, %v11415_v28 }
 0x63f   :  { %v7446_v11 = vcombine.low %v4039_v42, %v4046_v41  ;;  %v7448_v33 = vcombine.high %v4039_v42, %v4046_v41  ;;  %v7450_v47 = vcombine.low %v4055_v5, %v4062_v20  ;;  %v7452_v12 = vcombine.high %v4055_v5, %v4062_v20  ;;  %v3554_v20 = vpop.permute.xlu1 %3553 }
 0x640   :  { %v5847_v21 = vrot.slane %v7493_v17, %v11296_v14  ;;  %v5863_v52 = vrot.slane %v7495_v23, %v11296_v14  ;;  %v5879_v3 = vrot.slane %v7497_v24, %v11296_v14  ;;  %v5895_v15 = vrot.slane %v7499_v53, %v11296_v14 }
 0x641   :  { %v11492_v18 = vrot.slane %v7446_v11, %v11296_v14  ;;  %v11495_v2 = vrot.slane %v7448_v33, %v11296_v14  ;;  %v11498_v10 = vrot.slane %v7450_v47, %v11296_v14  ;;  %v11501_v28 = vrot.slane %v7452_v12, %v11296_v14 }
 0x642   :  { %v5904_v1 = vcombine.high %v5847_v21, %v5863_v52  ;;  %v5936_v46 = vcombine.high %v5879_v3, %v5895_v15  ;;  %v7501_v25 = vcombine.low %v11334_v9, %v11337_v36  ;;  %v7503_v61 = vcombine.high %v11334_v9, %v11337_v36 }
 0x643   :  { %v11508_v19 = vrot.slane %v5087_v56, %v11301_v45  ;;  %v11511_v43 = vrot.slane %v5088_v34, %v11301_v45  ;;  %v11514_v59 = vrot.slane %v5119_v30, %v11301_v45  ;;  %v5103_v40 = vcombine.low %v11492_v18, %v11495_v2 }
 0x644   :  { %v11519_v48 = vrot.slane %v5120_v6, %v11301_v45  ;;  %v11522_v49 = vrot.slane %v5936_v46, %v11301_v45  ;;  %v5983_v9 = vrot.slane %v7501_v25, %v11296_v14  ;;  %v5999_v36 = vrot.slane %v7503_v61, %v11296_v14 }
 0x645   :  { %v11535_v30 = vrot.slane %v5904_v1, %v11301_v45  ;;  %v11538_v6 = vrot.slane %v5103_v40, %v11301_v45  ;;  %v7505_v42 = vcombine.low %v11360_v7, %v11363_v58  ;;  %v7507_v41 = vcombine.high %v11360_v7, %v11363_v58 }
 0x646   :  { %v6040_v5 = vcombine.high %v5983_v9, %v5999_v36  ;;  %v5903_v17 = vcombine.low %v5847_v21, %v5863_v52  ;;  %v5935_v23 = vcombine.low %v5879_v3, %v5895_v15  ;;  %v6039_v24 = vcombine.low %v5983_v9, %v5999_v36 }
 0x647   :  { %v4343_v53 = vcombine.low %v11228_v32, %v11526_v60  ;;  %v5969_v11 = vcombine.low %v11535_v30, %v11522_v49  ;;  %v6015_v33 = vrot.slane %v7505_v42, %v11296_v14  ;;  %v6031_v47 = vrot.slane %v7507_v41, %v11296_v14 }
 0x648   :  { %v6054_v12 = vrot.slane %v6040_v5, %v11301_v45  ;;  %v11552_v1 = vrot.slane %v5903_v17, %v11301_v45  ;;  %v11555_v7 = vrot.slane %v5935_v23, %v11301_v45  ;;  %v11558_v58 = vrot.slane %v6039_v24, %v11301_v45  ;;  %v11582_v5 = vpop.permute.xlu1 %3601 }
 0x649   :  { %v4344_v21 = vcombine.high %v11228_v32, %v11526_v60  ;;  %v6072_v52 = vcombine.high %v6015_v33, %v6031_v47  ;;  %v6071_v3 = vcombine.low %v6015_v33, %v6031_v47  ;;  %v4351_v15 = vrot.slane %v4343_v53, %v11296_v14  ;;  %v11573_v32 = vpop.permute.xlu0 %3577 }
 0x64a   :  { %v7494_v46 = vcombine.low %v11392_v16, %v11395_v39  ;;  %v5968_v25 = vcombine.high %v11552_v1, %v11555_v7  ;;  %v7496_v61 = vcombine.high %v11392_v16, %v11395_v39  ;;  %v7498_v40 = vcombine.low %v11418_v26, %v11421_v31 }
 0x64b   :  { %v7500_v9 = vcombine.high %v11418_v26, %v11421_v31  ;;  %v6086_v36 = vrot.slane %v6072_v52, %v11301_v45  ;;  %v11577_v60 = vrot.slane %v6071_v3, %v11301_v45  ;;  %v7502_v41 = vcombine.low %v11340_v62, %v11343_v38 }
 0x64c   :  { %v5854_v42 = vrot.slane %v7494_v46, %v11296_v14  ;;  %v5870_v16 = vrot.slane %v7496_v61, %v11296_v14  ;;  %v5886_v39 = vrot.slane %v7498_v40, %v11296_v14  ;;  %v7504_v31 = vcombine.high %v11340_v62, %v11343_v38 }
 0x64d   :  { %v5902_v26 = vrot.slane %v7500_v9, %v11296_v14  ;;  %v6105_v17 = vcombine.low %v6054_v12, %v6086_v36  ;;  %v6104_v23 = vcombine.high %v11558_v58, %v11577_v60  ;;  %v11592_v24 = vrot.slane %v7502_v41, %v11296_v14  ;;  %v3626_v56 = vpop.permute.xlu0 %3625 }
 0x64e   :  { %v7506_v53 = vcombine.low %v11366_v4, %v11369_v57  ;;  %v5919_v33 = vcombine.low %v5854_v42, %v5870_v16  ;;  %v6006_v52 = vrot.slane %v7504_v31, %v11296_v14  ;;  %v7508_v3 = vcombine.high %v11366_v4, %v11369_v57 }
 0x64f   :  { %v5951_v47 = vcombine.low %v5886_v39, %v5902_v26  ;;  %v8582_v46 = vpack.i.bf16 %v6105_v17, %v5969_v11  ;;  %v8577_v61 = vpack.i.bf16 %v6104_v23, %v5968_v25  ;;  %v5970_v38 = vcombine.high %v11535_v30, %v11522_v49  ;;  %v3650_v25 = vpop.permute.xlu1 %3649 }
 0x650   :  { %v6022_v62 = vrot.slane %v7506_v53, %v11296_v14  ;;  %v5927_v40 = vrot.slane %v5919_v33, %v11301_v45  ;;  %v6038_v41 = vrot.slane %v7508_v3, %v11296_v14  ;;  %v6055_v34 = vcombine.low %v11592_v24, %v6006_v52 }
 0x651   :  { %v5959_v9 = vrot.slane %v5951_v47, %v11301_v45  ;;  %8583 = vrot.lane.b32.xlu1 %v8582_v46, %s9012_s18  ;;  %8578 = vrot.lane.b32.xlu0 %v8577_v61, %s9013_s0  ;;  %v6106_v4 = vcombine.high %v6054_v12, %v6086_v36  ;;  %v4359_v57 = vcombine.low %v11489_v37, %v3554_v20 }
 0x652   :  { %v4360_v11 = vcombine.high %v11489_v37, %v3554_v20  ;;  %v4358_v49 = vrot.slane %v4344_v21, %v11296_v14  ;;  %v6063_v31 = vrot.slane %v6055_v34, %v11301_v45  ;;  %v6087_v17 = vcombine.low %v6022_v62, %v6038_v41 }
 0x653   :  { %v5971_v30 = vcombine.low %v5927_v40, %v5959_v9  ;;  %v8587_v23 = vpack.i.bf16 %v6106_v4, %v5970_v38  ;;  %v4367_v53 = vrot.slane %v4359_v57, %v11296_v14  ;;  %v4375_v47 = vcombine.low %v11573_v32, %v3626_v56 }
 0x654   :  { %v4374_v33 = vrot.slane %v4360_v11, %v11296_v14  ;;  %v6095_v12 = vrot.slane %v6087_v17, %v11301_v45  ;;  %v5972_v36 = vcombine.high %v5927_v40, %v5959_v9  ;;  %v5920_v3 = vcombine.high %v5854_v42, %v5870_v16  ;;  %v11623_v16 = vpop.permute.xlu0 %3503 }
 0x655   :  { %v5952_v46 = vcombine.high %v5886_v39, %v5902_v26  ;;  %8588 = vrot.lane.b32.xlu0 %v8587_v23, %s9011_s17  ;;  %v4407_v37 = vcombine.low %v4351_v15, %v4367_v53  ;;  %v4408_v20 = vcombine.high %v4351_v15, %v4367_v53  ;;  %v4376_v38 = vcombine.high %v11573_v32, %v3626_v56  ;;  %v3528_v39 = vpop.permute.xlu1 %3527 }
 0x656   :  { %v4423_v21 = vcombine.low %v4358_v49, %v4374_v33  ;;  %v4424_v61 = vcombine.high %v4358_v49, %v4374_v33  ;;  %v6107_v34 = vcombine.low %v6063_v31, %v6095_v12  ;;  %v6108_v51 = vcombine.high %v6063_v31, %v6095_v12 }
 0x657   :  { %v4383_v4 = vrot.slane %v4375_v47, %v11296_v14  ;;  %v4415_v57 = vrot.slane %v4407_v37, %v11301_v45  ;;  %v4422_v11 = vrot.slane %v4408_v20, %v11301_v45  ;;  %v5934_v9 = vrot.slane %v5920_v3, %v11301_v45 }
 0x658   :  { %v4431_v40 = vrot.slane %v4423_v21, %v11301_v45  ;;  %v4438_v42 = vrot.slane %v4424_v61, %v11301_v45  ;;  %v8592_v15 = vpack.i.bf16 %v6107_v34, %v5971_v30  ;;  %v8597_v26 = vpack.i.bf16 %v6108_v51, %v5972_v36 }
 0x659   :  { %v5966_v49 = vrot.slane %v5952_v46, %v11301_v45  ;;  %v7469_v56 = vcombine.low %v4415_v57, %v4422_v11  ;;  %v7471_v32 = vcombine.high %v4415_v57, %v4422_v11  ;;  %v6056_v53 = vcombine.high %v11592_v24, %v6006_v52  ;;  %v11657_v34 = vpop.permute.xlu1 %3575 }
 0x65a   :  { %v7473_v31 = vcombine.low %v4431_v40, %v4438_v42  ;;  %v7475_v17 = vcombine.high %v4431_v40, %v4438_v42  ;;  %8593 = vrot.lane.b32.xlu1 %v8592_v15, %s9010_s16  ;;  %v6088_v33 = vcombine.high %v6022_v62, %v6038_v41  ;;  %v4391_v47 = vcombine.low %v11582_v5, %v3650_v25 }
 0x65b   :  { %v5973_v23 = vcombine.low %v5934_v9, %v5966_v49  ;;  %v5439_v12 = vrot.slane %v7469_v56, %v11296_v14  ;;  %v5455_v51 = vrot.slane %v7471_v32, %v11296_v14  ;;  %v6070_v3 = vrot.slane %v6056_v53, %v11301_v45 }
 0x65c   :  { %v5471_v30 = vrot.slane %v7473_v31, %v11296_v14  ;;  %v5487_v36 = vrot.slane %v7475_v17, %v11296_v14  ;;  %v6102_v46 = vrot.slane %v6088_v33, %v11301_v45  ;;  %v4392_v37 = vcombine.high %v11582_v5, %v3650_v25  ;;  %v3552_v25 = vpop.permute.xlu0 %3551 }
 0x65d   :  { %v4399_v20 = vrot.slane %v4391_v47, %v11296_v14  ;;  %v12461_v24 = vcombine.high %v11492_v18, %v11495_v2  ;;  %v12462_v62 = vcombine.low %v11498_v10, %v11501_v28  ;;  %v12463_v21 = vcombine.high %v11498_v10, %v11501_v28 }
 0x65e   :  { %v4390_v5 = vrot.slane %v4376_v38, %v11296_v14  ;;  %8598 = vrot.lane.b32.xlu1 %v8597_v26, %s9009_s26  ;;  %v6109_v18 = vcombine.low %v6070_v3, %v6102_v46  ;;  %v4406_v2 = vrot.slane %v4392_v37, %v11296_v14  ;;  %v5495_v40 = vcombine.low %v5439_v12, %v5455_v51 }
 0x65f   :  { %v11642_v52 = vrot.slane %v12461_v24, %v11301_v45  ;;  %v11648_v41 = vrot.slane %v12462_v62, %v11301_v45  ;;  %v11654_v61 = vrot.slane %v12463_v21, %v11301_v45  ;;  %v4439_v57 = vcombine.low %v4383_v4, %v4399_v20 }
 0x660   :  { %v4440_v11 = vcombine.high %v4383_v4, %v4399_v20  ;;  %v5496_v42 = vcombine.high %v5439_v12, %v5455_v51  ;;  %v5527_v15 = vcombine.low %v5471_v30, %v5487_v36  ;;  %v5528_v56 = vcombine.high %v5471_v30, %v5487_v36  ;;  %v3624_v36 = vpop.permute.xlu1 %3623 }
 0x661   :  { %v8602_v32 = vpack.i.bf16 %v6109_v18, %v5973_v23  ;;  %v4447_v10 = vrot.slane %v4439_v57, %v11301_v45  ;;  %v4455_v38 = vcombine.low %v4390_v5, %v4406_v2  ;;  %v4456_v31 = vcombine.high %v4390_v5, %v4406_v2  ;;  %v7229_v57 = vld [vmem:[#allocation7 + $0x78] sm:$0xff] }
 0x662   :  { %v4454_v28 = vrot.slane %v4440_v11, %v11301_v45  ;;  %v5974_v17 = vcombine.high %v5934_v9, %v5966_v49  ;;  %v6110_v53 = vcombine.high %v6070_v3, %v6102_v46  ;;  %v4207_v26 = vcombine.low %v11243_v35, %v3528_v39  ;;  %v3600_v49 = vpop.permute.xlu0 %3599  ;;  %v7228_v11 = vld [vmem:[#allocation7 + $0x70] sm:$0xff]  ;;  %8513 = vmatprep.subr.mxu0 %v7229_v57 }
 0x663   :  { %8603 = vrot.lane.b32.xlu1 %v8602_v32, %s9008_s15  ;;  %v4463_v33 = vrot.slane %v4455_v38, %v11301_v45  ;;  %v4208_v12 = vcombine.high %v11243_v35, %v3528_v39  ;;  %v11668_v23 = vrot.slane %v5495_v40, %v11301_v45  ;;  %v4470_v51 = vrot.slane %v4456_v31, %v11301_v45  ;;  %v7227_v31 = vld [vmem:[#allocation7 + $0x68] sm:$0xff] }
 0x664   :  { %v7470_v4 = vcombine.low %v4447_v10, %v4454_v28  ;;  %v7472_v47 = vcombine.high %v4447_v10, %v4454_v28  ;;  %v4215_v30 = vrot.slane %v4207_v26, %v11296_v14  ;;  %v4223_v9 = vcombine.low %v11623_v16, %v3552_v25  ;;  %8514 = vmatpush3.msra.mxu0 %v7229_v57 }
 0x665   :  { %v8607_v46 = vpack.i.bf16 %v6110_v53, %v5974_v17  ;;  %v4222_v37 = vrot.slane %v4208_v12, %v11296_v14  ;;  %v4224_v20 = vcombine.high %v11623_v16, %v3552_v25  ;;  %v7474_v39 = vcombine.low %v4463_v33, %v4470_v51  ;;  %8515 = vmatprep.subr.mxu0 %v7228_v11 }
 0x666   :  { %v5446_v3 = vrot.slane %v7470_v4, %v11296_v14  ;;  %v5462_v35 = vrot.slane %v7472_v47, %v11296_v14  ;;  %v7476_v24 = vcombine.high %v4463_v33, %v4470_v51  ;;  %v4231_v62 = vrot.slane %v4223_v9, %v11296_v14  ;;  %v3648_v33 = vpop.permute.xlu0 %3647  ;;  %8516 = vmatpush3.msra.mxu0 %v7228_v11  ;;  %v7224_v11 = vld [vmem:[#allocation7 + $0x50] sm:$0xff] }
 0x667   :  { %v11679_v21 = vrot.slane %v5496_v42, %v11301_v45  ;;  %8608 = vrot.lane.b32.xlu1 %v8607_v46, %s9007_s27  ;;  %v4238_v5 = vrot.slane %v4224_v20, %v11296_v14  ;;  %v4239_v18 = vcombine.low %v11657_v34, %v3624_v36  ;;  %v4240_v2 = vcombine.high %v11657_v34, %v3624_v36 }
 0x668   :  { %v5478_v16 = vrot.slane %v7474_v39, %v11296_v14  ;;  %v5494_v25 = vrot.slane %v7476_v24, %v11296_v14  ;;  %v4271_v40 = vcombine.low %v4215_v30, %v4231_v62  ;;  %v4272_v32 = vcombine.high %v4215_v30, %v4231_v62  ;;  %8517 = vmatprep.subr.mxu0 %v7227_v31 }
 0x669   :  { %v11688_v42 = vrot.slane %v5527_v15, %v11301_v45  ;;  %v11691_v10 = vrot.slane %v5528_v56, %v11301_v45  ;;  %v4287_v28 = vcombine.low %v4222_v37, %v4238_v5  ;;  %v4288_v38 = vcombine.high %v4222_v37, %v4238_v5  ;;  %v7226_v56 = vld [vmem:[#allocation7 + $0x60] sm:$0xff]  ;;  %8518 = vmatpush3.msra.mxu0 %v7227_v31  ;;  %v7223_v31 = vld [vmem:[#allocation7 + $0x48] sm:$0xff] }
 0x66a   :  { %v5511_v34 = vcombine.low %v5446_v3, %v5462_v35  ;;  %v5512_v17 = vcombine.high %v5446_v3, %v5462_v35  ;;  %v4279_v53 = vrot.slane %v4271_v40, %v11301_v45  ;;  %v4286_v26 = vrot.slane %v4272_v32, %v11301_v45  ;;  %v7225_v35 = vld [vmem:[#allocation7 + $0x58] sm:$0xff]  ;;  %8519 = vmatprep.subr.mxu0 %v7226_v56 }
 0x66b   :  { %v5543_v4 = vcombine.low %v5478_v16, %v5494_v25  ;;  %v5544_v47 = vcombine.high %v5478_v16, %v5494_v25  ;;  %v4295_v15 = vrot.slane %v4287_v28, %v11301_v45  ;;  %v4302_v12 = vrot.slane %v4288_v38, %v11301_v45  ;;  %8520 = vmatpush3.msra.mxu0 %v7226_v56 }
 0x66c   :  { %v7461_v51 = vcombine.low %v4279_v53, %v4286_v26  ;;  %v7463_v30 = vcombine.high %v4279_v53, %v4286_v26  ;;  %v4247_v9 = vrot.slane %v4239_v18, %v11296_v14  ;;  %v4254_v36 = vrot.slane %v4240_v2, %v11296_v14  ;;  %8521 = vmatprep.subr.mxu0 %v7225_v35 }
 0x66d   :  { %v7465_v3 = vcombine.low %v4295_v15, %v4302_v12  ;;  %v7467_v46 = vcombine.high %v4295_v15, %v4302_v12  ;;  %v4255_v37 = vcombine.low %v3600_v49, %v3648_v33  ;;  %v4256_v20 = vcombine.high %v3600_v49, %v3648_v33  ;;  %8522 = vmatpush3.msra.mxu0 %v7225_v35  ;;  %v7222_v12 = vld [vmem:[#allocation7 + $0x40] sm:$0xff] }
 0x66e   :  { %v11700_v39 = vrot.slane %v7461_v51, %v11296_v14  ;;  %v5319_v24 = vrot.slane %v7463_v30, %v11296_v14  ;;  %v7509_v62 = vcombine.low %v11508_v19, %v11511_v43  ;;  %v7511_v5 = vcombine.high %v11508_v19, %v11511_v43  ;;  %8523 = vmatprep.subr.mxu0 %v7224_v11 }
 0x66f   :  { %v11708_v18 = vrot.slane %v7465_v3, %v11296_v14  ;;  %v11711_v2 = vrot.slane %v7467_v46, %v11296_v14  ;;  %v4263_v49 = vrot.slane %v4255_v37, %v11296_v14  ;;  %v4270_v57 = vrot.slane %v4256_v20, %v11296_v14  ;;  %8524 = vmatpush3.msra.mxu0 %v7224_v11  ;;  %v7221_v20 = vld [vmem:[#allocation7 + $0x38] sm:$0xff] }
 0x670   :  { %v11716_v16 = vrot.slane %v5511_v34, %v11301_v45  ;;  %v11719_v25 = vrot.slane %v5512_v17, %v11301_v45  ;;  %v11722_v19 = vrot.slane %v5543_v4, %v11301_v45  ;;  %v11725_v43 = vrot.slane %v5544_v47, %v11301_v45  ;;  %8525 = vmatprep.subr.mxu0 %v7223_v31 }
 0x671   :  { %v5359_v40 = vcombine.low %v11700_v39, %v5319_v24  ;;  %v5360_v32 = vcombine.high %v11700_v39, %v5319_v24  ;;  %v4303_v28 = vcombine.low %v4247_v9, %v4263_v49  ;;  %v4304_v38 = vcombine.high %v4247_v9, %v4263_v49  ;;  %8526 = vmatpush3.msra.mxu0 %v7223_v31 }
 0x672   :  { %v4319_v34 = vcombine.low %v4254_v36, %v4270_v57  ;;  %v4320_v53 = vcombine.high %v4254_v36, %v4270_v57  ;;  %v11730_v17 = vrot.slane %v7509_v62, %v11296_v14  ;;  %v11733_v26 = vrot.slane %v7511_v5, %v11296_v14  ;;  %v11754_v5 = vpop.permute.xlu0 %3533  ;;  %8527 = vmatprep.subr.mxu0 %v7222_v12  ;;  %v7220_v57 = vld [vmem:[#allocation7 + $0x30] sm:$0xff] }
 0x673   :  { %v5391_v33 = vcombine.low %v11708_v18, %v11711_v2  ;;  %v5392_v4 = vcombine.high %v11708_v18, %v11711_v2  ;;  %v4311_v47 = vrot.slane %v4303_v28, %v11301_v45  ;;  %v4318_v15 = vrot.slane %v4304_v38, %v11301_v45  ;;  %8528 = vmatpush3.msra.mxu0 %v7222_v12 }
 0x674   :  { %v4327_v56 = vrot.slane %v4319_v34, %v11301_v45  ;;  %v4334_v51 = vrot.slane %v4320_v53, %v11301_v45  ;;  %v7513_v30 = vcombine.low %v11538_v6, %v11642_v52  ;;  %v7515_v9 = vcombine.high %v11538_v6, %v11642_v52  ;;  %v11756_v6 = vpop.permute.xlu1 %3509  ;;  %8529 = vmatprep.subr.mxu0 %v7221_v20 }
 0x675   :  { %v11748_v36 = vrot.slane %v5359_v40, %v11301_v45  ;;  %v7462_v3 = vcombine.low %v4311_v47, %v4318_v15  ;;  %v7464_v46 = vcombine.high %v4311_v47, %v4318_v15  ;;  %v7517_v37 = vcombine.low %v11438_v55, %v11441_v0  ;;  %8530 = vmatpush3.msra.mxu0 %v7221_v20  ;;  %v7219_v15 = vld [vmem:[#allocation7 + $0x28] sm:$0xff] }
 0x676   :  { %v7466_v35 = vcombine.low %v4327_v56, %v4334_v51  ;;  %v7468_v39 = vcombine.high %v4327_v56, %v4334_v51  ;;  %v6151_v24 = vrot.slane %v7513_v30, %v11296_v14  ;;  %v6167_v62 = vrot.slane %v7515_v9, %v11296_v14  ;;  %8531 = vmatprep.subr.mxu0 %v7220_v57 }
 0x677   :  { %v11759_v52 = vrot.slane %v7462_v3, %v11296_v14  ;;  %v11762_v18 = vrot.slane %v7464_v46, %v11296_v14  ;;  %v6175_v2 = vcombine.low %v11730_v17, %v11733_v26  ;;  %v6255_v49 = vrot.slane %v7517_v37, %v11296_v14  ;;  %8532 = vmatpush3.msra.mxu0 %v7220_v57  ;;  %v11808_v46 = vpop.permute.xlu0 %3581  ;;  %v7217_v57 = vld [vmem:[#allocation7 + $0x18] sm:$0xff] }
 0x678   :  { %v11768_v11 = vrot.slane %v7466_v35, %v11296_v14  ;;  %v11771_v40 = vrot.slane %v7468_v39, %v11296_v14  ;;  %v6207_v28 = vcombine.low %v6151_v24, %v6167_v62  ;;  %v7519_v38 = vcombine.high %v11438_v55, %v11441_v0  ;;  %v3558_v37 = vpop.permute.xlu1 %3557  ;;  %8533 = vmatprep.subr.mxu0 %v7219_v15 }
 0x679   :  { %v11776_v31 = vrot.slane %v5360_v32, %v11301_v45  ;;  %v5375_v34 = vcombine.low %v11759_v52, %v11762_v18  ;;  %v7521_v53 = vcombine.low %v11462_v44, %v11465_v29  ;;  %v7523_v47 = vcombine.high %v11462_v44, %v11465_v29  ;;  %8534 = vmatpush3.msra.mxu0 %v7219_v15 }
 0x67a   :  { %v11785_v12 = vrot.slane %v5391_v33, %v11301_v45  ;;  %v11788_v55 = vrot.slane %v5392_v4, %v11301_v45  ;;  %v11791_v0 = vrot.slane %v6207_v28, %v11301_v45  ;;  %v6271_v32 = vrot.slane %v7519_v38, %v11296_v14  ;;  %v7218_v33 = vld [vmem:[#allocation7 + $0x20] sm:$0xff] }
 0x67b   :  { %v11797_v51 = vrot.slane %v6175_v2, %v11301_v45  ;;  %v6287_v44 = vrot.slane %v7521_v53, %v11296_v14  ;;  %v6303_v29 = vrot.slane %v7523_v47, %v11296_v14  ;;  %v11802_v4 = vrot.slane %v5375_v34, %v11301_v45  ;;  %8535 = vmatprep.subr.mxu0 %v7218_v33 }
 0x67c   :  { %v6311_v3 = vcombine.low %v6255_v49, %v6271_v32  ;;  %v4615_v39 = vcombine.low %v11262_v63, %v11754_v5  ;;  %v6176_v2 = vcombine.high %v11730_v17, %v11733_v26  ;;  %v4616_v28 = vcombine.high %v11262_v63, %v11754_v5  ;;  %8536 = vmatpush3.msra.mxu0 %v7218_v33  ;;  %v7216_v17 = vld [vmem:[#allocation7 + $0x10] sm:$0xff] }
 0x67d   :  { %v6240_v20 = vcombine.high %v11797_v51, %v11791_v0  ;;  %v6343_v35 = vcombine.low %v6287_v44, %v6303_v29  ;;  %v6208_v38 = vcombine.high %v6151_v24, %v6167_v62  ;;  %v6312_v34 = vcombine.high %v6255_v49, %v6271_v32  ;;  %8537 = vmatprep.subr.mxu0 %v7217_v57 }
 0x67e   :  { %v6344_v53 = vcombine.high %v6287_v44, %v6303_v29  ;;  %v11819_v47 = vrot.slane %v6311_v3, %v11301_v45  ;;  %v4623_v30 = vrot.slane %v4615_v39, %v11296_v14  ;;  %v6190_v56 = vrot.slane %v6176_v2, %v11301_v45  ;;  %8538 = vmatpush3.msra.mxu0 %v7217_v57  ;;  %v7215_v44 = vld [vmem:[#allocation7 + $0x8] sm:$0xff]  ;;  %v11839_v39 = vpop.permute.xlu1 %3605  ;;  %v11841_v2 = vpop.permute.xlu0 %3507 }
 0x67f   :  { %v11822_v9 = vrot.slane %v6343_v35, %v11301_v45  ;;  %v6222_v26 = vrot.slane %v6208_v38, %v11301_v45  ;;  %v6326_v63 = vrot.slane %v6312_v34, %v11301_v45  ;;  %v4631_v62 = vcombine.low %v11756_v6, %v3558_v37  ;;  %8539 = vmatprep.subr.mxu0 %v7216_v17 }
 0x680   :  { %v6358_v24 = vrot.slane %v6344_v53, %v11301_v45  ;;  %v4632_v49 = vcombine.high %v11756_v6, %v3558_v37  ;;  %v7510_v15 = vcombine.low %v11514_v59, %v11519_v48  ;;  %v7512_v32 = vcombine.high %v11514_v59, %v11519_v48  ;;  %8540 = vmatpush3.msra.mxu0 %v7216_v17 }
 0x681   :  { %v6376_v5 = vcombine.high %v11819_v47, %v11822_v9  ;;  %v4630_v29 = vrot.slane %v4616_v28, %v11296_v14  ;;  %v6241_v33 = vcombine.low %v6190_v56, %v6222_v26  ;;  %v4639_v3 = vrot.slane %v4631_v62, %v11296_v14  ;;  %8541 = vmatprep.subr.mxu0 %v7215_v44 }
 0x682   :  { %v6242_v35 = vcombine.high %v6190_v56, %v6222_v26  ;;  %v6377_v37 = vcombine.low %v6326_v63, %v6358_v24  ;;  %v4646_v38 = vrot.slane %v4632_v49, %v11296_v14  ;;  %v6378_v34 = vcombine.high %v6326_v63, %v6358_v24  ;;  %v7214_v56 = vld [vmem:[#allocation7] sm:$0xff]  ;;  %8542 = vmatpush3.msra.mxu0 %v7215_v44 }
 0x683   :  { %v8612_v6 = vpack.i.bf16 %v6376_v5, %v6240_v20  ;;  %v4679_v59 = vcombine.low %v4623_v30, %v4639_v3  ;;  %v4680_v48 = vcombine.high %v4623_v30, %v4639_v3  ;;  %v11845_v57 = vrot.slane %v7510_v15, %v11296_v14  ;;  %8543 = vmatprep.subr.mxu0 %v7214_v56 }
 0x684   :  { %v11848_v28 = vrot.slane %v7512_v32, %v11296_v14  ;;  %v8617_v53 = vpack.i.bf16 %v6377_v37, %v6241_v33  ;;  %v4695_v26 = vcombine.low %v4630_v29, %v4646_v38  ;;  %v4696_v20 = vcombine.high %v4630_v29, %v4646_v38  ;;  %8544 = vmatpush3.msra.mxu0 %v7214_v56 }
 0x685   :  { %8613 = vrot.lane.b32.xlu0 %v8612_v6, %s9013_s0  ;;  %v7514_v62 = vcombine.low %v11648_v41, %v11654_v61  ;;  %v4687_v17 = vrot.slane %v4679_v59, %v11301_v45  ;;  %v4694_v30 = vrot.slane %v4680_v48, %v11301_v45  ;;  %v8622_v63 = vpack.i.bf16 %v6378_v34, %v6242_v35  ;;  %v3532_v6 = vpop.permute.xlu1 %3531 }
 0x686   :  { %v7516_v24 = vcombine.high %v11648_v41, %v11654_v61  ;;  %v4703_v5 = vrot.slane %v4695_v26, %v11301_v45  ;;  %v4710_v49 = vrot.slane %v4696_v20, %v11301_v45  ;;  %v7518_v32 = vcombine.low %v11444_v8, %v11447_v50  ;;  %v3556_v41 = vpop.permute.xlu0 %3555 }
 0x687   :  { %v6158_v15 = vrot.slane %v7514_v62, %v11296_v14  ;;  %v7485_v29 = vcombine.low %v4687_v17, %v4694_v30  ;;  %v7487_v33 = vcombine.high %v4687_v17, %v4694_v30  ;;  %v6191_v35 = vcombine.low %v11845_v57, %v11848_v28 }
 0x688   :  { %v6174_v3 = vrot.slane %v7516_v24, %v11296_v14  ;;  %v7489_v61 = vcombine.low %v4703_v5, %v4710_v49  ;;  %v7491_v44 = vcombine.high %v4703_v5, %v4710_v49  ;;  %v6262_v37 = vrot.slane %v7518_v32, %v11296_v14 }
 0x689   :  { %8618 = vrot.lane.b32.xlu0 %v8617_v53, %s9012_s18  ;;  %v7520_v38 = vcombine.high %v11444_v8, %v11447_v50  ;;  %v11870_v34 = vrot.slane %v7485_v29, %v11296_v14  ;;  %v11873_v59 = vrot.slane %v7487_v33, %v11296_v14  ;;  %v7522_v26 = vcombine.low %v11468_v13, %v11471_v22 }
 0x68a   :  { %v6223_v48 = vcombine.low %v6158_v15, %v6174_v3  ;;  %v11878_v56 = vrot.slane %v7489_v61, %v11296_v14  ;;  %v11881_v53 = vrot.slane %v7491_v44, %v11296_v14  ;;  %v7524_v8 = vcombine.high %v11468_v13, %v11471_v22  ;;  %v3604_v61 = vpop.permute.xlu0 %3603 }
 0x68b   :  { %v6278_v20 = vrot.slane %v7520_v38, %v11296_v14  ;;  %v12464_v50 = vcombine.high %v11759_v52, %v11762_v18  ;;  %v12465_v17 = vcombine.low %v11768_v11, %v11771_v40  ;;  %v6294_v5 = vrot.slane %v7522_v26, %v11296_v14 }
 0x68c   :  { %v6231_v24 = vrot.slane %v6223_v48, %v11301_v45  ;;  %v12466_v13 = vcombine.high %v11768_v11, %v11771_v40  ;;  %v6199_v52 = vrot.slane %v6191_v35, %v11301_v45  ;;  %v6310_v18 = vrot.slane %v7524_v8, %v11296_v14  ;;  %v3580_v40 = vpop.permute.xlu1 %3579 }
 0x68d   :  { %v11890_v62 = vrot.slane %v12464_v50, %v11301_v45  ;;  %v11896_v30 = vrot.slane %v12465_v17, %v11301_v45  ;;  %8623 = vrot.lane.b32.xlu0 %v8622_v63, %s9011_s17  ;;  %v6327_v49 = vcombine.low %v6262_v37, %v6278_v20  ;;  %v5767_v32 = vcombine.low %v11870_v34, %v11873_v59 }
 0x68e   :  { %v11904_v22 = vrot.slane %v12466_v13, %v11301_v45  ;;  %v5768_v29 = vcombine.high %v11870_v34, %v11873_v59  ;;  %v5799_v33 = vcombine.low %v11878_v56, %v11881_v53  ;;  %v4479_v11 = vcombine.low %v11273_v27, %v3532_v6 }
 0x68f   :  { %v5800_v63 = vcombine.high %v11878_v56, %v11881_v53  ;;  %v6243_v35 = vcombine.low %v6199_v52, %v6231_v24  ;;  %v6335_v44 = vrot.slane %v6327_v49, %v11301_v45  ;;  %v6359_v38 = vcombine.low %v6294_v5, %v6310_v18 }
 0x690   :  { %v4480_v48 = vcombine.high %v11273_v27, %v3532_v6  ;;  %v4487_v26 = vrot.slane %v4479_v11, %v11296_v14  ;;  %v4495_v34 = vcombine.low %v11841_v2, %v3556_v41  ;;  %v4496_v59 = vcombine.high %v11841_v2, %v3556_v41 }
 0x691   :  { %v6367_v8 = vrot.slane %v6359_v38, %v11301_v45  ;;  %v6244_v50 = vcombine.high %v6199_v52, %v6231_v24  ;;  %v6192_v17 = vcombine.high %v11845_v57, %v11848_v28  ;;  %v6224_v13 = vcombine.high %v6158_v15, %v6174_v3  ;;  %v3628_v28 = vpop.permute.xlu1 %3627  ;;  %v3652_v15 = vpop.permute.xlu0 %3651 }
 0x692   :  { %v4494_v56 = vrot.slane %v4480_v48, %v11296_v14  ;;  %v4503_v53 = vrot.slane %v4495_v34, %v11296_v14  ;;  %v4510_v49 = vrot.slane %v4496_v59, %v11296_v14  ;;  %v6328_v27 = vcombine.high %v6262_v37, %v6278_v20 }
 0x693   :  { %v6379_v6 = vcombine.low %v6335_v44, %v6367_v8  ;;  %v6380_v11 = vcombine.high %v6335_v44, %v6367_v8  ;;  %v11930_v54 = vrot.slane %v6192_v17, %v11301_v45  ;;  %v11933_v2 = vrot.slane %v6224_v13, %v11301_v45 }
 0x694   :  { %v4543_v41 = vcombine.low %v4487_v26, %v4503_v53  ;;  %v4544_v24 = vcombine.high %v4487_v26, %v4503_v53  ;;  %v4559_v52 = vcombine.low %v4494_v56, %v4510_v49  ;;  %v4560_v57 = vcombine.high %v4494_v56, %v4510_v49 }
 0x695   :  { %v8627_v3 = vpack.i.bf16 %v6379_v6, %v6243_v35  ;;  %v8632_v38 = vpack.i.bf16 %v6380_v11, %v6244_v50  ;;  %v6245_v48 = vcombine.low %v11930_v54, %v11933_v2  ;;  %v6342_v37 = vrot.slane %v6328_v27, %v11301_v45 }
 0x696   :  { %v4551_v20 = vrot.slane %v4543_v41, %v11301_v45  ;;  %v4558_v44 = vrot.slane %v4544_v24, %v11301_v45  ;;  %v4567_v34 = vrot.slane %v4559_v52, %v11301_v45  ;;  %v4574_v59 = vrot.slane %v4560_v57, %v11301_v45 }
 0x697   :  { %8628 = vrot.lane.b32.xlu0 %v8627_v3, %s9010_s16  ;;  %v6360_v26 = vcombine.high %v6294_v5, %v6310_v18  ;;  %v4511_v8 = vcombine.low %v3580_v40, %v3628_v28  ;;  %v4512_v17 = vcombine.high %v3580_v40, %v3628_v28  ;;  %v4527_v35 = vcombine.low %v3604_v61, %v3652_v15 }
 0x698   :  { %v7477_v50 = vcombine.low %v4551_v20, %v4558_v44  ;;  %v7479_v13 = vcombine.high %v4551_v20, %v4558_v44  ;;  %v7481_v56 = vcombine.low %v4567_v34, %v4574_v59  ;;  %v7483_v53 = vcombine.high %v4567_v34, %v4574_v59  ;;  %v3654_v59 = vpop.permute.xlu1 %3653 }
 0x699   :  { %v6374_v49 = vrot.slane %v6360_v26, %v11301_v45  ;;  %v4519_v27 = vrot.slane %v4511_v8, %v11296_v14  ;;  %v4526_v6 = vrot.slane %v4512_v17, %v11296_v14  ;;  %v4528_v11 = vcombine.high %v3604_v61, %v3652_v15  ;;  %v3630_v26 = vpop.permute.xlu0 %3629 }
 0x69a   :  { %v5575_v41 = vrot.slane %v7477_v50, %v11296_v14  ;;  %v5591_v24 = vrot.slane %v7479_v13, %v11296_v14  ;;  %v5607_v5 = vrot.slane %v7481_v56, %v11296_v14  ;;  %v5623_v18 = vrot.slane %v7483_v53, %v11296_v14 }
 0x69b   :  { %v11951_v40 = vrot.slane %v5767_v32, %v11301_v45  ;;  %8633 = vrot.lane.b32.xlu0 %v8632_v38, %s9009_s26  ;;  %v6381_v52 = vcombine.low %v6342_v37, %v6374_v49  ;;  %v4535_v57 = vrot.slane %v4527_v35, %v11296_v14  ;;  %v4542_v28 = vrot.slane %v4528_v11, %v11296_v14 }
 0x69c   :  { %v11957_v61 = vrot.slane %v5768_v29, %v11301_v45  ;;  %v11960_v15 = vrot.slane %v5799_v33, %v11301_v45  ;;  %v11963_v3 = vrot.slane %v5800_v63, %v11301_v45  ;;  %v6246_v32 = vcombine.high %v11930_v54, %v11933_v2 }
 0x69d   :  { %v8637_v20 = vpack.i.bf16 %v6381_v52, %v6245_v48  ;;  %v4575_v44 = vcombine.low %v4519_v27, %v4535_v57  ;;  %v4576_v38 = vcombine.high %v4519_v27, %v4535_v57  ;;  %v4591_v34 = vcombine.low %v4526_v6, %v4542_v28 }
 0x69e   :  { %v5631_v8 = vcombine.low %v5575_v41, %v5591_v24  ;;  %v5632_v17 = vcombine.high %v5575_v41, %v5591_v24  ;;  %v5663_v35 = vcombine.low %v5607_v5, %v5623_v18  ;;  %v5664_v29 = vcombine.high %v5607_v5, %v5623_v18 }
 0x69f   :  { %8638 = vrot.lane.b32.xlu0 %v8637_v20, %s9008_s15  ;;  %v4583_v33 = vrot.slane %v4575_v44, %v11301_v45  ;;  %v4590_v63 = vrot.slane %v4576_v38, %v11301_v45  ;;  %v4592_v50 = vcombine.high %v4526_v6, %v4542_v28  ;;  %v4599_v13 = vrot.slane %v4591_v34, %v11301_v45 }
 0x6a0   :  { %v6382_v54 = vcombine.high %v6342_v37, %v6374_v49  ;;  %v4663_v2 = vcombine.low %v11839_v39, %v3654_v59  ;;  %v4664_v48 = vcombine.high %v11839_v39, %v3654_v59  ;;  %v4647_v56 = vcombine.low %v11808_v46, %v3630_v26 }
 0x6a1   :  { %v4606_v53 = vrot.slane %v4592_v50, %v11301_v45  ;;  %v7478_v27 = vcombine.low %v4583_v33, %v4590_v63  ;;  %v7480_v11 = vcombine.high %v4583_v33, %v4590_v63  ;;  %v4648_v41 = vcombine.high %v11808_v46, %v3630_v26 }
 0x6a2   :  { %v8642_v24 = vpack.i.bf16 %v6382_v54, %v6246_v32  ;;  %v4671_v5 = vrot.slane %v4663_v2, %v11296_v14  ;;  %v4678_v6 = vrot.slane %v4664_v48, %v11296_v14  ;;  %v4655_v18 = vrot.slane %v4647_v56, %v11296_v14 }
 0x6a3   :  { %v5582_v37 = vrot.slane %v7478_v27, %v11296_v14  ;;  %v5598_v49 = vrot.slane %v7480_v11, %v11296_v14  ;;  %v7482_v39 = vcombine.low %v4599_v13, %v4606_v53  ;;  %v7484_v52 = vcombine.high %v4599_v13, %v4606_v53 }
 0x6a4   :  { %v11982_v57 = vrot.slane %v5631_v8, %v11301_v45  ;;  %8643 = vrot.lane.b32.xlu0 %v8642_v24, %s9007_s27  ;;  %v4662_v46 = vrot.slane %v4648_v41, %v11296_v14  ;;  %v4711_v28 = vcombine.low %v4655_v18, %v4671_v5  ;;  %v4712_v32 = vcombine.high %v4655_v18, %v4671_v5 }
 0x6a5   :  { %v11987_v20 = vrot.slane %v5632_v17, %v11301_v45  ;;  %v5614_v44 = vrot.slane %v7482_v39, %v11296_v14  ;;  %v5630_v38 = vrot.slane %v7484_v52, %v11296_v14  ;;  %v7525_v34 = vcombine.low %v11748_v36, %v11776_v31 }
 0x6a6   :  { %v4719_v59 = vrot.slane %v4711_v28, %v11301_v45  ;;  %v4726_v26 = vrot.slane %v4712_v32, %v11301_v45  ;;  %v4727_v8 = vcombine.low %v4662_v46, %v4678_v6  ;;  %v4728_v33 = vcombine.high %v4662_v46, %v4678_v6 }
 0x6a7   :  { %v11996_v63 = vrot.slane %v5663_v35, %v11301_v45  ;;  %v11999_v50 = vrot.slane %v5664_v29, %v11301_v45  ;;  %v5647_v17 = vcombine.low %v5582_v37, %v5598_v49  ;;  %v5648_v13 = vcombine.high %v5582_v37, %v5598_v49 }
 0x6a8   :  { %v4735_v54 = vrot.slane %v4727_v8, %v11301_v45  ;;  %v4742_v2 = vrot.slane %v4728_v33, %v11301_v45  ;;  %v7486_v48 = vcombine.low %v4719_v59, %v4726_v26  ;;  %v7488_v56 = vcombine.high %v4719_v59, %v4726_v26 }
 0x6a9   :  { %v5679_v53 = vcombine.low %v5614_v44, %v5630_v38  ;;  %v5680_v27 = vcombine.high %v5614_v44, %v5630_v38  ;;  %v6391_v11 = vrot.slane %v7525_v34, %v11296_v14  ;;  %v7527_v41 = vcombine.high %v11748_v36, %v11776_v31 }
 0x6aa   :  { %v12007_v35 = vrot.slane %v7486_v48, %v11296_v14  ;;  %v12010_v29 = vrot.slane %v7488_v56, %v11296_v14  ;;  %v7490_v24 = vcombine.low %v4735_v54, %v4742_v2  ;;  %v7492_v5 = vcombine.high %v4735_v54, %v4742_v2 }
 0x6ab   :  { %v6407_v6 = vrot.slane %v7527_v41, %v11296_v14  ;;  %v7529_v18 = vcombine.low %v11802_v4, %v11890_v62  ;;  %v7531_v37 = vcombine.high %v11802_v4, %v11890_v62  ;;  %v7533_v49 = vcombine.low %v11668_v23, %v11679_v21 }
 0x6ac   :  { %v12020_v36 = vrot.slane %v5647_v17, %v11301_v45  ;;  %v5750_v31 = vrot.slane %v7490_v24, %v11296_v14  ;;  %v5766_v39 = vrot.slane %v7492_v5, %v11296_v14  ;;  %v5783_v52 = vcombine.low %v12007_v35, %v12010_v29 }
 0x6ad   :  { %v12027_v46 = vrot.slane %v5648_v13, %v11301_v45  ;;  %v12030_v28 = vrot.slane %v5679_v53, %v11301_v45  ;;  %v6423_v4 = vrot.slane %v7529_v18, %v11296_v14  ;;  %v6439_v62 = vrot.slane %v7531_v37, %v11296_v14 }
 0x6ae   :  { %v12035_v32 = vrot.slane %v5680_v27, %v11301_v45  ;;  %v5784_v44 = vcombine.high %v12007_v35, %v12010_v29  ;;  %v6447_v38 = vcombine.low %v6391_v11, %v6407_v6  ;;  %v6527_v34 = vrot.slane %v7533_v49, %v11296_v14 }
 0x6af   :  { %v5815_v59 = vcombine.low %v5750_v31, %v5766_v39  ;;  %v6479_v26 = vcombine.low %v6423_v4, %v6439_v62  ;;  %v7535_v8 = vcombine.high %v11668_v23, %v11679_v21  ;;  %v7537_v33 = vcombine.low %v11716_v16, %v11719_v25 }
 0x6b0   :  { %v12045_v17 = vrot.slane %v5783_v52, %v11301_v45  ;;  %v5816_v13 = vcombine.high %v5750_v31, %v5766_v39  ;;  %v7539_v54 = vcombine.high %v11716_v16, %v11719_v25  ;;  %v6448_v2 = vcombine.high %v6391_v11, %v6407_v6 }
 0x6b1   :  { %v12050_v48 = vrot.slane %v6479_v26, %v11301_v45  ;;  %v6543_v56 = vrot.slane %v7535_v8, %v11296_v14  ;;  %v6559_v53 = vrot.slane %v7537_v33, %v11296_v14  ;;  %v6480_v27 = vcombine.high %v6423_v4, %v6439_v62 }
 0x6b2   :  { %v12055_v23 = vrot.slane %v6447_v38, %v11301_v45  ;;  %v6575_v21 = vrot.slane %v7539_v54, %v11296_v14  ;;  %v7526_v41 = vcombine.low %v11785_v12, %v11788_v55  ;;  %v7528_v16 = vcombine.high %v11785_v12, %v11788_v55 }
 0x6b3   :  { %v12063_v25 = vrot.slane %v5815_v59, %v11301_v45  ;;  %v6583_v11 = vcombine.low %v6527_v34, %v6543_v56  ;;  %v6494_v24 = vrot.slane %v6480_v27, %v11301_v45  ;;  %v6584_v5 = vcombine.high %v6527_v34, %v6543_v56 }
 0x6b4   :  { %v6615_v6 = vcombine.low %v6559_v53, %v6575_v21  ;;  %v6616_v18 = vcombine.high %v6559_v53, %v6575_v21  ;;  %v6398_v37 = vrot.slane %v7526_v41, %v11296_v14  ;;  %v6414_v49 = vrot.slane %v7528_v16, %v11296_v14 }
 0x6b5   :  { %v12069_v31 = vrot.slane %v5816_v13, %v11301_v45  ;;  %v6512_v39 = vcombine.high %v12055_v23, %v12050_v48  ;;  %v12074_v12 = vrot.slane %v6583_v11, %v11301_v45  ;;  %v6462_v55 = vrot.slane %v6448_v2, %v11301_v45 }
 0x6b6   :  { %v12078_v52 = vrot.slane %v6615_v6, %v11301_v45  ;;  %v6630_v4 = vrot.slane %v6616_v18, %v11301_v45  ;;  %v7530_v62 = vcombine.low %v11896_v30, %v11904_v22  ;;  %v7532_v38 = vcombine.high %v11896_v30, %v11904_v22 }
 0x6b7   :  { %v6513_v34 = vcombine.low %v6462_v55, %v6494_v24  ;;  %v7534_v59 = vcombine.low %v11688_v42, %v11691_v10  ;;  %v7536_v26 = vcombine.high %v11688_v42, %v11691_v10  ;;  %v7538_v8 = vcombine.low %v11722_v19, %v11725_v43 }
 0x6b8   :  { %v6648_v33 = vcombine.high %v12074_v12, %v12078_v52  ;;  %v6598_v13 = vrot.slane %v6584_v5, %v11301_v45  ;;  %v6430_v54 = vrot.slane %v7530_v62, %v11296_v14  ;;  %v6463_v2 = vcombine.low %v6398_v37, %v6414_v49 }
 0x6b9   :  { %v6514_v56 = vcombine.high %v6462_v55, %v6494_v24  ;;  %v6446_v30 = vrot.slane %v7532_v38, %v11296_v14  ;;  %v6534_v22 = vrot.slane %v7534_v59, %v11296_v14  ;;  %v6550_v53 = vrot.slane %v7536_v26, %v11296_v14 }
 0x6ba   :  { %v8647_v27 = vpack.i.bf16 %v6648_v33, %v6512_v39  ;;  %v6649_v42 = vcombine.low %v6598_v13, %v6630_v4  ;;  %v6650_v10 = vcombine.high %v6598_v13, %v6630_v4  ;;  %v6566_v21 = vrot.slane %v7538_v8, %v11296_v14 }
 0x6bb   :  { %v6495_v41 = vcombine.low %v6430_v54, %v6446_v30  ;;  %v7540_v16 = vcombine.high %v11722_v19, %v11725_v43  ;;  %v6599_v11 = vcombine.low %v6534_v22, %v6550_v53  ;;  %v6464_v5 = vcombine.high %v6398_v37, %v6414_v49 }
 0x6bc   :  { %8648 = vrot.lane.b32.xlu1 %v8647_v27, %s9013_s0  ;;  %v6471_v24 = vrot.slane %v6463_v2, %v11301_v45  ;;  %v6496_v6 = vcombine.high %v6430_v54, %v6446_v30  ;;  %v7542_v18 = vcombine.low %v11996_v63, %v11999_v50  ;;  %v7544_v39 = vcombine.high %v11996_v63, %v11999_v50 }
 0x6bd   :  { %v8652_v55 = vpack.i.bf16 %v6649_v42, %v6513_v34  ;;  %v8657_v4 = vpack.i.bf16 %v6650_v10, %v6514_v56  ;;  %v6503_v62 = vrot.slane %v6495_v41, %v11301_v45  ;;  %v6582_v38 = vrot.slane %v7540_v16, %v11296_v14 }
 0x6be   :  { %v6607_v19 = vrot.slane %v6599_v11, %v11301_v45  ;;  %v6600_v43 = vcombine.high %v6534_v22, %v6550_v53  ;;  %v12111_v37 = vrot.slane %v7542_v18, %v11296_v14  ;;  %v12114_v49 = vrot.slane %v7544_v39, %v11296_v14 }
 0x6bf   :  { %v6631_v59 = vcombine.low %v6566_v21, %v6582_v38  ;;  %v6478_v26 = vrot.slane %v6464_v5, %v11301_v45  ;;  %v6510_v63 = vrot.slane %v6496_v6, %v11301_v45  ;;  %v6632_v50 = vcombine.high %v6566_v21, %v6582_v38 }
 0x6c0   :  { %8653 = vrot.lane.b32.xlu1 %v8652_v55, %s9012_s18  ;;  %v6515_v34 = vcombine.low %v6471_v24, %v6503_v62  ;;  %v6516_v8 = vcombine.high %v6471_v24, %v6503_v62  ;;  %v7546_v33 = vcombine.low %v12030_v28, %v12035_v32  ;;  %v7548_v13 = vcombine.high %v12030_v28, %v12035_v32 }
 0x6c1   :  { %v6639_v54 = vrot.slane %v6631_v59, %v11301_v45  ;;  %v6646_v2 = vrot.slane %v6632_v50, %v11301_v45  ;;  %v6735_v56 = vcombine.low %v12111_v37, %v12114_v49  ;;  %v7550_v30 = vcombine.low %v11960_v15, %v11963_v3 }
 0x6c2   :  { %v6702_v22 = vrot.slane %v7546_v33, %v11296_v14  ;;  %v6718_v53 = vrot.slane %v7548_v13, %v11296_v14  ;;  %v7552_v27 = vcombine.high %v11960_v15, %v11963_v3  ;;  %v7554_v28 = vcombine.low %v12063_v25, %v12069_v31 }
 0x6c3   :  { %v5798_v32 = vrot.slane %v5784_v44, %v11301_v45  ;;  %v6651_v42 = vcombine.low %v6607_v19, %v6639_v54  ;;  %v6517_v10 = vcombine.low %v6478_v26, %v6510_v63  ;;  %v6614_v21 = vrot.slane %v6600_v43, %v11301_v45  ;;  %v12157_v38 = vpop.permute.xlu1 %8583 }
 0x6c4   :  { %8658 = vrot.lane.b32.xlu1 %v8657_v4, %s9011_s17  ;;  %v6652_v41 = vcombine.high %v6607_v19, %v6639_v54  ;;  %v6767_v16 = vcombine.low %v6702_v22, %v6718_v53  ;;  %v6806_v11 = vrot.slane %v7550_v30, %v11296_v14  ;;  %v6822_v15 = vrot.slane %v7552_v27, %v11296_v14 }
 0x6c5   :  { %v6653_v3 = vcombine.low %v6614_v21, %v6646_v2  ;;  %v6518_v5 = vcombine.high %v6478_v26, %v6510_v63  ;;  %v6654_v24 = vcombine.high %v6614_v21, %v6646_v2  ;;  %v12144_v6 = vrot.slane %v6735_v56, %v11301_v45 }
 0x6c6   :  { %v8662_v35 = vpack.i.bf16 %v6651_v42, %v6515_v34  ;;  %v8667_v29 = vpack.i.bf16 %v6652_v41, %v6516_v8  ;;  %v6838_v44 = vrot.slane %v7554_v28, %v11296_v14  ;;  %v7556_v18 = vcombine.high %v12063_v25, %v12069_v31 }
 0x6c7   :  { %v7541_v39 = vcombine.low %v11982_v57, %v11987_v20  ;;  %v7543_v55 = vcombine.high %v11982_v57, %v11987_v20  ;;  %v7545_v4 = vcombine.low %v12020_v36, %v12027_v46  ;;  %v7547_v62 = vcombine.high %v12020_v36, %v12027_v46 }
 0x6c8   :  { %8663 = vrot.lane.b32.xlu1 %v8662_v35, %s9010_s16  ;;  %v12161_v19 = vrot.slane %v6767_v16, %v11301_v45  ;;  %v6854_v25 = vrot.slane %v7556_v18, %v11296_v14  ;;  %v6871_v31 = vcombine.low %v6806_v11, %v6822_v15  ;;  %v7549_v43 = vcombine.low %v11951_v40, %v11957_v61  ;;  %v8579_v35 = vpop.permute.xlu0 %8578 }
 0x6c9   :  { %v6663_v57 = vrot.slane %v7541_v39, %v11296_v14  ;;  %v6679_v20 = vrot.slane %v7543_v55, %v11296_v14  ;;  %v6695_v59 = vrot.slane %v7545_v4, %v11296_v14  ;;  %v6711_v36 = vrot.slane %v7547_v62, %v11296_v14 }
 0x6ca   :  { %v6903_v46 = vcombine.low %v6838_v44, %v6854_v25  ;;  %v6799_v26 = vrot.slane %v7549_v43, %v11296_v14  ;;  %v7551_v63 = vcombine.high %v11951_v40, %v11957_v61  ;;  %v7553_v50 = vcombine.low %v12045_v17, %v5798_v32 }
 0x6cb   :  { %v6719_v34 = vcombine.low %v6663_v57, %v6679_v20  ;;  %v6751_v8 = vcombine.low %v6695_v59, %v6711_v36  ;;  %v7555_v33 = vcombine.high %v12045_v17, %v5798_v32  ;;  %v6736_v13 = vcombine.high %v12111_v37, %v12114_v49 }
 0x6cc   :  { %8668 = vrot.lane.b32.xlu1 %v8667_v29, %s9009_s26  ;;  %v12179_v54 = vrot.slane %v6903_v46, %v11301_v45  ;;  %v6815_v2 = vrot.slane %v7551_v63, %v11296_v14  ;;  %v6831_v56 = vrot.slane %v7553_v50, %v11296_v14  ;;  %v6768_v30 = vcombine.high %v6702_v22, %v6718_v53  ;;  %v12187_v28 = vpop.permute.xlu1 %8593 }
 0x6cd   :  { %v8672_v40 = vpack.i.bf16 %v6653_v3, %v6517_v10  ;;  %v8677_v61 = vpack.i.bf16 %v6654_v24, %v6518_v5  ;;  %v12184_v27 = vrot.slane %v6871_v31, %v11301_v45  ;;  %v6847_v17 = vrot.slane %v7555_v33, %v11296_v14 }
 0x6ce   :  { %v12190_v37 = vrot.slane %v6751_v8, %v11301_v45  ;;  %v6855_v49 = vcombine.low %v6799_v26, %v6815_v2  ;;  %v12193_v32 = vrot.slane %v6768_v30, %v11301_v45  ;;  %v6872_v42 = vcombine.high %v6806_v11, %v6822_v15 }
 0x6cf   :  { %v6788_v22 = vcombine.high %v12144_v6, %v12161_v19  ;;  %v6887_v53 = vcombine.low %v6831_v56, %v6847_v17  ;;  %v6904_v10 = vcombine.high %v6838_v44, %v6854_v25  ;;  %v6720_v21 = vcombine.high %v6663_v57, %v6679_v20 }
 0x6d0   :  { %8673 = vrot.lane.b32.xlu1 %v8672_v40, %s9008_s15  ;;  %v6924_v14 = vcombine.high %v12184_v27, %v12179_v54  ;;  %v12201_v41 = vrot.slane %v6719_v34, %v11301_v45  ;;  %v12204_v16 = vrot.slane %v6855_v49, %v11301_v45  ;;  %v12207_v3 = vrot.slane %v6736_v13, %v11301_v45  ;;  %v12218_v29 = vpop.permute.xlu1 %8598 }
 0x6d1   :  { %v12210_v11 = vrot.slane %v6887_v53, %v11301_v45  ;;  %v12213_v15 = vrot.slane %v6872_v42, %v11301_v45  ;;  %v12216_v5 = vrot.slane %v6904_v10, %v11301_v45  ;;  %v6752_v24 = vcombine.high %v6695_v59, %v6711_v36 }
 0x6d2   :  { %v6784_v44 = vcombine.high %v12201_v41, %v12190_v37  ;;  %v6790_v18 = vcombine.high %v12207_v3, %v12193_v32  ;;  %v6856_v39 = vcombine.high %v6799_v26, %v6815_v2  ;;  %v6888_v55 = vcombine.high %v6831_v56, %v6847_v17 }
 0x6d3   :  { %v6920_v4 = vcombine.high %v12204_v16, %v12210_v11  ;;  %v6926_v62 = vcombine.high %v12213_v15, %v12216_v5  ;;  %v6734_v25 = vrot.slane %v6720_v21, %v11301_v45  ;;  %v6766_v31 = vrot.slane %v6752_v24, %v11301_v45 }
 0x6d4   :  { %8678 = vrot.lane.b32.xlu1 %v8677_v61, %s9007_s27  ;;  %v8702_v43 = vpack.i.bf16 %v6924_v14, %v6788_v22  ;;  %v6870_v57 = vrot.slane %v6856_v39, %v11301_v45  ;;  %v6902_v20 = vrot.slane %v6888_v55, %v11301_v45  ;;  %v6787_v59 = vcombine.low %v12144_v6, %v12161_v19  ;;  %v8589_v19 = vpop.permute.xlu0 %8588 }
 0x6d5   :  { %v8682_v36 = vpack.i.bf16 %v6920_v4, %v6784_v44  ;;  %v8712_v46 = vpack.i.bf16 %v6926_v62, %v6790_v18  ;;  %v6785_v26 = vcombine.low %v6734_v25, %v6766_v31  ;;  %v6923_v63 = vcombine.low %v12184_v27, %v12179_v54  ;;  %v8604_v50 = vpop.permute.xlu1 %8603 }
 0x6d6   :  { %v6921_v34 = vcombine.low %v6870_v57, %v6902_v20  ;;  %v6786_v8 = vcombine.high %v6734_v25, %v6766_v31  ;;  %v6922_v33 = vcombine.high %v6870_v57, %v6902_v20  ;;  %v8586_v13 = vunpack.i.h.bf16 %v12157_v38 }
 0x6d7   :  { %8683 = vrot.lane.b32.xlu0 %v8682_v36, %s9013_s0  ;;  %v8585_v2 = vunpack.i.l.bf16 %v12157_v38  ;;  %v5967_v45 = vcombine.low %v11552_v1, %v11555_v7  ;;  %v6103_v6 = vcombine.low %v11558_v58, %v11577_v60  ;;  %v8581_v30 = vunpack.i.h.bf16 %v8579_v35 }
 0x6d8   :  { %8703 = vrot.lane.b32.xlu1 %v8702_v43, %s9009_s26  ;;  %v8687_v54 = vpack.i.bf16 %v6921_v34, %v6785_v26  ;;  %v8692_v56 = vpack.i.bf16 %v6922_v33, %v6786_v8  ;;  %v8580_v40 = vunpack.i.l.bf16 %v8579_v35  ;;  %v8596_v61 = vunpack.i.h.bf16 %v12187_v28 }
 0x6d9   :  { %v8595_v27 = vunpack.i.l.bf16 %v12187_v28  ;;  %v7153_v38 = vsel %vm7151_vm1, %v6103_v6, %v8581_v30  ;;  %v8591_v7 = vunpack.i.h.bf16 %v8589_v19  ;;  %v8590_v58 = vunpack.i.l.bf16 %v8589_v19  ;;  %v8609_v49 = vpop.permute.xlu1 %8608 }
 0x6da   :  { %v7152_v1 = vsel %vm7151_vm1, %v5967_v45, %v8580_v40  ;;  %v7162_v17 = vsel %vm7160_vm2, %v7153_v38, %v8586_v13  ;;  %v8601_v22 = vunpack.i.h.bf16 %v12218_v29  ;;  %v8600_v53 = vunpack.i.l.bf16 %v12218_v29 }
 0x6db   :  { %8688 = vrot.lane.b32.xlu0 %v8687_v54, %s9012_s18  ;;  %v7161_v60 = vsel %vm7160_vm2, %v7152_v1, %v8585_v2  ;;  %v7171_v42 = vsel %vm7169_vm3, %v7162_v17, %v8591_v7  ;;  %v8606_v21 = vunpack.i.h.bf16 %v8604_v50  ;;  %v8605_v14 = vunpack.i.l.bf16 %v8604_v50 }
 0x6dc   :  { %8713 = vrot.lane.b32.xlu1 %v8712_v46, %s9007_s27  ;;  %v7170_v28 = vsel %vm7169_vm3, %v7161_v60, %v8590_v58  ;;  %v7180_v10 = vsel %vm7178_vm4, %v7171_v42, %v8596_v61  ;;  %v8611_v35 = vunpack.i.h.bf16 %v8609_v49  ;;  %v8610_v44 = vunpack.i.l.bf16 %v8609_v49 }
 0x6dd   :  { %v7189_v24 = vsel %vm7187_vm5, %v7180_v10, %v8601_v22  ;;  %v7179_v18 = vsel %vm7178_vm4, %v7170_v28, %v8595_v27  ;;  %v8697_v39 = vpack.i.bf16 %v6923_v63, %v6787_v59  ;;  %v6925_v29 = vcombine.low %v12213_v15, %v12216_v5 }
 0x6de   :  { %v7198_v55 = vsel %vm7196_vm6, %v7189_v24, %v8606_v21  ;;  %v7188_v4 = vsel %vm7187_vm5, %v7179_v18, %v8600_v53  ;;  %v6511_v31 = vcombine.low %v12055_v23, %v12050_v48  ;;  %v6647_v57 = vcombine.low %v12074_v12, %v12078_v52 }
 0x6df   :  { %8693 = vrot.lane.b32.xlu0 %v8692_v56, %s9011_s17  ;;  %v7197_v62 = vsel %vm7196_vm6, %v7188_v4, %v8605_v14  ;;  %v7207_v25 = vsel %vm7205_vm7, %v7198_v55, %v8611_v35  ;;  %v6783_v20 = vcombine.low %v12201_v41, %v12190_v37  ;;  %v6919_v59 = vcombine.low %v12204_v16, %v12210_v11 }
 0x6e0   :  { %v7206_v43 = vsel %vm7205_vm7, %v7197_v62, %v8610_v44  ;;  %v6789_v15 = vcombine.low %v12207_v3, %v12193_v32  ;;  %v6239_v2 = vcombine.low %v11797_v51, %v11791_v0  ;;  %v6375_v45 = vcombine.low %v11819_v47, %v11822_v9 }
 0x6e1   :  { %8545 = vmatprep.mubr.f32.mxu0 %v7206_v43 }
 0x6e2   :  { %8546 = vmatmul.mubr.f32.vlgmr.msra.gmra.mxu0 %v7207_v25  ;;  %v8707_v5 = vpack.i.bf16 %v6925_v29, %v6789_v15 }
 0x6e3   :  { %8698 = vrot.lane.b32.xlu0 %v8697_v39, %s9010_s16 }
 0x6e7   :  { %8708 = vrot.lane.b32.xlu0 %v8707_v5, %s9008_s15 }
 0x6f7   :  { %v8614_v36 = vpop.permute.xlu0 %8613 }
 0x6f8   :  { %v8616_v34 = vunpack.i.h.bf16 %v8614_v36  ;;  %v8615_v8 = vunpack.i.l.bf16 %v8614_v36 }
 0x6fa   :  { %v7155_v56 = vsel %vm7151_vm1, %v6375_v45, %v8616_v34  ;;  %v7154_v30 = vsel %vm7151_vm1, %v6239_v2, %v8615_v8 }
 0x6fb   :  { %v8619_v46 = vpop.permute.xlu0 %8618 }
 0x6fc   :  { %v8621_v33 = vunpack.i.h.bf16 %v8619_v46  ;;  %v8620_v13 = vunpack.i.l.bf16 %v8619_v46 }
 0x6fe   :  { %v7163_v27 = vsel %vm7160_vm2, %v7154_v30, %v8620_v13  ;;  %v7164_v38 = vsel %vm7160_vm2, %v7155_v56, %v8621_v33 }
 0x6ff   :  { %v8624_v26 = vpop.permute.xlu0 %8623 }
 0x700   :  { %v8626_v32 = vunpack.i.h.bf16 %v8624_v26  ;;  %v8625_v3 = vunpack.i.l.bf16 %v8624_v26 }
 0x702   :  { %v7172_v51 = vsel %vm7169_vm3, %v7163_v27, %v8625_v3  ;;  %v7173_v9 = vsel %vm7169_vm3, %v7164_v38, %v8626_v32 }
 0x709   :  { %v8629_v63 = vpop.permute.xlu0 %8628 }
 0x70a   :  { %v8631_v19 = vunpack.i.h.bf16 %v8629_v63  ;;  %v8630_v54 = vunpack.i.l.bf16 %v8629_v63 }
 0x70c   :  { %v7181_v47 = vsel %vm7178_vm4, %v7172_v51, %v8630_v54  ;;  %v7182_v7 = vsel %vm7178_vm4, %v7173_v9, %v8631_v19 }
 0x70d   :  { %v8634_v50 = vpop.permute.xlu0 %8633 }
 0x70e   :  { %v8636_v40 = vunpack.i.h.bf16 %v8634_v50  ;;  %v8635_v61 = vunpack.i.l.bf16 %v8634_v50 }
 0x710   :  { %v7190_v49 = vsel %vm7187_vm5, %v7181_v47, %v8635_v61  ;;  %v7191_v28 = vsel %vm7187_vm5, %v7182_v7, %v8636_v40 }
 0x711   :  { %v8639_v6 = vpop.permute.xlu0 %8638 }
 0x712   :  { %v8641_v1 = vunpack.i.h.bf16 %v8639_v6  ;;  %v8640_v0 = vunpack.i.l.bf16 %v8639_v6 }
 0x714   :  { %v7199_v42 = vsel %vm7196_vm6, %v7190_v49, %v8640_v0  ;;  %v7200_v22 = vsel %vm7196_vm6, %v7191_v28, %v8641_v1 }
 0x716   :  { %v8644_v58 = vpop.permute.xlu0 %8643 }
 0x717   :  { %v8646_v60 = vunpack.i.h.bf16 %v8644_v58  ;;  %v8645_v17 = vunpack.i.l.bf16 %v8644_v58 }
 0x719   :  { %v7208_v53 = vsel %vm7205_vm7, %v7199_v42, %v8645_v17  ;;  %v7209_v10 = vsel %vm7205_vm7, %v7200_v22, %v8646_v60 }
 0x71a   :  { %8548 = vmatprep.mubr.f32.mxu0 %v7208_v53 }
 0x71b   :  { %8549 = vmatmul.mubr.f32.gmra.mxu0 %v7209_v10 }
 0x72e   :  { %v8649_v21 = vpop.permute.xlu1 %8648 }
 0x72f   :  { %v8651_v18 = vunpack.i.h.bf16 %v8649_v21  ;;  %v8650_v39 = vunpack.i.l.bf16 %v8649_v21 }
 0x731   :  { %v7157_v5 = vsel %vm7151_vm1, %v6647_v57, %v8651_v18  ;;  %v7156_v36 = vsel %vm7151_vm1, %v6511_v31, %v8650_v39  ;;  %v12467_v39 = vld [vmem:[#allocation20_spill] sm:$0xff] }
 0x732   :  { %v8654_v14 = vpop.permute.xlu1 %8653 }
 0x733   :  { %v8656_v55 = vunpack.i.h.bf16 %v8654_v14  ;;  %v8655_v4 = vunpack.i.l.bf16 %v8654_v14 }
 0x735   :  { %v7165_v63 = vsel %vm7160_vm2, %v7156_v36, %v8655_v4  ;;  %v7166_v50 = vsel %vm7160_vm2, %v7157_v5, %v8656_v55  ;;  %v7232_v55 = vsub.s32 5, %v12467_v39  ;;  %v8910_v4 = vld [vmem:[%s12351_s3] sm:$0xff]  ;;  %s9016_s3 = smov [#allocation8]  }
 0x736   :  { %v8659_v24 = vpop.permute.xlu1 %8658  ;;  %s7352_s15 = sshll.u32 %s9016_s3, 4  ;;  %s7353_s15 = int_to_ptr.vmem [resolvable:$true] %s7352_s15 }
 0x737   :  { %v8661_v29 = vunpack.i.h.bf16 %v8659_v24  ;;  %v8660_v62 = vunpack.i.l.bf16 %v8659_v24  ;;  %s8971_s26 = scalar_lea.vmem %s7353_s15, 1024  ;;  %p8976_p2 = scmp.lt.s32.totalorder %s7353_s15, %s7353_s15 }
 0x738   :  { %p8972_p1 = scmp.ne.s32.totalorder %s7353_s15, %s8971_s26  ;;  %p8977_p3 = scmp.lt.s32.totalorder %s8971_s26, %s8971_s26 }
 0x739   :  { %v7174_v33 = vsel %vm7169_vm3, %v7165_v63, %v8660_v62  ;;  %v7175_v13 = vsel %vm7169_vm3, %v7166_v50, %v8661_v29  ;;  %v7233_v29 = vrot.slane %v8910_v4, %v7232_v55 }
 0x73a   :  { %v8664_v35 = vpop.permute.xlu1 %8663  ;;  %p8978_p4 = por %p8977_p3, %p8976_p2 }
 0x73b   :  { %v8666_v25 = vunpack.i.h.bf16 %v8664_v35  ;;  %v8665_v43 = vunpack.i.l.bf16 %v8664_v35 }
 0x73c   :  { %p8979_p5 = pnand %p8978_p4, %p8972_p1 }
 0x73d   :  { %v7183_v12 = vsel %vm7178_vm4, %v7174_v33, %v8665_v43  ;;  %v7184_v52 = vsel %vm7178_vm4, %v7175_v13, %v8666_v25 }
 0x73e   :  { %v8669_v44 = vpop.permute.xlu1 %8668 }
 0x73f   :  { %v8671_v46 = vunpack.i.h.bf16 %v8669_v44  ;;  %v8670_v26 = vunpack.i.l.bf16 %v8669_v44 }
 0x741   :  { %v7192_v31 = vsel %vm7187_vm5, %v7183_v12, %v8670_v26  ;;  %v7193_v2 = vsel %vm7187_vm5, %v7184_v52, %v8671_v46 }
 0x742   :  { %v8674_v15 = vpop.permute.xlu1 %8673 }
 0x743   :  { %v8676_v34 = vunpack.i.h.bf16 %v8674_v15  ;;  %v8675_v8 = vunpack.i.l.bf16 %v8674_v15 }
 0x745   :  { %v7201_v45 = vsel %vm7196_vm6, %v7192_v31, %v8675_v8  ;;  %v7202_v32 = vsel %vm7196_vm6, %v7193_v2, %v8676_v34 }
 0x746   :  { %v8679_v57 = vpop.permute.xlu1 %8678 }
 0x747   :  { %v8681_v48 = vunpack.i.h.bf16 %v8679_v57  ;;  %v8680_v23 = vunpack.i.l.bf16 %v8679_v57 }
 0x749   :  { %v8684_v3 = vpop.permute.xlu0 %8683  ;;  %v7210_v6 = vsel %vm7205_vm7, %v7201_v45, %v8680_v23  ;;  %v7211_v19 = vsel %vm7205_vm7, %v7202_v32, %v8681_v48 }
 0x74a   :  { %8551 = vmatprep.mubr.f32.mxu0 %v7210_v6  ;;  %v8686_v56 = vunpack.i.h.bf16 %v8684_v3  ;;  %v8685_v30 = vunpack.i.l.bf16 %v8684_v3  ;;  %v8704_v61 = vpop.permute.xlu1 %8703 }
 0x74b   :  { %8552 = vmatmul.mubr.f32.gmra.mxu0 %v7211_v19  ;;  %v8705_v37 = vunpack.i.l.bf16 %v8704_v61 }
 0x74c   :  { %v7159_v51 = vsel %vm7151_vm1, %v6919_v59, %v8686_v56  ;;  %v7158_v9 = vsel %vm7151_vm1, %v6783_v20, %v8685_v30  ;;  %v8706_v59 = vunpack.i.h.bf16 %v8704_v61 }
 0x74d   :  { %v8689_v54 = vpop.permute.xlu0 %8688 }
 0x74e   :  { %v8691_v27 = vunpack.i.h.bf16 %v8689_v54  ;;  %v8690_v38 = vunpack.i.l.bf16 %v8689_v54  ;;  %v8714_v42 = vpop.permute.xlu1 %8713 }
 0x74f   :  { %v8716_v53 = vunpack.i.h.bf16 %v8714_v42  ;;  %v8715_v10 = vunpack.i.l.bf16 %v8714_v42 }
 0x750   :  { %v7167_v7 = vsel %vm7160_vm2, %v7158_v9, %v8690_v38  ;;  %v7168_v58 = vsel %vm7160_vm2, %v7159_v51, %v8691_v27 }
 0x751   :  { %v8694_v40 = vpop.permute.xlu0 %8693 }
 0x752   :  { %v8696_v1 = vunpack.i.h.bf16 %v8694_v40  ;;  %v8695_v0 = vunpack.i.l.bf16 %v8694_v40 }
 0x754   :  { %v7176_v49 = vsel %vm7169_vm3, %v7167_v7, %v8695_v0  ;;  %v7177_v28 = vsel %vm7169_vm3, %v7168_v58, %v8696_v1 }
 0x755   :  { %v8699_v47 = vpop.permute.xlu0 %8698 }
 0x756   :  { %v8701_v60 = vunpack.i.h.bf16 %v8699_v47  ;;  %v8700_v17 = vunpack.i.l.bf16 %v8699_v47 }
 0x758   :  { %v7185_v16 = vsel %vm7178_vm4, %v7176_v49, %v8700_v17  ;;  %v7186_v11 = vsel %vm7178_vm4, %v7177_v28, %v8701_v60 }
 0x759   :  { %v8709_v41 = vpop.permute.xlu0 %8708  ;;  %v7194_v21 = vsel %vm7187_vm5, %v7185_v16, %v8705_v37  ;;  %v7195_v14 = vsel %vm7187_vm5, %v7186_v11, %v8706_v59 }
 0x75a   :  { %v8711_v20 = vunpack.i.h.bf16 %v8709_v41  ;;  %v8710_v22 = vunpack.i.l.bf16 %v8709_v41 }
 0x75c   :  { %v7203_v24 = vsel %vm7196_vm6, %v7194_v21, %v8710_v22  ;;  %v7204_v35 = vsel %vm7196_vm6, %v7195_v14, %v8711_v20 }
 0x75d   :  { %v7212_v44 = vsel %vm7205_vm7, %v7203_v24, %v8715_v10  ;;  %v7213_v18 = vsel %vm7205_vm7, %v7204_v35, %v8716_v53 }
 0x75e   :  { %8554 = vmatprep.mubr.f32.mxu0 %v7212_v44 }
 0x75f   :  { %8555 = vmatmul.mubr.f32.gmra.mxu0 %v7213_v18 }
 0x7a2   :  { %v8547_v62 = vpop.f32.mrf.mxu0 }
 0x7a3   :  { %v7306_v25 = vadd.f32 %v8547_v62, %v7233_v29 }
 0x7a4   :  { %v7300_v43 = vpop.f32.mrf.mxu0 }
 0x7a5   :  { %7340 = vst [vmem:[#allocation8 + $0x8] sm:$0xff] %v7306_v25  ;;  %v7301_v15 = vadd.f32 %v7300_v43, %v7233_v29 }
 0x7a7   :  { %7339 = vst [vmem:[#allocation8] sm:$0xff] %v7301_v15 }
 0x7db   :  { %v8550_v5 = vpop.f32.mrf.mxu0 }
 0x7dc   :  { %v7316_v36 = vadd.f32 %v8550_v5, %v7233_v29 }
 0x7dd   :  { %v7310_v46 = vpop.f32.mrf.mxu0 }
 0x7de   :  { %7342 = vst [vmem:[#allocation8 + $0x18] sm:$0xff] %v7316_v36  ;;  %v7311_v26 = vadd.f32 %v7310_v46, %v7233_v29 }
 0x7e0   :  { %7341 = vst [vmem:[#allocation8 + $0x10] sm:$0xff] %v7311_v26 }
 0x80b   :  { %v8553_v63 = vpop.f32.mrf.mxu0 }
 0x80c   :  { %v7326_v50 = vadd.f32 %v8553_v63, %v7233_v29 }
 0x80d   :  { %v7320_v34 = vpop.f32.mrf.mxu0 }
 0x80e   :  { %7344 = vst [vmem:[#allocation8 + $0x28] sm:$0xff] %v7326_v50  ;;  %v7321_v8 = vadd.f32 %v7320_v34, %v7233_v29 }
 0x810   :  { %7343 = vst [vmem:[#allocation8 + $0x20] sm:$0xff] %v7321_v8 }
 0x81f   :  { %v8556_v33 = vpop.f32.mrf.mxu0 }
 0x820   :  { %v7336_v13 = vadd.f32 %v8556_v33, %v7233_v29 }
 0x821   :  { %v7330_v12 = vpop.f32.mrf.mxu0 }
 0x822   :  { %7346 = vst [vmem:[#allocation8 + $0x38] sm:$0xff] %v7336_v13  ;;  %v7331_v52 = vadd.f32 %v7330_v12, %v7233_v29 }
 0x824   :  { %7345 = vst [vmem:[#allocation8 + $0x30] sm:$0xff] %v7331_v52 }
 0x825   :  { %8982 = shalt.err (!%p8979_p5)
}
 0x826   :  { %7358 = dma.vmem_to_hbm [thread:$0]  %s7353_s15, 1024, %s12355_s7, [#allocation4], %s9001_s11, %s9001_s11, %s9002_s12  }
 0x827   :  { %8995 = dma.done.wait [#allocation4], 1024  }
 0x828   :  { %8996 = vsyncadd [#allocation4], 4294966272 }
 0x829   :  { %7362 = vsyncpa [#allocation3], 1 }
 0x82a   :  { %7363 = vsyncpa [#allocation6], 1 }
 0x82b   :  { %7364 = vsyncpa [#allocation4], 1 }

</bundles_post_ra>
